<compile_context>
chip_gen: v7x
topology: tpu7x:2x2x1
jax: 0.10.0
libtpu: 0.0.40
codegen_flags: <defaults>
</compile_context>

<pallas_src>
import math
from functools import partial

import jax
import jax.numpy as jnp
from jax.experimental import pallas as pl
from jax.experimental.pallas import tpu as pltpu


# ---------------------------------------------------------------------------
# Parameter init (synthetic deterministic weights — pretrained HF checkpoints
# cannot be loaded here).  Encoder weights are stacked with a leading axis of
# size 2: index 0 = history encoder (self.model), index 1 = llm encoder (self.bert).
# QKV / output-projection weights are packed per (layer, q/k/v, head) so the
# kernel never slices the lane dimension.
# ---------------------------------------------------------------------------

def _norm(key, shape, scale=0.02, dtype=jnp.float32):
    return (scale * jax.random.normal(key, shape, dtype=jnp.float32)).astype(dtype)


def init_params(key, cfg, n_enc=2):
    H, INTER, L, NH = cfg["hidden"], cfg["inter"], cfg["n_layers"], cfg["n_heads"]
    V, P = cfg["vocab"], cfg["max_pos"]
    dh = H // NH
    ks = iter(jax.random.split(key, 32))

    enc = dict(
        word_emb=_norm(next(ks), (n_enc, V, H)),
        pos_emb=_norm(next(ks), (n_enc, P, H)),
        type_emb=_norm(next(ks), (n_enc, H)),
        emb_ln_g=jnp.ones((n_enc, 1, H), jnp.float32),
        emb_ln_b=jnp.zeros((n_enc, 1, H), jnp.float32),
        # packed: index = layer*3*NH + {0:q,1:k,2:v}*NH + head
        wqkv=_norm(next(ks), (n_enc, L * 3 * NH, H, dh), dtype=jnp.bfloat16),
        bqkv=jnp.zeros((n_enc, L * 3 * NH, 1, dh), jnp.float32),
        # packed: index = layer*NH + head
        wo=_norm(next(ks), (n_enc, L * NH, dh, H), dtype=jnp.bfloat16),
        bo=jnp.zeros((n_enc, L, 1, H), jnp.float32),
        ln1_g=jnp.ones((n_enc, L, 1, H), jnp.float32),
        ln1_b=jnp.zeros((n_enc, L, 1, H), jnp.float32),
        w1=_norm(next(ks), (n_enc, L, H, INTER), dtype=jnp.bfloat16),
        b1=jnp.zeros((n_enc, L, 1, INTER), jnp.float32),
        w2=_norm(next(ks), (n_enc, L, INTER, H), dtype=jnp.bfloat16),
        b2=jnp.zeros((n_enc, L, 1, H), jnp.float32),
        ln2_g=jnp.ones((n_enc, L, 1, H), jnp.float32),
        ln2_b=jnp.zeros((n_enc, L, 1, H), jnp.float32),
    )

    D, C = cfg["item_dim"], cfg["n_classes"]
    head = dict(
        gw_wa=_norm(next(ks), (D, D), dtype=jnp.bfloat16), gw_ba=jnp.zeros((1, D), jnp.float32),
        gw_wb=_norm(next(ks), (D, D), dtype=jnp.bfloat16), gw_bb=jnp.zeros((1, D), jnp.float32),
        rec_w1=_norm(next(ks), (D, D), dtype=jnp.bfloat16), rec_b1=jnp.zeros((1, D), jnp.float32),
        rec_w2=_norm(next(ks), (D, D), dtype=jnp.bfloat16), rec_b2=jnp.zeros((1, D), jnp.float32),
        gate_wx=_norm(next(ks), (D, D), dtype=jnp.bfloat16),
        gate_wr=_norm(next(ks), (D, D), dtype=jnp.bfloat16),
        gate_b=jnp.zeros((1, D), jnp.float32),
        cls_w=_norm(next(ks), (D, C), dtype=jnp.bfloat16), cls_b=jnp.zeros((1, C), jnp.float32),
    )
    return enc, head


# ---------------------------------------------------------------------------
# Fused kernels
# ---------------------------------------------------------------------------

def make_forward(cfg):
    H, INTER, L, NH = cfg["hidden"], cfg["inter"], cfg["n_layers"], cfg["n_heads"]
    dh = H // NH
    scale = 1.0 / math.sqrt(dh)
    f32, bf16 = jnp.float32, jnp.bfloat16

    def _ln(v, g, b, eps=1e-12):
        mu = jnp.mean(v, axis=-1, keepdims=True)
        var = jnp.mean((v - mu) ** 2, axis=-1, keepdims=True)
        return (v - mu) * jax.lax.rsqrt(var + eps) * g + b

    def _mm(a, w):  # bf16 MXU operands, f32 accumulation
        return jnp.dot(a.astype(bf16), w, preferred_element_type=f32)

    # ----- fused dual-encoder: embedding-LN + L transformer layers + pooling --
    def dual_encoder(enc, x_emb, mask_f, pool_w):
        NE, BS, _ = x_emb.shape
        B, S = mask_f.shape[1], mask_f.shape[2]

        def kernel(x_ref, mask_ref, pool_ref, eg_ref, eb_ref,
                   wqkv_ref, bqkv_ref, wo_ref, bo_ref,
                   ln1g_ref, ln1b_ref, w1_ref, b1_ref, w2_ref, b2_ref,
                   ln2g_ref, ln2b_ref, out_ref):
            x = _ln(x_ref[...], eg_ref[...], eb_ref[...])        # (BS, H)
            bias = (1.0 - mask_ref[...]) * (-1e9)                 # (B, S)

            for l in range(L):
                # --- multi-head self-attention (all heads in this invocation) ---
                attn = None
                for h in range(NH):
                    iq = l * 3 * NH + 0 * NH + h
                    ik = l * 3 * NH + 1 * NH + h
                    iv = l * 3 * NH + 2 * NH + h
                    qh = (_mm(x, wqkv_ref[iq]) + bqkv_ref[iq]).reshape(B, S, dh)
                    kh = (_mm(x, wqkv_ref[ik]) + bqkv_ref[ik]).reshape(B, S, dh)
                    vh = (_mm(x, wqkv_ref[iv]) + bqkv_ref[iv]).reshape(B, S, dh)
                    s = jnp.einsum("bqd,bkd->bqk", qh.astype(bf16), kh.astype(bf16),
                                   preferred_element_type=f32) * scale
                    s = s + bias[:, None, :]
                    s = s - jnp.max(s, axis=-1, keepdims=True)
                    p = jnp.exp(s)
                    p = p / jnp.sum(p, axis=-1, keepdims=True)
                    ch = jnp.einsum("bqk,bkd->bqd", p.astype(bf16), vh.astype(bf16),
                                    preferred_element_type=f32)
                    contrib = _mm(ch.reshape(BS, dh), wo_ref[l * NH + h])
                    attn = contrib if attn is None else attn + contrib
                x = _ln(x + attn + bo_ref[l], ln1g_ref[l], ln1b_ref[l])

                # --- feed-forward ---
                hmid = jax.nn.gelu(_mm(x, w1_ref[l]) + b1_ref[l], approximate=True)
                # TODO(synk): HF BERT uses exact (erf) GELU; tanh approximation used here.
                x = _ln(x + _mm(hmid, w2_ref[l]) + b2_ref[l], ln2g_ref[l], ln2b_ref[l])

            # pooling as a single (B, B*S) @ (B*S, H) matmul ('avg' or 'cls' matrix)
            out_ref[...] = jnp.dot(pool_ref[...], x, preferred_element_type=f32)

        args = (x_emb, mask_f, pool_w, enc["emb_ln_g"], enc["emb_ln_b"],
                enc["wqkv"], enc["bqkv"], enc["wo"], enc["bo"],
                enc["ln1_g"], enc["ln1_b"], enc["w1"], enc["b1"],
                enc["w2"], enc["b2"], enc["ln2_g"], enc["ln2_b"])

        def enc_spec(a):
            nd = a.ndim

            def idx(e):
                return (e,) + (0,) * (nd - 1)

            return pl.BlockSpec((None,) + tuple(a.shape[1:]), idx)

        return pl.pallas_call(
            kernel,
            out_shape=jax.ShapeDtypeStruct((NE, B, H), jnp.float32),
            grid=(NE,),
            in_specs=[enc_spec(a) for a in args],
            out_specs=pl.BlockSpec((None, B, H), lambda e: (e, 0, 0)),
            compiler_params=pltpu.CompilerParams(dimension_semantics=("parallel",)),
        )(*args)

    # ----- fused head: GateFusion + rec_head + GatedResidual + classifier -----
    def head_forward(head, llm_emb, hist_emb):
        B = llm_emb.shape[0]
        C = head["cls_w"].shape[1]

        def kernel(a_ref, b_ref, wa_ref, ba_ref, wb_ref, bb_ref,
                   rw1_ref, rb1_ref, rw2_ref, rb2_ref,
                   gwx_ref, gwr_ref, gb_ref, cw_ref, cb_ref, o_ref):
            a = a_ref[...]
            b = b_ref[...]
            # GateFusion
            g = jax.nn.sigmoid(_mm(a, wa_ref[...]) + ba_ref[...]
                               + _mm(b, wb_ref[...]) + bb_ref[...])
            fused = g * a + (1.0 - g) * b
            # rec_head (Feedforward)
            rec = jax.nn.gelu(_mm(fused, rw1_ref[...]) + rb1_ref[...], approximate=True)
            rec = _mm(rec, rw2_ref[...]) + rb2_ref[...]
            # rec_gate (GatedResidual)
            gg = jax.nn.sigmoid(_mm(rec, gwx_ref[...]) + _mm(fused, gwr_ref[...]) + gb_ref[...])
            out = gg * rec + (1.0 - gg) * fused
            # classifier
            o_ref[...] = _mm(out, cw_ref[...]) + cb_ref[...]

        args = (llm_emb, hist_emb,
                head["gw_wa"], head["gw_ba"], head["gw_wb"], head["gw_bb"],
                head["rec_w1"], head["rec_b1"], head["rec_w2"], head["rec_b2"],
                head["gate_wx"], head["gate_wr"], head["gate_b"],
                head["cls_w"], head["cls_b"])

        def full_spec(a):
            nd = a.ndim

            def idx():
                return (0,) * nd

            return pl.BlockSpec(a.shape, idx)

        return pl.pallas_call(
            kernel,
            out_shape=jax.ShapeDtypeStruct((B, C), jnp.float32),
            in_specs=[full_spec(a) for a in args],
            out_specs=pl.BlockSpec((B, C), lambda: (0, 0)),
        )(*args)

    # ----- full forward (jitted; embedding gathers & pooling matrices are glue) --
    @jax.jit
    def fwd(enc, head, hist_ids, hist_mask, llm_ids, llm_mask):
        B, S = hist_ids.shape

        def embed(e, ids):
            return (enc["word_emb"][e][ids]
                    + enc["pos_emb"][e, :S][None, :, :]
                    + enc["type_emb"][e][None, None, :]).reshape(B * S, H)

        x_emb = jnp.stack([embed(0, hist_ids), embed(1, llm_ids)])              # (2, B*S, H)
        mask_f = jnp.stack([hist_mask.astype(f32), llm_mask.astype(f32)])       # (2, B, S)

        # pooling matrices: 'avg' (masked mean) for history, 'cls' (token 0) for llm
        eye = jnp.eye(B, dtype=f32)
        w_avg = mask_f[0] / jnp.maximum(jnp.sum(mask_f[0], axis=-1, keepdims=True), 1e-9)
        w_cls = jnp.zeros((B, S), f32).at[:, 0].set(1.0)
        pool_w = jnp.stack([
            (eye[:, :, None] * w_avg[None, :, :]).reshape(B, B * S),
            (eye[:, :, None] * w_cls[None, :, :]).reshape(B, B * S),
        ])                                                                      # (2, B, B*S)

        pooled = dual_encoder(enc, x_emb, mask_f, pool_w)   # (2, B, H)
        history_embeds = pooled[0]
        llm_embeddings = pooled[1]
        return head_forward(head, llm_embeddings, history_embeds)

    return fwd


# ---------------------------------------------------------------------------
# BERTModel (use_bert=True, use_llm_embedding=False, pooling_strategy='avg',
#            pooling_method='cls'); inference path only.
# ---------------------------------------------------------------------------

class BERTModelPallas:
    def __init__(self, key, cfg):
        self.cfg = cfg
        self.enc_params, self.head_params = init_params(key, cfg)
        self._fwd = make_forward(cfg)

    def forward(self, history_tokens, llm_tokens, llm_compressed_tokens=None, labels=None):
        logits = self._fwd(self.enc_params, self.head_params,
                           history_tokens["input_ids"], history_tokens["attention_mask"],
                           llm_tokens["input_ids"], llm_tokens["attention_mask"])
        # TODO(synk): training branch (CrossEntropyLoss(label_smoothing=0.1) + 0.3 *
        # ContrastiveLoss(0.07, 0.1)) not implemented — ContrastiveLoss is undefined
        # in the reference source; inference path (labels=None) returns logits only.
        return {"logits": logits, "loss": None, "loss_cl": None, "loss_rec": None}


# ---------------------------------------------------------------------------

if __name__ == "__main__":
    cfg = dict(vocab=64, max_pos=16, hidden=32, n_heads=2, n_layers=2, inter=64,
               item_dim=32, n_classes=10)

    key = jax.random.PRNGKey(0)
    k_params, k_hist, k_llm = jax.random.split(key, 3)
    model = BERTModelPallas(k_params, cfg)

    B, S = 2, 8
    hist_ids = jax.random.randint(k_hist, (B, S), 0, cfg["vocab"], dtype=jnp.int32)
    llm_ids = jax.random.randint(k_llm, (B, S), 0, cfg["vocab"], dtype=jnp.int32)
    hist_mask = jnp.ones((B, S), jnp.int32).at[1, 6:].set(0)
    llm_mask = jnp.ones((B, S), jnp.int32).at[0, 5:].set(0)

    history_tokens = {"input_ids": hist_ids, "attention_mask": hist_mask}
    llm_tokens = {"input_ids": llm_ids, "attention_mask": llm_mask}

    out = model.forward(history_tokens, llm_tokens, llm_compressed_tokens=None)
    logits = jax.block_until_ready(out["logits"])
    assert logits.shape == (B, cfg["n_classes"]), logits.shape
    assert bool(jnp.all(jnp.isfinite(logits)))
    print("KERNEL_OK")
</pallas_src>

<mosaic_0001>
module attributes {stable_mosaic.version = 11 : i64} {
  func.func @kernel(%arg0: memref<2x32xf32, #tpu.memory_space<vmem>>, %arg1: memref<2x32xf32, #tpu.memory_space<vmem>>, %arg2: memref<32x32xbf16, #tpu.memory_space<vmem>>, %arg3: memref<1x32xf32, #tpu.memory_space<vmem>>, %arg4: memref<32x32xbf16, #tpu.memory_space<vmem>>, %arg5: memref<1x32xf32, #tpu.memory_space<vmem>>, %arg6: memref<32x32xbf16, #tpu.memory_space<vmem>>, %arg7: memref<1x32xf32, #tpu.memory_space<vmem>>, %arg8: memref<32x32xbf16, #tpu.memory_space<vmem>>, %arg9: memref<1x32xf32, #tpu.memory_space<vmem>>, %arg10: memref<32x32xbf16, #tpu.memory_space<vmem>>, %arg11: memref<32x32xbf16, #tpu.memory_space<vmem>>, %arg12: memref<1x32xf32, #tpu.memory_space<vmem>>, %arg13: memref<32x10xbf16, #tpu.memory_space<vmem>>, %arg14: memref<1x10xf32, #tpu.memory_space<vmem>>, %arg15: memref<2x10xf32, #tpu.memory_space<vmem>>) attributes {dimension_semantics = [], scalar_prefetch = 0 : i64, scratch_operands = 0 : i64, tpu.core_type = #tpu.core_type<tc>} {
    %c0 = arith.constant 0 : index
    %c0_0 = arith.constant 0 : index
    %0 = vector.load %arg0[%c0, %c0_0] : memref<2x32xf32, #tpu.memory_space<vmem>>, vector<2x32xf32>
    %c0_1 = arith.constant 0 : index
    %c0_2 = arith.constant 0 : index
    %1 = vector.load %arg1[%c0_1, %c0_2] : memref<2x32xf32, #tpu.memory_space<vmem>>, vector<2x32xf32>
    %c0_3 = arith.constant 0 : index
    %c0_4 = arith.constant 0 : index
    %2 = vector.load %arg2[%c0_3, %c0_4] : memref<32x32xbf16, #tpu.memory_space<vmem>>, vector<32x32xbf16>
    %3 = arith.truncf %0 : vector<2x32xf32> to vector<2x32xbf16>
    %cst = arith.constant dense<0.000000e+00> : vector<2x32xf32>
    %4 = tpu.matmul %3, %2, %cst {dimension_numbers = #tpu.dot_dimension_numbers<[1], [0], [0], [1], [0, 0, 1, 1], [], []>} : vector<2x32xbf16>, vector<32x32xbf16>, vector<2x32xf32> -> vector<2x32xf32>
    %c0_5 = arith.constant 0 : index
    %c0_6 = arith.constant 0 : index
    %5 = vector.load %arg3[%c0_5, %c0_6] : memref<1x32xf32, #tpu.memory_space<vmem>>, vector<1x32xf32>
    %6 = vector.broadcast %5 : vector<1x32xf32> to vector<2x32xf32>
    %7 = arith.addf %4, %6 : vector<2x32xf32>
    %c0_7 = arith.constant 0 : index
    %c0_8 = arith.constant 0 : index
    %8 = vector.load %arg4[%c0_7, %c0_8] : memref<32x32xbf16, #tpu.memory_space<vmem>>, vector<32x32xbf16>
    %9 = arith.truncf %1 : vector<2x32xf32> to vector<2x32xbf16>
    %cst_9 = arith.constant dense<0.000000e+00> : vector<2x32xf32>
    %10 = tpu.matmul %9, %8, %cst_9 {dimension_numbers = #tpu.dot_dimension_numbers<[1], [0], [0], [1], [0, 0, 1, 1], [], []>} : vector<2x32xbf16>, vector<32x32xbf16>, vector<2x32xf32> -> vector<2x32xf32>
    %11 = arith.addf %7, %10 : vector<2x32xf32>
    %c0_10 = arith.constant 0 : index
    %c0_11 = arith.constant 0 : index
    %12 = vector.load %arg5[%c0_10, %c0_11] : memref<1x32xf32, #tpu.memory_space<vmem>>, vector<1x32xf32>
    %13 = vector.broadcast %12 : vector<1x32xf32> to vector<2x32xf32>
    %14 = arith.addf %11, %13 : vector<2x32xf32>
    %15 = arith.negf %14 : vector<2x32xf32>
    %16 = math.exp %15 : vector<2x32xf32>
    %cst_12 = arith.constant 1.000000e+00 : f32
    %17 = vector.broadcast %cst_12 : f32 to vector<2x32xf32>
    %18 = arith.addf %17, %16 : vector<2x32xf32>
    %19 = arith.divf %17, %18 : vector<2x32xf32>
    %20 = arith.mulf %19, %0 : vector<2x32xf32>
    %cst_13 = arith.constant 1.000000e+00 : f32
    %21 = vector.broadcast %cst_13 : f32 to vector<2x32xf32>
    %22 = arith.subf %21, %19 : vector<2x32xf32>
    %23 = arith.mulf %22, %1 : vector<2x32xf32>
    %24 = arith.addf %20, %23 : vector<2x32xf32>
    %c0_14 = arith.constant 0 : index
    %c0_15 = arith.constant 0 : index
    %25 = vector.load %arg6[%c0_14, %c0_15] : memref<32x32xbf16, #tpu.memory_space<vmem>>, vector<32x32xbf16>
    %26 = arith.truncf %24 : vector<2x32xf32> to vector<2x32xbf16>
    %cst_16 = arith.constant dense<0.000000e+00> : vector<2x32xf32>
    %27 = tpu.matmul %26, %25, %cst_16 {dimension_numbers = #tpu.dot_dimension_numbers<[1], [0], [0], [1], [0, 0, 1, 1], [], []>} : vector<2x32xbf16>, vector<32x32xbf16>, vector<2x32xf32> -> vector<2x32xf32>
    %c0_17 = arith.constant 0 : index
    %c0_18 = arith.constant 0 : index
    %28 = vector.load %arg7[%c0_17, %c0_18] : memref<1x32xf32, #tpu.memory_space<vmem>>, vector<1x32xf32>
    %29 = vector.broadcast %28 : vector<1x32xf32> to vector<2x32xf32>
    %30 = arith.addf %27, %29 : vector<2x32xf32>
    %31 = arith.mulf %30, %30 : vector<2x32xf32>
    %32 = arith.mulf %30, %31 : vector<2x32xf32>
    %cst_19 = arith.constant 4.471500e-02 : f32
    %33 = vector.broadcast %cst_19 : f32 to vector<2x32xf32>
    %34 = arith.mulf %33, %32 : vector<2x32xf32>
    %35 = arith.addf %30, %34 : vector<2x32xf32>
    %cst_20 = arith.constant 0.797884583 : f32
    %36 = vector.broadcast %cst_20 : f32 to vector<2x32xf32>
    %37 = arith.mulf %36, %35 : vector<2x32xf32>
    %38 = math.tanh %37 : vector<2x32xf32>
    %cst_21 = arith.constant 1.000000e+00 : f32
    %39 = vector.broadcast %cst_21 : f32 to vector<2x32xf32>
    %40 = arith.addf %39, %38 : vector<2x32xf32>
    %cst_22 = arith.constant 5.000000e-01 : f32
    %41 = vector.broadcast %cst_22 : f32 to vector<2x32xf32>
    %42 = arith.mulf %41, %40 : vector<2x32xf32>
    %43 = arith.mulf %30, %42 : vector<2x32xf32>
    %c0_23 = arith.constant 0 : index
    %c0_24 = arith.constant 0 : index
    %44 = vector.load %arg8[%c0_23, %c0_24] : memref<32x32xbf16, #tpu.memory_space<vmem>>, vector<32x32xbf16>
    %45 = arith.truncf %43 : vector<2x32xf32> to vector<2x32xbf16>
    %cst_25 = arith.constant dense<0.000000e+00> : vector<2x32xf32>
    %46 = tpu.matmul %45, %44, %cst_25 {dimension_numbers = #tpu.dot_dimension_numbers<[1], [0], [0], [1], [0, 0, 1, 1], [], []>} : vector<2x32xbf16>, vector<32x32xbf16>, vector<2x32xf32> -> vector<2x32xf32>
    %c0_26 = arith.constant 0 : index
    %c0_27 = arith.constant 0 : index
    %47 = vector.load %arg9[%c0_26, %c0_27] : memref<1x32xf32, #tpu.memory_space<vmem>>, vector<1x32xf32>
    %48 = vector.broadcast %47 : vector<1x32xf32> to vector<2x32xf32>
    %49 = arith.addf %46, %48 : vector<2x32xf32>
    %c0_28 = arith.constant 0 : index
    %c0_29 = arith.constant 0 : index
    %50 = vector.load %arg10[%c0_28, %c0_29] : memref<32x32xbf16, #tpu.memory_space<vmem>>, vector<32x32xbf16>
    %51 = arith.truncf %49 : vector<2x32xf32> to vector<2x32xbf16>
    %cst_30 = arith.constant dense<0.000000e+00> : vector<2x32xf32>
    %52 = tpu.matmul %51, %50, %cst_30 {dimension_numbers = #tpu.dot_dimension_numbers<[1], [0], [0], [1], [0, 0, 1, 1], [], []>} : vector<2x32xbf16>, vector<32x32xbf16>, vector<2x32xf32> -> vector<2x32xf32>
    %c0_31 = arith.constant 0 : index
    %c0_32 = arith.constant 0 : index
    %53 = vector.load %arg11[%c0_31, %c0_32] : memref<32x32xbf16, #tpu.memory_space<vmem>>, vector<32x32xbf16>
    %54 = arith.truncf %24 : vector<2x32xf32> to vector<2x32xbf16>
    %cst_33 = arith.constant dense<0.000000e+00> : vector<2x32xf32>
    %55 = tpu.matmul %54, %53, %cst_33 {dimension_numbers = #tpu.dot_dimension_numbers<[1], [0], [0], [1], [0, 0, 1, 1], [], []>} : vector<2x32xbf16>, vector<32x32xbf16>, vector<2x32xf32> -> vector<2x32xf32>
    %56 = arith.addf %52, %55 : vector<2x32xf32>
    %c0_34 = arith.constant 0 : index
    %c0_35 = arith.constant 0 : index
    %57 = vector.load %arg12[%c0_34, %c0_35] : memref<1x32xf32, #tpu.memory_space<vmem>>, vector<1x32xf32>
    %58 = vector.broadcast %57 : vector<1x32xf32> to vector<2x32xf32>
    %59 = arith.addf %56, %58 : vector<2x32xf32>
    %60 = arith.negf %59 : vector<2x32xf32>
    %61 = math.exp %60 : vector<2x32xf32>
    %cst_36 = arith.constant 1.000000e+00 : f32
    %62 = vector.broadcast %cst_36 : f32 to vector<2x32xf32>
    %63 = arith.addf %62, %61 : vector<2x32xf32>
    %64 = arith.divf %62, %63 : vector<2x32xf32>
    %65 = arith.mulf %64, %49 : vector<2x32xf32>
    %cst_37 = arith.constant 1.000000e+00 : f32
    %66 = vector.broadcast %cst_37 : f32 to vector<2x32xf32>
    %67 = arith.subf %66, %64 : vector<2x32xf32>
    %68 = arith.mulf %67, %24 : vector<2x32xf32>
    %69 = arith.addf %65, %68 : vector<2x32xf32>
    %c0_38 = arith.constant 0 : index
    %c0_39 = arith.constant 0 : index
    %70 = vector.load %arg13[%c0_38, %c0_39] : memref<32x10xbf16, #tpu.memory_space<vmem>>, vector<32x10xbf16>
    %71 = arith.truncf %69 : vector<2x32xf32> to vector<2x32xbf16>
    %cst_40 = arith.constant dense<0.000000e+00> : vector<2x10xf32>
    %72 = tpu.matmul %71, %70, %cst_40 {dimension_numbers = #tpu.dot_dimension_numbers<[1], [0], [0], [1], [0, 0, 1, 1], [], []>} : vector<2x32xbf16>, vector<32x10xbf16>, vector<2x10xf32> -> vector<2x10xf32>
    %c0_41 = arith.constant 0 : index
    %c0_42 = arith.constant 0 : index
    %73 = vector.load %arg14[%c0_41, %c0_42] : memref<1x10xf32, #tpu.memory_space<vmem>>, vector<1x10xf32>
    %74 = vector.broadcast %73 : vector<1x10xf32> to vector<2x10xf32>
    %75 = arith.addf %72, %74 : vector<2x10xf32>
    %c0_43 = arith.constant 0 : index
    %c0_44 = arith.constant 0 : index
    %76 = vector.load %arg15[%c0_43, %c0_44] : memref<2x10xf32, #tpu.memory_space<vmem>>, vector<2x10xf32>
    tpu.vector_store %arg15[%c0_43, %c0_44], %75 {strides = array<i32>} : memref<2x10xf32, #tpu.memory_space<vmem>>, vector<2x10xf32>,
    return
  }
}

module attributes {stable_mosaic.version = 11 : i64} {
  func.func @kernel(%arg0: i32, %arg1: memref<1x16x32xf32, #tpu.memory_space<vmem>>, %arg2: memref<1x2x8xf32, #tpu.memory_space<vmem>>, %arg3: memref<1x2x16xf32, #tpu.memory_space<vmem>>, %arg4: memref<1x1x32xf32, #tpu.memory_space<vmem>>, %arg5: memref<1x1x32xf32, #tpu.memory_space<vmem>>, %arg6: memref<1x12x32x16xbf16, #tpu.memory_space<vmem>>, %arg7: memref<1x12x1x16xf32, #tpu.memory_space<vmem>>, %arg8: memref<1x4x16x32xbf16, #tpu.memory_space<vmem>>, %arg9: memref<1x2x1x32xf32, #tpu.memory_space<vmem>>, %arg10: memref<1x2x1x32xf32, #tpu.memory_space<vmem>>, %arg11: memref<1x2x1x32xf32, #tpu.memory_space<vmem>>, %arg12: memref<1x2x32x64xbf16, #tpu.memory_space<vmem>>, %arg13: memref<1x2x1x64xf32, #tpu.memory_space<vmem>>, %arg14: memref<1x2x64x32xbf16, #tpu.memory_space<vmem>>, %arg15: memref<1x2x1x32xf32, #tpu.memory_space<vmem>>, %arg16: memref<1x2x1x32xf32, #tpu.memory_space<vmem>>, %arg17: memref<1x2x1x32xf32, #tpu.memory_space<vmem>>, %arg18: memref<1x2x32xf32, #tpu.memory_space<vmem>>) attributes {dimension_semantics = [#tpu.dimension_semantics<parallel>], iteration_bounds = array<i64: 2>, scalar_prefetch = 0 : i64, scratch_operands = 0 : i64, tpu.core_type = #tpu.core_type<tc>, window_params = [{transform_indices = @transform_0, window_bounds = array<i64: 1, 16, 32>}, {transform_indices = @transform_1, window_bounds = array<i64: 1, 2, 8>}, {transform_indices = @transform_2, window_bounds = array<i64: 1, 2, 16>}, {transform_indices = @transform_3, window_bounds = array<i64: 1, 1, 32>}, {transform_indices = @transform_4, window_bounds = array<i64: 1, 1, 32>}, {transform_indices = @transform_5, window_bounds = array<i64: 1, 12, 32, 16>}, {transform_indices = @transform_6, window_bounds = array<i64: 1, 12, 1, 16>}, {transform_indices = @transform_7, window_bounds = array<i64: 1, 4, 16, 32>}, {transform_indices = @transform_8, window_bounds = array<i64: 1, 2, 1, 32>}, {transform_indices = @transform_9, window_bounds = array<i64: 1, 2, 1, 32>}, {transform_indices = @transform_10, window_bounds = array<i64: 1, 2, 1, 32>}, {transform_indices = @transform_11, window_bounds = array<i64: 1, 2, 32, 64>}, {transform_indices = @transform_12, window_bounds = array<i64: 1, 2, 1, 64>}, {transform_indices = @transform_13, window_bounds = array<i64: 1, 2, 64, 32>}, {transform_indices = @transform_14, window_bounds = array<i64: 1, 2, 1, 32>}, {transform_indices = @transform_15, window_bounds = array<i64: 1, 2, 1, 32>}, {transform_indices = @transform_16, window_bounds = array<i64: 1, 2, 1, 32>}, {transform_indices = @transform_17, window_bounds = array<i64: 1, 2, 32>}]} {
    %c0 = arith.constant 0 : index
    %c0_0 = arith.constant 0 : index
    %c0_1 = arith.constant 0 : index
    %0 = vector.load %arg1[%c0, %c0_0, %c0_1] : memref<1x16x32xf32, #tpu.memory_space<vmem>>, vector<1x16x32xf32>
    %1 = vector.shape_cast %0 : vector<1x16x32xf32> to vector<16x32xf32>
    %c0_2 = arith.constant 0 : index
    %c0_3 = arith.constant 0 : index
    %c0_4 = arith.constant 0 : index
    %2 = vector.load %arg4[%c0_2, %c0_3, %c0_4] : memref<1x1x32xf32, #tpu.memory_space<vmem>>, vector<1x1x32xf32>
    %3 = vector.shape_cast %2 : vector<1x1x32xf32> to vector<1x32xf32>
    %c0_5 = arith.constant 0 : index
    %c0_6 = arith.constant 0 : index
    %c0_7 = arith.constant 0 : index
    %4 = vector.load %arg5[%c0_5, %c0_6, %c0_7] : memref<1x1x32xf32, #tpu.memory_space<vmem>>, vector<1x1x32xf32>
    %5 = vector.shape_cast %4 : vector<1x1x32xf32> to vector<1x32xf32>
    %cst = arith.constant dense<0.000000e+00> : vector<16xf32>
    %6 = vector.multi_reduction <add>, %1, %cst [1] : vector<16x32xf32> to vector<16xf32>
    %7 = vector.shape_cast %6 : vector<16xf32> to vector<16x1xf32>
    %cst_8 = arith.constant 3.200000e+01 : f32
    %8 = vector.broadcast %cst_8 : f32 to vector<16x1xf32>
    %9 = arith.divf %7, %8 : vector<16x1xf32>
    %10 = vector.broadcast %9 : vector<16x1xf32> to vector<16x32xf32>
    %11 = arith.subf %1, %10 : vector<16x32xf32>
    %12 = arith.mulf %11, %11 : vector<16x32xf32>
    %cst_9 = arith.constant dense<0.000000e+00> : vector<16xf32>
    %13 = vector.multi_reduction <add>, %12, %cst_9 [1] : vector<16x32xf32> to vector<16xf32>
    %14 = vector.shape_cast %13 : vector<16xf32> to vector<16x1xf32>
    %cst_10 = arith.constant 3.200000e+01 : f32
    %15 = vector.broadcast %cst_10 : f32 to vector<16x1xf32>
    %16 = arith.divf %14, %15 : vector<16x1xf32>
    %17 = vector.broadcast %9 : vector<16x1xf32> to vector<16x32xf32>
    %18 = arith.subf %1, %17 : vector<16x32xf32>
    %cst_11 = arith.constant 9.99999996E-13 : f32
    %19 = vector.broadcast %cst_11 : f32 to vector<16x1xf32>
    %20 = arith.addf %16, %19 : vector<16x1xf32>
    %21 = math.rsqrt %20 : vector<16x1xf32>
    %22 = vector.broadcast %21 : vector<16x1xf32> to vector<16x32xf32>
    %23 = arith.mulf %18, %22 : vector<16x32xf32>
    %24 = vector.broadcast %3 : vector<1x32xf32> to vector<16x32xf32>
    %25 = arith.mulf %23, %24 : vector<16x32xf32>
    %26 = vector.broadcast %5 : vector<1x32xf32> to vector<16x32xf32>
    %27 = arith.addf %25, %26 : vector<16x32xf32>
    %c0_12 = arith.constant 0 : index
    %c0_13 = arith.constant 0 : index
    %c0_14 = arith.constant 0 : index
    %28 = vector.load %arg2[%c0_12, %c0_13, %c0_14] : memref<1x2x8xf32, #tpu.memory_space<vmem>>, vector<1x2x8xf32>
    %29 = vector.shape_cast %28 : vector<1x2x8xf32> to vector<2x8xf32>
    %cst_15 = arith.constant 1.000000e+00 : f32
    %30 = vector.broadcast %cst_15 : f32 to vector<2x8xf32>
    %31 = arith.subf %30, %29 : vector<2x8xf32>
    %cst_16 = arith.constant -1.000000e+09 : f32
    %32 = vector.broadcast %cst_16 : f32 to vector<2x8xf32>
    %33 = arith.mulf %31, %32 : vector<2x8xf32>
    %c0_17 = arith.constant 0 : index
    %c0_18 = arith.constant 0 : index
    %c0_19 = arith.constant 0 : index
    %c0_20 = arith.constant 0 : index
    %34 = vector.load %arg6[%c0_17, %c0_18, %c0_19, %c0_20] : memref<1x12x32x16xbf16, #tpu.memory_space<vmem>>, vector<1x1x32x16xbf16>
    %35 = vector.shape_cast %34 : vector<1x1x32x16xbf16> to vector<32x16xbf16>
    %36 = arith.truncf %27 : vector<16x32xf32> to vector<16x32xbf16>
    %cst_21 = arith.constant dense<0.000000e+00> : vector<16x16xf32>
    %37 = tpu.matmul %36, %35, %cst_21 {dimension_numbers = #tpu.dot_dimension_numbers<[1], [0], [0], [1], [0, 0, 1, 1], [], []>} : vector<16x32xbf16>, vector<32x16xbf16>, vector<16x16xf32> -> vector<16x16xf32>
    %c0_22 = arith.constant 0 : index
    %c0_23 = arith.constant 0 : index
    %c0_24 = arith.constant 0 : index
    %c0_25 = arith.constant 0 : index
    %38 = vector.load %arg7[%c0_22, %c0_23, %c0_24, %c0_25] : memref<1x12x1x16xf32, #tpu.memory_space<vmem>>, vector<1x1x1x16xf32>
    %39 = vector.shape_cast %38 : vector<1x1x1x16xf32> to vector<1x16xf32>
    %40 = vector.broadcast %39 : vector<1x16xf32> to vector<16x16xf32>
    %41 = arith.addf %37, %40 : vector<16x16xf32>
    %42 = vector.shape_cast %41 : vector<16x16xf32> to vector<2x8x16xf32>
    %c0_26 = arith.constant 0 : index
    %c2 = arith.constant 2 : index
    %c0_27 = arith.constant 0 : index
    %c0_28 = arith.constant 0 : index
    %43 = vector.load %arg6[%c0_26, %c2, %c0_27, %c0_28] : memref<1x12x32x16xbf16, #tpu.memory_space<vmem>>, vector<1x1x32x16xbf16>
    %44 = vector.shape_cast %43 : vector<1x1x32x16xbf16> to vector<32x16xbf16>
    %45 = arith.truncf %27 : vector<16x32xf32> to vector<16x32xbf16>
    %cst_29 = arith.constant dense<0.000000e+00> : vector<16x16xf32>
    %46 = tpu.matmul %45, %44, %cst_29 {dimension_numbers = #tpu.dot_dimension_numbers<[1], [0], [0], [1], [0, 0, 1, 1], [], []>} : vector<16x32xbf16>, vector<32x16xbf16>, vector<16x16xf32> -> vector<16x16xf32>
    %c0_30 = arith.constant 0 : index
    %c2_31 = arith.constant 2 : index
    %c0_32 = arith.constant 0 : index
    %c0_33 = arith.constant 0 : index
    %47 = vector.load %arg7[%c0_30, %c2_31, %c0_32, %c0_33] : memref<1x12x1x16xf32, #tpu.memory_space<vmem>>, vector<1x1x1x16xf32>
    %48 = vector.shape_cast %47 : vector<1x1x1x16xf32> to vector<1x16xf32>
    %49 = vector.broadcast %48 : vector<1x16xf32> to vector<16x16xf32>
    %50 = arith.addf %46, %49 : vector<16x16xf32>
    %51 = vector.shape_cast %50 : vector<16x16xf32> to vector<2x8x16xf32>
    %c0_34 = arith.constant 0 : index
    %c4 = arith.constant 4 : index
    %c0_35 = arith.constant 0 : index
    %c0_36 = arith.constant 0 : index
    %52 = vector.load %arg6[%c0_34, %c4, %c0_35, %c0_36] : memref<1x12x32x16xbf16, #tpu.memory_space<vmem>>, vector<1x1x32x16xbf16>
    %53 = vector.shape_cast %52 : vector<1x1x32x16xbf16> to vector<32x16xbf16>
    %54 = arith.truncf %27 : vector<16x32xf32> to vector<16x32xbf16>
    %cst_37 = arith.constant dense<0.000000e+00> : vector<16x16xf32>
    %55 = tpu.matmul %54, %53, %cst_37 {dimension_numbers = #tpu.dot_dimension_numbers<[1], [0], [0], [1], [0, 0, 1, 1], [], []>} : vector<16x32xbf16>, vector<32x16xbf16>, vector<16x16xf32> -> vector<16x16xf32>
    %c0_38 = arith.constant 0 : index
    %c4_39 = arith.constant 4 : index
    %c0_40 = arith.constant 0 : index
    %c0_41 = arith.constant 0 : index
    %56 = vector.load %arg7[%c0_38, %c4_39, %c0_40, %c0_41] : memref<1x12x1x16xf32, #tpu.memory_space<vmem>>, vector<1x1x1x16xf32>
    %57 = vector.shape_cast %56 : vector<1x1x1x16xf32> to vector<1x16xf32>
    %58 = vector.broadcast %57 : vector<1x16xf32> to vector<16x16xf32>
    %59 = arith.addf %55, %58 : vector<16x16xf32>
    %60 = vector.shape_cast %59 : vector<16x16xf32> to vector<2x8x16xf32>
    %61 = arith.truncf %42 : vector<2x8x16xf32> to vector<2x8x16xbf16>
    %62 = arith.truncf %51 : vector<2x8x16xf32> to vector<2x8x16xbf16>
    "tpu.trace_start"() <{level = 10 : i32, message = "bqd,bkd->bqk"}> : () -> ()
    %cst_42 = arith.constant dense<0.000000e+00> : vector<2x8x8xf32>
    %63 = tpu.matmul %61, %62, %cst_42 {dimension_numbers = #tpu.dot_dimension_numbers<[2], [2], [1], [1], [0, 0, 0, 1, 1, 1], [0], [0]>} : vector<2x8x16xbf16>, vector<2x8x16xbf16>, vector<2x8x8xf32> -> vector<2x8x8xf32>
    "tpu.trace_stop"() : () -> ()
    %cst_43 = arith.constant 2.500000e-01 : f32
    %64 = vector.broadcast %cst_43 : f32 to vector<2x8x8xf32>
    %65 = arith.mulf %63, %64 : vector<2x8x8xf32>
    %66 = vector.shape_cast %33 : vector<2x8xf32> to vector<2x1x8xf32>
    %67 = vector.broadcast %66 : vector<2x1x8xf32> to vector<2x8x8xf32>
    %68 = arith.addf %65, %67 : vector<2x8x8xf32>
    %cst_44 = arith.constant dense<0xFF800000> : vector<2x8xf32>
    %69 = vector.multi_reduction <maximumf>, %68, %cst_44 [2] : vector<2x8x8xf32> to vector<2x8xf32>
    %70 = vector.shape_cast %69 : vector<2x8xf32> to vector<2x8x1xf32>
    %71 = vector.broadcast %70 : vector<2x8x1xf32> to vector<2x8x8xf32>
    %72 = arith.subf %68, %71 : vector<2x8x8xf32>
    %73 = math.exp %72 : vector<2x8x8xf32>
    %cst_45 = arith.constant dense<0.000000e+00> : vector<2x8xf32>
    %74 = vector.multi_reduction <add>, %73, %cst_45 [2] : vector<2x8x8xf32> to vector<2x8xf32>
    %75 = vector.shape_cast %74 : vector<2x8xf32> to vector<2x8x1xf32>
    %76 = vector.broadcast %75 : vector<2x8x1xf32> to vector<2x8x8xf32>
    %77 = arith.divf %73, %76 : vector<2x8x8xf32>
    %78 = arith.truncf %77 : vector<2x8x8xf32> to vector<2x8x8xbf16>
    %79 = arith.truncf %60 : vector<2x8x16xf32> to vector<2x8x16xbf16>
    "tpu.trace_start"() <{level = 10 : i32, message = "bqk,bkd->bqd"}> : () -> ()
    %cst_46 = arith.constant dense<0.000000e+00> : vector<2x8x16xf32>
    %80 = tpu.matmul %78, %79, %cst_46 {dimension_numbers = #tpu.dot_dimension_numbers<[2], [1], [1], [2], [0, 0, 0, 1, 1, 2], [0], [0]>} : vector<2x8x8xbf16>, vector<2x8x16xbf16>, vector<2x8x16xf32> -> vector<2x8x16xf32>
    "tpu.trace_stop"() : () -> ()
    %81 = vector.shape_cast %80 : vector<2x8x16xf32> to vector<16x16xf32>
    %c0_47 = arith.constant 0 : index
    %c0_48 = arith.constant 0 : index
    %c0_49 = arith.constant 0 : index
    %c0_50 = arith.constant 0 : index
    %82 = vector.load %arg8[%c0_47, %c0_48, %c0_49, %c0_50] : memref<1x4x16x32xbf16, #tpu.memory_space<vmem>>, vector<1x1x16x32xbf16>
    %83 = vector.shape_cast %82 : vector<1x1x16x32xbf16> to vector<16x32xbf16>
    %84 = arith.truncf %81 : vector<16x16xf32> to vector<16x16xbf16>
    %cst_51 = arith.constant dense<0.000000e+00> : vector<16x32xf32>
    %85 = tpu.matmul %84, %83, %cst_51 {dimension_numbers = #tpu.dot_dimension_numbers<[1], [0], [0], [1], [0, 0, 1, 1], [], []>} : vector<16x16xbf16>, vector<16x32xbf16>, vector<16x32xf32> -> vector<16x32xf32>
    %c0_52 = arith.constant 0 : index
    %c1 = arith.constant 1 : index
    %c0_53 = arith.constant 0 : index
    %c0_54 = arith.constant 0 : index
    %86 = vector.load %arg6[%c0_52, %c1, %c0_53, %c0_54] : memref<1x12x32x16xbf16, #tpu.memory_space<vmem>>, vector<1x1x32x16xbf16>
    %87 = vector.shape_cast %86 : vector<1x1x32x16xbf16> to vector<32x16xbf16>
    %88 = arith.truncf %27 : vector<16x32xf32> to vector<16x32xbf16>
    %cst_55 = arith.constant dense<0.000000e+00> : vector<16x16xf32>
    %89 = tpu.matmul %88, %87, %cst_55 {dimension_numbers = #tpu.dot_dimension_numbers<[1], [0], [0], [1], [0, 0, 1, 1], [], []>} : vector<16x32xbf16>, vector<32x16xbf16>, vector<16x16xf32> -> vector<16x16xf32>
    %c0_56 = arith.constant 0 : index
    %c1_57 = arith.constant 1 : index
    %c0_58 = arith.constant 0 : index
    %c0_59 = arith.constant 0 : index
    %90 = vector.load %arg7[%c0_56, %c1_57, %c0_58, %c0_59] : memref<1x12x1x16xf32, #tpu.memory_space<vmem>>, vector<1x1x1x16xf32>
    %91 = vector.shape_cast %90 : vector<1x1x1x16xf32> to vector<1x16xf32>
    %92 = vector.broadcast %91 : vector<1x16xf32> to vector<16x16xf32>
    %93 = arith.addf %89, %92 : vector<16x16xf32>
    %94 = vector.shape_cast %93 : vector<16x16xf32> to vector<2x8x16xf32>
    %c0_60 = arith.constant 0 : index
    %c3 = arith.constant 3 : index
    %c0_61 = arith.constant 0 : index
    %c0_62 = arith.constant 0 : index
    %95 = vector.load %arg6[%c0_60, %c3, %c0_61, %c0_62] : memref<1x12x32x16xbf16, #tpu.memory_space<vmem>>, vector<1x1x32x16xbf16>
    %96 = vector.shape_cast %95 : vector<1x1x32x16xbf16> to vector<32x16xbf16>
    %97 = arith.truncf %27 : vector<16x32xf32> to vector<16x32xbf16>
    %cst_63 = arith.constant dense<0.000000e+00> : vector<16x16xf32>
    %98 = tpu.matmul %97, %96, %cst_63 {dimension_numbers = #tpu.dot_dimension_numbers<[1], [0], [0], [1], [0, 0, 1, 1], [], []>} : vector<16x32xbf16>, vector<32x16xbf16>, vector<16x16xf32> -> vector<16x16xf32>
    %c0_64 = arith.constant 0 : index
    %c3_65 = arith.constant 3 : index
    %c0_66 = arith.constant 0 : index
    %c0_67 = arith.constant 0 : index
    %99 = vector.load %arg7[%c0_64, %c3_65, %c0_66, %c0_67] : memref<1x12x1x16xf32, #tpu.memory_space<vmem>>, vector<1x1x1x16xf32>
    %100 = vector.shape_cast %99 : vector<1x1x1x16xf32> to vector<1x16xf32>
    %101 = vector.broadcast %100 : vector<1x16xf32> to vector<16x16xf32>
    %102 = arith.addf %98, %101 : vector<16x16xf32>
    %103 = vector.shape_cast %102 : vector<16x16xf32> to vector<2x8x16xf32>
    %c0_68 = arith.constant 0 : index
    %c5 = arith.constant 5 : index
    %c0_69 = arith.constant 0 : index
    %c0_70 = arith.constant 0 : index
    %104 = vector.load %arg6[%c0_68, %c5, %c0_69, %c0_70] : memref<1x12x32x16xbf16, #tpu.memory_space<vmem>>, vector<1x1x32x16xbf16>
    %105 = vector.shape_cast %104 : vector<1x1x32x16xbf16> to vector<32x16xbf16>
    %106 = arith.truncf %27 : vector<16x32xf32> to vector<16x32xbf16>
    %cst_71 = arith.constant dense<0.000000e+00> : vector<16x16xf32>
    %107 = tpu.matmul %106, %105, %cst_71 {dimension_numbers = #tpu.dot_dimension_numbers<[1], [0], [0], [1], [0, 0, 1, 1], [], []>} : vector<16x32xbf16>, vector<32x16xbf16>, vector<16x16xf32> -> vector<16x16xf32>
    %c0_72 = arith.constant 0 : index
    %c5_73 = arith.constant 5 : index
    %c0_74 = arith.constant 0 : index
    %c0_75 = arith.constant 0 : index
    %108 = vector.load %arg7[%c0_72, %c5_73, %c0_74, %c0_75] : memref<1x12x1x16xf32, #tpu.memory_space<vmem>>, vector<1x1x1x16xf32>
    %109 = vector.shape_cast %108 : vector<1x1x1x16xf32> to vector<1x16xf32>
    %110 = vector.broadcast %109 : vector<1x16xf32> to vector<16x16xf32>
    %111 = arith.addf %107, %110 : vector<16x16xf32>
    %112 = vector.shape_cast %111 : vector<16x16xf32> to vector<2x8x16xf32>
    %113 = arith.truncf %94 : vector<2x8x16xf32> to vector<2x8x16xbf16>
    %114 = arith.truncf %103 : vector<2x8x16xf32> to vector<2x8x16xbf16>
    "tpu.trace_start"() <{level = 10 : i32, message = "bqd,bkd->bqk"}> : () -> ()
    %cst_76 = arith.constant dense<0.000000e+00> : vector<2x8x8xf32>
    %115 = tpu.matmul %113, %114, %cst_76 {dimension_numbers = #tpu.dot_dimension_numbers<[2], [2], [1], [1], [0, 0, 0, 1, 1, 1], [0], [0]>} : vector<2x8x16xbf16>, vector<2x8x16xbf16>, vector<2x8x8xf32> -> vector<2x8x8xf32>
    "tpu.trace_stop"() : () -> ()
    %cst_77 = arith.constant 2.500000e-01 : f32
    %116 = vector.broadcast %cst_77 : f32 to vector<2x8x8xf32>
    %117 = arith.mulf %115, %116 : vector<2x8x8xf32>
    %118 = vector.shape_cast %33 : vector<2x8xf32> to vector<2x1x8xf32>
    %119 = vector.broadcast %118 : vector<2x1x8xf32> to vector<2x8x8xf32>
    %120 = arith.addf %117, %119 : vector<2x8x8xf32>
    %cst_78 = arith.constant dense<0xFF800000> : vector<2x8xf32>
    %121 = vector.multi_reduction <maximumf>, %120, %cst_78 [2] : vector<2x8x8xf32> to vector<2x8xf32>
    %122 = vector.shape_cast %121 : vector<2x8xf32> to vector<2x8x1xf32>
    %123 = vector.broadcast %122 : vector<2x8x1xf32> to vector<2x8x8xf32>
    %124 = arith.subf %120, %123 : vector<2x8x8xf32>
    %125 = math.exp %124 : vector<2x8x8xf32>
    %cst_79 = arith.constant dense<0.000000e+00> : vector<2x8xf32>
    %126 = vector.multi_reduction <add>, %125, %cst_79 [2] : vector<2x8x8xf32> to vector<2x8xf32>
    %127 = vector.shape_cast %126 : vector<2x8xf32> to vector<2x8x1xf32>
    %128 = vector.broadcast %127 : vector<2x8x1xf32> to vector<2x8x8xf32>
    %129 = arith.divf %125, %128 : vector<2x8x8xf32>
    %130 = arith.truncf %129 : vector<2x8x8xf32> to vector<2x8x8xbf16>
    %131 = arith.truncf %112 : vector<2x8x16xf32> to vector<2x8x16xbf16>
    "tpu.trace_start"() <{level = 10 : i32, message = "bqk,bkd->bqd"}> : () -> ()
    %cst_80 = arith.constant dense<0.000000e+00> : vector<2x8x16xf32>
    %132 = tpu.matmul %130, %131, %cst_80 {dimension_numbers = #tpu.dot_dimension_numbers<[2], [1], [1], [2], [0, 0, 0, 1, 1, 2], [0], [0]>} : vector<2x8x8xbf16>, vector<2x8x16xbf16>, vector<2x8x16xf32> -> vector<2x8x16xf32>
    "tpu.trace_stop"() : () -> ()
    %133 = vector.shape_cast %132 : vector<2x8x16xf32> to vector<16x16xf32>
    %c0_81 = arith.constant 0 : index
    %c1_82 = arith.constant 1 : index
    %c0_83 = arith.constant 0 : index
    %c0_84 = arith.constant 0 : index
    %134 = vector.load %arg8[%c0_81, %c1_82, %c0_83, %c0_84] : memref<1x4x16x32xbf16, #tpu.memory_space<vmem>>, vector<1x1x16x32xbf16>
    %135 = vector.shape_cast %134 : vector<1x1x16x32xbf16> to vector<16x32xbf16>
    %136 = arith.truncf %133 : vector<16x16xf32> to vector<16x16xbf16>
    %cst_85 = arith.constant dense<0.000000e+00> : vector<16x32xf32>
    %137 = tpu.matmul %136, %135, %cst_85 {dimension_numbers = #tpu.dot_dimension_numbers<[1], [0], [0], [1], [0, 0, 1, 1], [], []>} : vector<16x16xbf16>, vector<16x32xbf16>, vector<16x32xf32> -> vector<16x32xf32>
    %138 = arith.addf %85, %137 : vector<16x32xf32>
    %139 = arith.addf %27, %138 : vector<16x32xf32>
    %c0_86 = arith.constant 0 : index
    %c0_87 = arith.constant 0 : index
    %c0_88 = arith.constant 0 : index
    %c0_89 = arith.constant 0 : index
    %140 = vector.load %arg9[%c0_86, %c0_87, %c0_88, %c0_89] : memref<1x2x1x32xf32, #tpu.memory_space<vmem>>, vector<1x1x1x32xf32>
    %141 = vector.shape_cast %140 : vector<1x1x1x32xf32> to vector<1x32xf32>
    %142 = vector.broadcast %141 : vector<1x32xf32> to vector<16x32xf32>
    %143 = arith.addf %139, %142 : vector<16x32xf32>
    %c0_90 = arith.constant 0 : index
    %c0_91 = arith.constant 0 : index
    %c0_92 = arith.constant 0 : index
    %c0_93 = arith.constant 0 : index
    %144 = vector.load %arg10[%c0_90, %c0_91, %c0_92, %c0_93] : memref<1x2x1x32xf32, #tpu.memory_space<vmem>>, vector<1x1x1x32xf32>
    %145 = vector.shape_cast %144 : vector<1x1x1x32xf32> to vector<1x32xf32>
    %c0_94 = arith.constant 0 : index
    %c0_95 = arith.constant 0 : index
    %c0_96 = arith.constant 0 : index
    %c0_97 = arith.constant 0 : index
    %146 = vector.load %arg11[%c0_94, %c0_95, %c0_96, %c0_97] : memref<1x2x1x32xf32, #tpu.memory_space<vmem>>, vector<1x1x1x32xf32>
    %147 = vector.shape_cast %146 : vector<1x1x1x32xf32> to vector<1x32xf32>
    %cst_98 = arith.constant dense<0.000000e+00> : vector<16xf32>
    %148 = vector.multi_reduction <add>, %143, %cst_98 [1] : vector<16x32xf32> to vector<16xf32>
    %149 = vector.shape_cast %148 : vector<16xf32> to vector<16x1xf32>
    %cst_99 = arith.constant 3.200000e+01 : f32
    %150 = vector.broadcast %cst_99 : f32 to vector<16x1xf32>
    %151 = arith.divf %149, %150 : vector<16x1xf32>
    %152 = vector.broadcast %151 : vector<16x1xf32> to vector<16x32xf32>
    %153 = arith.subf %143, %152 : vector<16x32xf32>
    %154 = arith.mulf %153, %153 : vector<16x32xf32>
    %cst_100 = arith.constant dense<0.000000e+00> : vector<16xf32>
    %155 = vector.multi_reduction <add>, %154, %cst_100 [1] : vector<16x32xf32> to vector<16xf32>
    %156 = vector.shape_cast %155 : vector<16xf32> to vector<16x1xf32>
    %cst_101 = arith.constant 3.200000e+01 : f32
    %157 = vector.broadcast %cst_101 : f32 to vector<16x1xf32>
    %158 = arith.divf %156, %157 : vector<16x1xf32>
    %159 = vector.broadcast %151 : vector<16x1xf32> to vector<16x32xf32>
    %160 = arith.subf %143, %159 : vector<16x32xf32>
    %cst_102 = arith.constant 9.99999996E-13 : f32
    %161 = vector.broadcast %cst_102 : f32 to vector<16x1xf32>
    %162 = arith.addf %158, %161 : vector<16x1xf32>
    %163 = math.rsqrt %162 : vector<16x1xf32>
    %164 = vector.broadcast %163 : vector<16x1xf32> to vector<16x32xf32>
    %165 = arith.mulf %160, %164 : vector<16x32xf32>
    %166 = vector.broadcast %145 : vector<1x32xf32> to vector<16x32xf32>
    %167 = arith.mulf %165, %166 : vector<16x32xf32>
    %168 = vector.broadcast %147 : vector<1x32xf32> to vector<16x32xf32>
    %169 = arith.addf %167, %168 : vector<16x32xf32>
    %c0_103 = arith.constant 0 : index
    %c0_104 = arith.constant 0 : index
    %c0_105 = arith.constant 0 : index
    %c0_106 = arith.constant 0 : index
    %170 = vector.load %arg12[%c0_103, %c0_104, %c0_105, %c0_106] : memref<1x2x32x64xbf16, #tpu.memory_space<vmem>>, vector<1x1x32x64xbf16>
    %171 = vector.shape_cast %170 : vector<1x1x32x64xbf16> to vector<32x64xbf16>
    %172 = arith.truncf %169 : vector<16x32xf32> to vector<16x32xbf16>
    %cst_107 = arith.constant dense<0.000000e+00> : vector<16x64xf32>
    %173 = tpu.matmul %172, %171, %cst_107 {dimension_numbers = #tpu.dot_dimension_numbers<[1], [0], [0], [1], [0, 0, 1, 1], [], []>} : vector<16x32xbf16>, vector<32x64xbf16>, vector<16x64xf32> -> vector<16x64xf32>
    %c0_108 = arith.constant 0 : index
    %c0_109 = arith.constant 0 : index
    %c0_110 = arith.constant 0 : index
    %c0_111 = arith.constant 0 : index
    %174 = vector.load %arg13[%c0_108, %c0_109, %c0_110, %c0_111] : memref<1x2x1x64xf32, #tpu.memory_space<vmem>>, vector<1x1x1x64xf32>
    %175 = vector.shape_cast %174 : vector<1x1x1x64xf32> to vector<1x64xf32>
    %176 = vector.broadcast %175 : vector<1x64xf32> to vector<16x64xf32>
    %177 = arith.addf %173, %176 : vector<16x64xf32>
    %178 = arith.mulf %177, %177 : vector<16x64xf32>
    %179 = arith.mulf %177, %178 : vector<16x64xf32>
    %cst_112 = arith.constant 4.471500e-02 : f32
    %180 = vector.broadcast %cst_112 : f32 to vector<16x64xf32>
    %181 = arith.mulf %180, %179 : vector<16x64xf32>
    %182 = arith.addf %177, %181 : vector<16x64xf32>
    %cst_113 = arith.constant 0.797884583 : f32
    %183 = vector.broadcast %cst_113 : f32 to vector<16x64xf32>
    %184 = arith.mulf %183, %182 : vector<16x64xf32>
    %185 = math.tanh %184 : vector<16x64xf32>
    %cst_114 = arith.constant 1.000000e+00 : f32
    %186 = vector.broadcast %cst_114 : f32 to vector<16x64xf32>
    %187 = arith.addf %186, %185 : vector<16x64xf32>
    %cst_115 = arith.constant 5.000000e-01 : f32
    %188 = vector.broadcast %cst_115 : f32 to vector<16x64xf32>
    %189 = arith.mulf %188, %187 : vector<16x64xf32>
    %190 = arith.mulf %177, %189 : vector<16x64xf32>
    %c0_116 = arith.constant 0 : index
    %c0_117 = arith.constant 0 : index
    %c0_118 = arith.constant 0 : index
    %c0_119 = arith.constant 0 : index
    %191 = vector.load %arg14[%c0_116, %c0_117, %c0_118, %c0_119] : memref<1x2x64x32xbf16, #tpu.memory_space<vmem>>, vector<1x1x64x32xbf16>
    %192 = vector.shape_cast %191 : vector<1x1x64x32xbf16> to vector<64x32xbf16>
    %193 = arith.truncf %190 : vector<16x64xf32> to vector<16x64xbf16>
    %cst_120 = arith.constant dense<0.000000e+00> : vector<16x32xf32>
    %194 = tpu.matmul %193, %192, %cst_120 {dimension_numbers = #tpu.dot_dimension_numbers<[1], [0], [0], [1], [0, 0, 1, 1], [], []>} : vector<16x64xbf16>, vector<64x32xbf16>, vector<16x32xf32> -> vector<16x32xf32>
    %195 = arith.addf %169, %194 : vector<16x32xf32>
    %c0_121 = arith.constant 0 : index
    %c0_122 = arith.constant 0 : index
    %c0_123 = arith.constant 0 : index
    %c0_124 = arith.constant 0 : index
    %196 = vector.load %arg15[%c0_121, %c0_122, %c0_123, %c0_124] : memref<1x2x1x32xf32, #tpu.memory_space<vmem>>, vector<1x1x1x32xf32>
    %197 = vector.shape_cast %196 : vector<1x1x1x32xf32> to vector<1x32xf32>
    %198 = vector.broadcast %197 : vector<1x32xf32> to vector<16x32xf32>
    %199 = arith.addf %195, %198 : vector<16x32xf32>
    %c0_125 = arith.constant 0 : index
    %c0_126 = arith.constant 0 : index
    %c0_127 = arith.constant 0 : index
    %c0_128 = arith.constant 0 : index
    %200 = vector.load %arg16[%c0_125, %c0_126, %c0_127, %c0_128] : memref<1x2x1x32xf32, #tpu.memory_space<vmem>>, vector<1x1x1x32xf32>
    %201 = vector.shape_cast %200 : vector<1x1x1x32xf32> to vector<1x32xf32>
    %c0_129 = arith.constant 0 : index
    %c0_130 = arith.constant 0 : index
    %c0_131 = arith.constant 0 : index
    %c0_132 = arith.constant 0 : index
    %202 = vector.load %arg17[%c0_129, %c0_130, %c0_131, %c0_132] : memref<1x2x1x32xf32, #tpu.memory_space<vmem>>, vector<1x1x1x32xf32>
    %203 = vector.shape_cast %202 : vector<1x1x1x32xf32> to vector<1x32xf32>
    %cst_133 = arith.constant dense<0.000000e+00> : vector<16xf32>
    %204 = vector.multi_reduction <add>, %199, %cst_133 [1] : vector<16x32xf32> to vector<16xf32>
    %205 = vector.shape_cast %204 : vector<16xf32> to vector<16x1xf32>
    %cst_134 = arith.constant 3.200000e+01 : f32
    %206 = vector.broadcast %cst_134 : f32 to vector<16x1xf32>
    %207 = arith.divf %205, %206 : vector<16x1xf32>
    %208 = vector.broadcast %207 : vector<16x1xf32> to vector<16x32xf32>
    %209 = arith.subf %199, %208 : vector<16x32xf32>
    %210 = arith.mulf %209, %209 : vector<16x32xf32>
    %cst_135 = arith.constant dense<0.000000e+00> : vector<16xf32>
    %211 = vector.multi_reduction <add>, %210, %cst_135 [1] : vector<16x32xf32> to vector<16xf32>
    %212 = vector.shape_cast %211 : vector<16xf32> to vector<16x1xf32>
    %cst_136 = arith.constant 3.200000e+01 : f32
    %213 = vector.broadcast %cst_136 : f32 to vector<16x1xf32>
    %214 = arith.divf %212, %213 : vector<16x1xf32>
    %215 = vector.broadcast %207 : vector<16x1xf32> to vector<16x32xf32>
    %216 = arith.subf %199, %215 : vector<16x32xf32>
    %cst_137 = arith.constant 9.99999996E-13 : f32
    %217 = vector.broadcast %cst_137 : f32 to vector<16x1xf32>
    %218 = arith.addf %214, %217 : vector<16x1xf32>
    %219 = math.rsqrt %218 : vector<16x1xf32>
    %220 = vector.broadcast %219 : vector<16x1xf32> to vector<16x32xf32>
    %221 = arith.mulf %216, %220 : vector<16x32xf32>
    %222 = vector.broadcast %201 : vector<1x32xf32> to vector<16x32xf32>
    %223 = arith.mulf %221, %222 : vector<16x32xf32>
    %224 = vector.broadcast %203 : vector<1x32xf32> to vector<16x32xf32>
    %225 = arith.addf %223, %224 : vector<16x32xf32>
    %c0_138 = arith.constant 0 : index
    %c6 = arith.constant 6 : index
    %c0_139 = arith.constant 0 : index
    %c0_140 = arith.constant 0 : index
    %226 = vector.load %arg6[%c0_138, %c6, %c0_139, %c0_140] : memref<1x12x32x16xbf16, #tpu.memory_space<vmem>>, vector<1x1x32x16xbf16>
    %227 = vector.shape_cast %226 : vector<1x1x32x16xbf16> to vector<32x16xbf16>
    %228 = arith.truncf %225 : vector<16x32xf32> to vector<16x32xbf16>
    %cst_141 = arith.constant dense<0.000000e+00> : vector<16x16xf32>
    %229 = tpu.matmul %228, %227, %cst_141 {dimension_numbers = #tpu.dot_dimension_numbers<[1], [0], [0], [1], [0, 0, 1, 1], [], []>} : vector<16x32xbf16>, vector<32x16xbf16>, vector<16x16xf32> -> vector<16x16xf32>
    %c0_142 = arith.constant 0 : index
    %c6_143 = arith.constant 6 : index
    %c0_144 = arith.constant 0 : index
    %c0_145 = arith.constant 0 : index
    %230 = vector.load %arg7[%c0_142, %c6_143, %c0_144, %c0_145] : memref<1x12x1x16xf32, #tpu.memory_space<vmem>>, vector<1x1x1x16xf32>
    %231 = vector.shape_cast %230 : vector<1x1x1x16xf32> to vector<1x16xf32>
    %232 = vector.broadcast %231 : vector<1x16xf32> to vector<16x16xf32>
    %233 = arith.addf %229, %232 : vector<16x16xf32>
    %234 = vector.shape_cast %233 : vector<16x16xf32> to vector<2x8x16xf32>
    %c0_146 = arith.constant 0 : index
    %c8 = arith.constant 8 : index
    %c0_147 = arith.constant 0 : index
    %c0_148 = arith.constant 0 : index
    %235 = vector.load %arg6[%c0_146, %c8, %c0_147, %c0_148] : memref<1x12x32x16xbf16, #tpu.memory_space<vmem>>, vector<1x1x32x16xbf16>
    %236 = vector.shape_cast %235 : vector<1x1x32x16xbf16> to vector<32x16xbf16>
    %237 = arith.truncf %225 : vector<16x32xf32> to vector<16x32xbf16>
    %cst_149 = arith.constant dense<0.000000e+00> : vector<16x16xf32>
    %238 = tpu.matmul %237, %236, %cst_149 {dimension_numbers = #tpu.dot_dimension_numbers<[1], [0], [0], [1], [0, 0, 1, 1], [], []>} : vector<16x32xbf16>, vector<32x16xbf16>, vector<16x16xf32> -> vector<16x16xf32>
    %c0_150 = arith.constant 0 : index
    %c8_151 = arith.constant 8 : index
    %c0_152 = arith.constant 0 : index
    %c0_153 = arith.constant 0 : index
    %239 = vector.load %arg7[%c0_150, %c8_151, %c0_152, %c0_153] : memref<1x12x1x16xf32, #tpu.memory_space<vmem>>, vector<1x1x1x16xf32>
    %240 = vector.shape_cast %239 : vector<1x1x1x16xf32> to vector<1x16xf32>
    %241 = vector.broadcast %240 : vector<1x16xf32> to vector<16x16xf32>
    %242 = arith.addf %238, %241 : vector<16x16xf32>
    %243 = vector.shape_cast %242 : vector<16x16xf32> to vector<2x8x16xf32>
    %c0_154 = arith.constant 0 : index
    %c10 = arith.constant 10 : index
    %c0_155 = arith.constant 0 : index
    %c0_156 = arith.constant 0 : index
    %244 = vector.load %arg6[%c0_154, %c10, %c0_155, %c0_156] : memref<1x12x32x16xbf16, #tpu.memory_space<vmem>>, vector<1x1x32x16xbf16>
    %245 = vector.shape_cast %244 : vector<1x1x32x16xbf16> to vector<32x16xbf16>
    %246 = arith.truncf %225 : vector<16x32xf32> to vector<16x32xbf16>
    %cst_157 = arith.constant dense<0.000000e+00> : vector<16x16xf32>
    %247 = tpu.matmul %246, %245, %cst_157 {dimension_numbers = #tpu.dot_dimension_numbers<[1], [0], [0], [1], [0, 0, 1, 1], [], []>} : vector<16x32xbf16>, vector<32x16xbf16>, vector<16x16xf32> -> vector<16x16xf32>
    %c0_158 = arith.constant 0 : index
    %c10_159 = arith.constant 10 : index
    %c0_160 = arith.constant 0 : index
    %c0_161 = arith.constant 0 : index
    %248 = vector.load %arg7[%c0_158, %c10_159, %c0_160, %c0_161] : memref<1x12x1x16xf32, #tpu.memory_space<vmem>>, vector<1x1x1x16xf32>
    %249 = vector.shape_cast %248 : vector<1x1x1x16xf32> to vector<1x16xf32>
    %250 = vector.broadcast %249 : vector<1x16xf32> to vector<16x16xf32>
    %251 = arith.addf %247, %250 : vector<16x16xf32>
    %252 = vector.shape_cast %251 : vector<16x16xf32> to vector<2x8x16xf32>
    %253 = arith.truncf %234 : vector<2x8x16xf32> to vector<2x8x16xbf16>
    %254 = arith.truncf %243 : vector<2x8x16xf32> to vector<2x8x16xbf16>
    "tpu.trace_start"() <{level = 10 : i32, message = "bqd,bkd->bqk"}> : () -> ()
    %cst_162 = arith.constant dense<0.000000e+00> : vector<2x8x8xf32>
    %255 = tpu.matmul %253, %254, %cst_162 {dimension_numbers = #tpu.dot_dimension_numbers<[2], [2], [1], [1], [0, 0, 0, 1, 1, 1], [0], [0]>} : vector<2x8x16xbf16>, vector<2x8x16xbf16>, vector<2x8x8xf32> -> vector<2x8x8xf32>
    "tpu.trace_stop"() : () -> ()
    %cst_163 = arith.constant 2.500000e-01 : f32
    %256 = vector.broadcast %cst_163 : f32 to vector<2x8x8xf32>
    %257 = arith.mulf %255, %256 : vector<2x8x8xf32>
    %258 = vector.shape_cast %33 : vector<2x8xf32> to vector<2x1x8xf32>
    %259 = vector.broadcast %258 : vector<2x1x8xf32> to vector<2x8x8xf32>
    %260 = arith.addf %257, %259 : vector<2x8x8xf32>
    %cst_164 = arith.constant dense<0xFF800000> : vector<2x8xf32>
    %261 = vector.multi_reduction <maximumf>, %260, %cst_164 [2] : vector<2x8x8xf32> to vector<2x8xf32>
    %262 = vector.shape_cast %261 : vector<2x8xf32> to vector<2x8x1xf32>
    %263 = vector.broadcast %262 : vector<2x8x1xf32> to vector<2x8x8xf32>
    %264 = arith.subf %260, %263 : vector<2x8x8xf32>
    %265 = math.exp %264 : vector<2x8x8xf32>
    %cst_165 = arith.constant dense<0.000000e+00> : vector<2x8xf32>
    %266 = vector.multi_reduction <add>, %265, %cst_165 [2] : vector<2x8x8xf32> to vector<2x8xf32>
    %267 = vector.shape_cast %266 : vector<2x8xf32> to vector<2x8x1xf32>
    %268 = vector.broadcast %267 : vector<2x8x1xf32> to vector<2x8x8xf32>
    %269 = arith.divf %265, %268 : vector<2x8x8xf32>
    %270 = arith.truncf %269 : vector<2x8x8xf32> to vector<2x8x8xbf16>
    %271 = arith.truncf %252 : vector<2x8x16xf32> to vector<2x8x16xbf16>
    "tpu.trace_start"() <{level = 10 : i32, message = "bqk,bkd->bqd"}> : () -> ()
    %cst_166 = arith.constant dense<0.000000e+00> : vector<2x8x16xf32>
    %272 = tpu.matmul %270, %271, %cst_166 {dimension_numbers = #tpu.dot_dimension_numbers<[2], [1], [1], [2], [0, 0, 0, 1, 1, 2], [0], [0]>} : vector<2x8x8xbf16>, vector<2x8x16xbf16>, vector<2x8x16xf32> -> vector<2x8x16xf32>
    "tpu.trace_stop"() : () -> ()
    %273 = vector.shape_cast %272 : vector<2x8x16xf32> to vector<16x16xf32>
    %c0_167 = arith.constant 0 : index
    %c2_168 = arith.constant 2 : index
    %c0_169 = arith.constant 0 : index
    %c0_170 = arith.constant 0 : index
    %274 = vector.load %arg8[%c0_167, %c2_168, %c0_169, %c0_170] : memref<1x4x16x32xbf16, #tpu.memory_space<vmem>>, vector<1x1x16x32xbf16>
    %275 = vector.shape_cast %274 : vector<1x1x16x32xbf16> to vector<16x32xbf16>
    %276 = arith.truncf %273 : vector<16x16xf32> to vector<16x16xbf16>
    %cst_171 = arith.constant dense<0.000000e+00> : vector<16x32xf32>
    %277 = tpu.matmul %276, %275, %cst_171 {dimension_numbers = #tpu.dot_dimension_numbers<[1], [0], [0], [1], [0, 0, 1, 1], [], []>} : vector<16x16xbf16>, vector<16x32xbf16>, vector<16x32xf32> -> vector<16x32xf32>
    %c0_172 = arith.constant 0 : index
    %c7 = arith.constant 7 : index
    %c0_173 = arith.constant 0 : index
    %c0_174 = arith.constant 0 : index
    %278 = vector.load %arg6[%c0_172, %c7, %c0_173, %c0_174] : memref<1x12x32x16xbf16, #tpu.memory_space<vmem>>, vector<1x1x32x16xbf16>
    %279 = vector.shape_cast %278 : vector<1x1x32x16xbf16> to vector<32x16xbf16>
    %280 = arith.truncf %225 : vector<16x32xf32> to vector<16x32xbf16>
    %cst_175 = arith.constant dense<0.000000e+00> : vector<16x16xf32>
    %281 = tpu.matmul %280, %279, %cst_175 {dimension_numbers = #tpu.dot_dimension_numbers<[1], [0], [0], [1], [0, 0, 1, 1], [], []>} : vector<16x32xbf16>, vector<32x16xbf16>, vector<16x16xf32> -> vector<16x16xf32>
    %c0_176 = arith.constant 0 : index
    %c7_177 = arith.constant 7 : index
    %c0_178 = arith.constant 0 : index
    %c0_179 = arith.constant 0 : index
    %282 = vector.load %arg7[%c0_176, %c7_177, %c0_178, %c0_179] : memref<1x12x1x16xf32, #tpu.memory_space<vmem>>, vector<1x1x1x16xf32>
    %283 = vector.shape_cast %282 : vector<1x1x1x16xf32> to vector<1x16xf32>
    %284 = vector.broadcast %283 : vector<1x16xf32> to vector<16x16xf32>
    %285 = arith.addf %281, %284 : vector<16x16xf32>
    %286 = vector.shape_cast %285 : vector<16x16xf32> to vector<2x8x16xf32>
    %c0_180 = arith.constant 0 : index
    %c9 = arith.constant 9 : index
    %c0_181 = arith.constant 0 : index
    %c0_182 = arith.constant 0 : index
    %287 = vector.load %arg6[%c0_180, %c9, %c0_181, %c0_182] : memref<1x12x32x16xbf16, #tpu.memory_space<vmem>>, vector<1x1x32x16xbf16>
    %288 = vector.shape_cast %287 : vector<1x1x32x16xbf16> to vector<32x16xbf16>
    %289 = arith.truncf %225 : vector<16x32xf32> to vector<16x32xbf16>
    %cst_183 = arith.constant dense<0.000000e+00> : vector<16x16xf32>
    %290 = tpu.matmul %289, %288, %cst_183 {dimension_numbers = #tpu.dot_dimension_numbers<[1], [0], [0], [1], [0, 0, 1, 1], [], []>} : vector<16x32xbf16>, vector<32x16xbf16>, vector<16x16xf32> -> vector<16x16xf32>
    %c0_184 = arith.constant 0 : index
    %c9_185 = arith.constant 9 : index
    %c0_186 = arith.constant 0 : index
    %c0_187 = arith.constant 0 : index
    %291 = vector.load %arg7[%c0_184, %c9_185, %c0_186, %c0_187] : memref<1x12x1x16xf32, #tpu.memory_space<vmem>>, vector<1x1x1x16xf32>
    %292 = vector.shape_cast %291 : vector<1x1x1x16xf32> to vector<1x16xf32>
    %293 = vector.broadcast %292 : vector<1x16xf32> to vector<16x16xf32>
    %294 = arith.addf %290, %293 : vector<16x16xf32>
    %295 = vector.shape_cast %294 : vector<16x16xf32> to vector<2x8x16xf32>
    %c0_188 = arith.constant 0 : index
    %c11 = arith.constant 11 : index
    %c0_189 = arith.constant 0 : index
    %c0_190 = arith.constant 0 : index
    %296 = vector.load %arg6[%c0_188, %c11, %c0_189, %c0_190] : memref<1x12x32x16xbf16, #tpu.memory_space<vmem>>, vector<1x1x32x16xbf16>
    %297 = vector.shape_cast %296 : vector<1x1x32x16xbf16> to vector<32x16xbf16>
    %298 = arith.truncf %225 : vector<16x32xf32> to vector<16x32xbf16>
    %cst_191 = arith.constant dense<0.000000e+00> : vector<16x16xf32>
    %299 = tpu.matmul %298, %297, %cst_191 {dimension_numbers = #tpu.dot_dimension_numbers<[1], [0], [0], [1], [0, 0, 1, 1], [], []>} : vector<16x32xbf16>, vector<32x16xbf16>, vector<16x16xf32> -> vector<16x16xf32>
    %c0_192 = arith.constant 0 : index
    %c11_193 = arith.constant 11 : index
    %c0_194 = arith.constant 0 : index
    %c0_195 = arith.constant 0 : index
    %300 = vector.load %arg7[%c0_192, %c11_193, %c0_194, %c0_195] : memref<1x12x1x16xf32, #tpu.memory_space<vmem>>, vector<1x1x1x16xf32>
    %301 = vector.shape_cast %300 : vector<1x1x1x16xf32> to vector<1x16xf32>
    %302 = vector.broadcast %301 : vector<1x16xf32> to vector<16x16xf32>
    %303 = arith.addf %299, %302 : vector<16x16xf32>
    %304 = vector.shape_cast %303 : vector<16x16xf32> to vector<2x8x16xf32>
    %305 = arith.truncf %286 : vector<2x8x16xf32> to vector<2x8x16xbf16>
    %306 = arith.truncf %295 : vector<2x8x16xf32> to vector<2x8x16xbf16>
    "tpu.trace_start"() <{level = 10 : i32, message = "bqd,bkd->bqk"}> : () -> ()
    %cst_196 = arith.constant dense<0.000000e+00> : vector<2x8x8xf32>
    %307 = tpu.matmul %305, %306, %cst_196 {dimension_numbers = #tpu.dot_dimension_numbers<[2], [2], [1], [1], [0, 0, 0, 1, 1, 1], [0], [0]>} : vector<2x8x16xbf16>, vector<2x8x16xbf16>, vector<2x8x8xf32> -> vector<2x8x8xf32>
    "tpu.trace_stop"() : () -> ()
    %cst_197 = arith.constant 2.500000e-01 : f32
    %308 = vector.broadcast %cst_197 : f32 to vector<2x8x8xf32>
    %309 = arith.mulf %307, %308 : vector<2x8x8xf32>
    %310 = vector.shape_cast %33 : vector<2x8xf32> to vector<2x1x8xf32>
    %311 = vector.broadcast %310 : vector<2x1x8xf32> to vector<2x8x8xf32>
    %312 = arith.addf %309, %311 : vector<2x8x8xf32>
    %cst_198 = arith.constant dense<0xFF800000> : vector<2x8xf32>
    %313 = vector.multi_reduction <maximumf>, %312, %cst_198 [2] : vector<2x8x8xf32> to vector<2x8xf32>
    %314 = vector.shape_cast %313 : vector<2x8xf32> to vector<2x8x1xf32>
    %315 = vector.broadcast %314 : vector<2x8x1xf32> to vector<2x8x8xf32>
    %316 = arith.subf %312, %315 : vector<2x8x8xf32>
    %317 = math.exp %316 : vector<2x8x8xf32>
    %cst_199 = arith.constant dense<0.000000e+00> : vector<2x8xf32>
    %318 = vector.multi_reduction <add>, %317, %cst_199 [2] : vector<2x8x8xf32> to vector<2x8xf32>
    %319 = vector.shape_cast %318 : vector<2x8xf32> to vector<2x8x1xf32>
    %320 = vector.broadcast %319 : vector<2x8x1xf32> to vector<2x8x8xf32>
    %321 = arith.divf %317, %320 : vector<2x8x8xf32>
    %322 = arith.truncf %321 : vector<2x8x8xf32> to vector<2x8x8xbf16>
    %323 = arith.truncf %304 : vector<2x8x16xf32> to vector<2x8x16xbf16>
    "tpu.trace_start"() <{level = 10 : i32, message = "bqk,bkd->bqd"}> : () -> ()
    %cst_200 = arith.constant dense<0.000000e+00> : vector<2x8x16xf32>
    %324 = tpu.matmul %322, %323, %cst_200 {dimension_numbers = #tpu.dot_dimension_numbers<[2], [1], [1], [2], [0, 0, 0, 1, 1, 2], [0], [0]>} : vector<2x8x8xbf16>, vector<2x8x16xbf16>, vector<2x8x16xf32> -> vector<2x8x16xf32>
    "tpu.trace_stop"() : () -> ()
    %325 = vector.shape_cast %324 : vector<2x8x16xf32> to vector<16x16xf32>
    %c0_201 = arith.constant 0 : index
    %c3_202 = arith.constant 3 : index
    %c0_203 = arith.constant 0 : index
    %c0_204 = arith.constant 0 : index
    %326 = vector.load %arg8[%c0_201, %c3_202, %c0_203, %c0_204] : memref<1x4x16x32xbf16, #tpu.memory_space<vmem>>, vector<1x1x16x32xbf16>
    %327 = vector.shape_cast %326 : vector<1x1x16x32xbf16> to vector<16x32xbf16>
    %328 = arith.truncf %325 : vector<16x16xf32> to vector<16x16xbf16>
    %cst_205 = arith.constant dense<0.000000e+00> : vector<16x32xf32>
    %329 = tpu.matmul %328, %327, %cst_205 {dimension_numbers = #tpu.dot_dimension_numbers<[1], [0], [0], [1], [0, 0, 1, 1], [], []>} : vector<16x16xbf16>, vector<16x32xbf16>, vector<16x32xf32> -> vector<16x32xf32>
    %330 = arith.addf %277, %329 : vector<16x32xf32>
    %331 = arith.addf %225, %330 : vector<16x32xf32>
    %c0_206 = arith.constant 0 : index
    %c1_207 = arith.constant 1 : index
    %c0_208 = arith.constant 0 : index
    %c0_209 = arith.constant 0 : index
    %332 = vector.load %arg9[%c0_206, %c1_207, %c0_208, %c0_209] : memref<1x2x1x32xf32, #tpu.memory_space<vmem>>, vector<1x1x1x32xf32>
    %333 = vector.shape_cast %332 : vector<1x1x1x32xf32> to vector<1x32xf32>
    %334 = vector.broadcast %333 : vector<1x32xf32> to vector<16x32xf32>
    %335 = arith.addf %331, %334 : vector<16x32xf32>
    %c0_210 = arith.constant 0 : index
    %c1_211 = arith.constant 1 : index
    %c0_212 = arith.constant 0 : index
    %c0_213 = arith.constant 0 : index
    %336 = vector.load %arg10[%c0_210, %c1_211, %c0_212, %c0_213] : memref<1x2x1x32xf32, #tpu.memory_space<vmem>>, vector<1x1x1x32xf32>
    %337 = vector.shape_cast %336 : vector<1x1x1x32xf32> to vector<1x32xf32>
    %c0_214 = arith.constant 0 : index
    %c1_215 = arith.constant 1 : index
    %c0_216 = arith.constant 0 : index
    %c0_217 = arith.constant 0 : index
    %338 = vector.load %arg11[%c0_214, %c1_215, %c0_216, %c0_217] : memref<1x2x1x32xf32, #tpu.memory_space<vmem>>, vector<1x1x1x32xf32>
    %339 = vector.shape_cast %338 : vector<1x1x1x32xf32> to vector<1x32xf32>
    %cst_218 = arith.constant dense<0.000000e+00> : vector<16xf32>
    %340 = vector.multi_reduction <add>, %335, %cst_218 [1] : vector<16x32xf32> to vector<16xf32>
    %341 = vector.shape_cast %340 : vector<16xf32> to vector<16x1xf32>
    %cst_219 = arith.constant 3.200000e+01 : f32
    %342 = vector.broadcast %cst_219 : f32 to vector<16x1xf32>
    %343 = arith.divf %341, %342 : vector<16x1xf32>
    %344 = vector.broadcast %343 : vector<16x1xf32> to vector<16x32xf32>
    %345 = arith.subf %335, %344 : vector<16x32xf32>
    %346 = arith.mulf %345, %345 : vector<16x32xf32>
    %cst_220 = arith.constant dense<0.000000e+00> : vector<16xf32>
    %347 = vector.multi_reduction <add>, %346, %cst_220 [1] : vector<16x32xf32> to vector<16xf32>
    %348 = vector.shape_cast %347 : vector<16xf32> to vector<16x1xf32>
    %cst_221 = arith.constant 3.200000e+01 : f32
    %349 = vector.broadcast %cst_221 : f32 to vector<16x1xf32>
    %350 = arith.divf %348, %349 : vector<16x1xf32>
    %351 = vector.broadcast %343 : vector<16x1xf32> to vector<16x32xf32>
    %352 = arith.subf %335, %351 : vector<16x32xf32>
    %cst_222 = arith.constant 9.99999996E-13 : f32
    %353 = vector.broadcast %cst_222 : f32 to vector<16x1xf32>
    %354 = arith.addf %350, %353 : vector<16x1xf32>
    %355 = math.rsqrt %354 : vector<16x1xf32>
    %356 = vector.broadcast %355 : vector<16x1xf32> to vector<16x32xf32>
    %357 = arith.mulf %352, %356 : vector<16x32xf32>
    %358 = vector.broadcast %337 : vector<1x32xf32> to vector<16x32xf32>
    %359 = arith.mulf %357, %358 : vector<16x32xf32>
    %360 = vector.broadcast %339 : vector<1x32xf32> to vector<16x32xf32>
    %361 = arith.addf %359, %360 : vector<16x32xf32>
    %c0_223 = arith.constant 0 : index
    %c1_224 = arith.constant 1 : index
    %c0_225 = arith.constant 0 : index
    %c0_226 = arith.constant 0 : index
    %362 = vector.load %arg12[%c0_223, %c1_224, %c0_225, %c0_226] : memref<1x2x32x64xbf16, #tpu.memory_space<vmem>>, vector<1x1x32x64xbf16>
    %363 = vector.shape_cast %362 : vector<1x1x32x64xbf16> to vector<32x64xbf16>
    %364 = arith.truncf %361 : vector<16x32xf32> to vector<16x32xbf16>
    %cst_227 = arith.constant dense<0.000000e+00> : vector<16x64xf32>
    %365 = tpu.matmul %364, %363, %cst_227 {dimension_numbers = #tpu.dot_dimension_numbers<[1], [0], [0], [1], [0, 0, 1, 1], [], []>} : vector<16x32xbf16>, vector<32x64xbf16>, vector<16x64xf32> -> vector<16x64xf32>
    %c0_228 = arith.constant 0 : index
    %c1_229 = arith.constant 1 : index
    %c0_230 = arith.constant 0 : index
    %c0_231 = arith.constant 0 : index
    %366 = vector.load %arg13[%c0_228, %c1_229, %c0_230, %c0_231] : memref<1x2x1x64xf32, #tpu.memory_space<vmem>>, vector<1x1x1x64xf32>
    %367 = vector.shape_cast %366 : vector<1x1x1x64xf32> to vector<1x64xf32>
    %368 = vector.broadcast %367 : vector<1x64xf32> to vector<16x64xf32>
    %369 = arith.addf %365, %368 : vector<16x64xf32>
    %370 = arith.mulf %369, %369 : vector<16x64xf32>
    %371 = arith.mulf %369, %370 : vector<16x64xf32>
    %cst_232 = arith.constant 4.471500e-02 : f32
    %372 = vector.broadcast %cst_232 : f32 to vector<16x64xf32>
    %373 = arith.mulf %372, %371 : vector<16x64xf32>
    %374 = arith.addf %369, %373 : vector<16x64xf32>
    %cst_233 = arith.constant 0.797884583 : f32
    %375 = vector.broadcast %cst_233 : f32 to vector<16x64xf32>
    %376 = arith.mulf %375, %374 : vector<16x64xf32>
    %377 = math.tanh %376 : vector<16x64xf32>
    %cst_234 = arith.constant 1.000000e+00 : f32
    %378 = vector.broadcast %cst_234 : f32 to vector<16x64xf32>
    %379 = arith.addf %378, %377 : vector<16x64xf32>
    %cst_235 = arith.constant 5.000000e-01 : f32
    %380 = vector.broadcast %cst_235 : f32 to vector<16x64xf32>
    %381 = arith.mulf %380, %379 : vector<16x64xf32>
    %382 = arith.mulf %369, %381 : vector<16x64xf32>
    %c0_236 = arith.constant 0 : index
    %c1_237 = arith.constant 1 : index
    %c0_238 = arith.constant 0 : index
    %c0_239 = arith.constant 0 : index
    %383 = vector.load %arg14[%c0_236, %c1_237, %c0_238, %c0_239] : memref<1x2x64x32xbf16, #tpu.memory_space<vmem>>, vector<1x1x64x32xbf16>
    %384 = vector.shape_cast %383 : vector<1x1x64x32xbf16> to vector<64x32xbf16>
    %385 = arith.truncf %382 : vector<16x64xf32> to vector<16x64xbf16>
    %cst_240 = arith.constant dense<0.000000e+00> : vector<16x32xf32>
    %386 = tpu.matmul %385, %384, %cst_240 {dimension_numbers = #tpu.dot_dimension_numbers<[1], [0], [0], [1], [0, 0, 1, 1], [], []>} : vector<16x64xbf16>, vector<64x32xbf16>, vector<16x32xf32> -> vector<16x32xf32>
    %387 = arith.addf %361, %386 : vector<16x32xf32>
    %c0_241 = arith.constant 0 : index
    %c1_242 = arith.constant 1 : index
    %c0_243 = arith.constant 0 : index
    %c0_244 = arith.constant 0 : index
    %388 = vector.load %arg15[%c0_241, %c1_242, %c0_243, %c0_244] : memref<1x2x1x32xf32, #tpu.memory_space<vmem>>, vector<1x1x1x32xf32>
    %389 = vector.shape_cast %388 : vector<1x1x1x32xf32> to vector<1x32xf32>
    %390 = vector.broadcast %389 : vector<1x32xf32> to vector<16x32xf32>
    %391 = arith.addf %387, %390 : vector<16x32xf32>
    %c0_245 = arith.constant 0 : index
    %c1_246 = arith.constant 1 : index
    %c0_247 = arith.constant 0 : index
    %c0_248 = arith.constant 0 : index
    %392 = vector.load %arg16[%c0_245, %c1_246, %c0_247, %c0_248] : memref<1x2x1x32xf32, #tpu.memory_space<vmem>>, vector<1x1x1x32xf32>
    %393 = vector.shape_cast %392 : vector<1x1x1x32xf32> to vector<1x32xf32>
    %c0_249 = arith.constant 0 : index
    %c1_250 = arith.constant 1 : index
    %c0_251 = arith.constant 0 : index
    %c0_252 = arith.constant 0 : index
    %394 = vector.load %arg17[%c0_249, %c1_250, %c0_251, %c0_252] : memref<1x2x1x32xf32, #tpu.memory_space<vmem>>, vector<1x1x1x32xf32>
    %395 = vector.shape_cast %394 : vector<1x1x1x32xf32> to vector<1x32xf32>
    %cst_253 = arith.constant dense<0.000000e+00> : vector<16xf32>
    %396 = vector.multi_reduction <add>, %391, %cst_253 [1] : vector<16x32xf32> to vector<16xf32>
    %397 = vector.shape_cast %396 : vector<16xf32> to vector<16x1xf32>
    %cst_254 = arith.constant 3.200000e+01 : f32
    %398 = vector.broadcast %cst_254 : f32 to vector<16x1xf32>
    %399 = arith.divf %397, %398 : vector<16x1xf32>
    %400 = vector.broadcast %399 : vector<16x1xf32> to vector<16x32xf32>
    %401 = arith.subf %391, %400 : vector<16x32xf32>
    %402 = arith.mulf %401, %401 : vector<16x32xf32>
    %cst_255 = arith.constant dense<0.000000e+00> : vector<16xf32>
    %403 = vector.multi_reduction <add>, %402, %cst_255 [1] : vector<16x32xf32> to vector<16xf32>
    %404 = vector.shape_cast %403 : vector<16xf32> to vector<16x1xf32>
    %cst_256 = arith.constant 3.200000e+01 : f32
    %405 = vector.broadcast %cst_256 : f32 to vector<16x1xf32>
    %406 = arith.divf %404, %405 : vector<16x1xf32>
    %407 = vector.broadcast %399 : vector<16x1xf32> to vector<16x32xf32>
    %408 = arith.subf %391, %407 : vector<16x32xf32>
    %cst_257 = arith.constant 9.99999996E-13 : f32
    %409 = vector.broadcast %cst_257 : f32 to vector<16x1xf32>
    %410 = arith.addf %406, %409 : vector<16x1xf32>
    %411 = math.rsqrt %410 : vector<16x1xf32>
    %412 = vector.broadcast %411 : vector<16x1xf32> to vector<16x32xf32>
    %413 = arith.mulf %408, %412 : vector<16x32xf32>
    %414 = vector.broadcast %393 : vector<1x32xf32> to vector<16x32xf32>
    %415 = arith.mulf %413, %414 : vector<16x32xf32>
    %416 = vector.broadcast %395 : vector<1x32xf32> to vector<16x32xf32>
    %417 = arith.addf %415, %416 : vector<16x32xf32>
    %c0_258 = arith.constant 0 : index
    %c0_259 = arith.constant 0 : index
    %c0_260 = arith.constant 0 : index
    %418 = vector.load %arg3[%c0_258, %c0_259, %c0_260] : memref<1x2x16xf32, #tpu.memory_space<vmem>>, vector<1x2x16xf32>
    %419 = vector.shape_cast %418 : vector<1x2x16xf32> to vector<2x16xf32>
    %cst_261 = arith.constant dense<0.000000e+00> : vector<2x32xf32>
    %420 = tpu.matmul %419, %417, %cst_261 {dimension_numbers = #tpu.dot_dimension_numbers<[1], [0], [0], [1], [0, 0, 1, 1], [], []>} : vector<2x16xf32>, vector<16x32xf32>, vector<2x32xf32> -> vector<2x32xf32>
    %c0_262 = arith.constant 0 : index
    %c0_263 = arith.constant 0 : index
    %c0_264 = arith.constant 0 : index
    %421 = vector.load %arg18[%c0_262, %c0_263, %c0_264] : memref<1x2x32xf32, #tpu.memory_space<vmem>>, vector<1x2x32xf32>
    %422 = vector.shape_cast %421 : vector<1x2x32xf32> to vector<2x32xf32>
    %423 = vector.shape_cast %420 : vector<2x32xf32> to vector<1x2x32xf32>
    tpu.vector_store %arg18[%c0_262, %c0_263, %c0_264], %423 {strides = array<i32>} : memref<1x2x32xf32, #tpu.memory_space<vmem>>, vector<1x2x32xf32>,
    return
  }
  func.func @transform_0(%arg0: i32) -> (i32, i32, i32) {
    %c0_i32 = arith.constant 0 : i32
    %c0_i32_0 = arith.constant 0 : i32
    %c0_i32_1 = arith.constant 0 : i32
    return %arg0, %c0_i32, %c0_i32_0 : i32, i32, i32
  }
  func.func @transform_1(%arg0: i32) -> (i32, i32, i32) {
    %c0_i32 = arith.constant 0 : i32
    %c0_i32_0 = arith.constant 0 : i32
    %c0_i32_1 = arith.constant 0 : i32
    return %arg0, %c0_i32, %c0_i32_0 : i32, i32, i32
  }
  func.func @transform_2(%arg0: i32) -> (i32, i32, i32) {
    %c0_i32 = arith.constant 0 : i32
    %c0_i32_0 = arith.constant 0 : i32
    %c0_i32_1 = arith.constant 0 : i32
    return %arg0, %c0_i32, %c0_i32_0 : i32, i32, i32
  }
  func.func @transform_3(%arg0: i32) -> (i32, i32, i32) {
    %c0_i32 = arith.constant 0 : i32
    %c0_i32_0 = arith.constant 0 : i32
    %c0_i32_1 = arith.constant 0 : i32
    return %arg0, %c0_i32, %c0_i32_0 : i32, i32, i32
  }
  func.func @transform_4(%arg0: i32) -> (i32, i32, i32) {
    %c0_i32 = arith.constant 0 : i32
    %c0_i32_0 = arith.constant 0 : i32
    %c0_i32_1 = arith.constant 0 : i32
    return %arg0, %c0_i32, %c0_i32_0 : i32, i32, i32
  }
  func.func @transform_5(%arg0: i32) -> (i32, i32, i32, i32) {
    %c0_i32 = arith.constant 0 : i32
    %c0_i32_0 = arith.constant 0 : i32
    %c0_i32_1 = arith.constant 0 : i32
    %c0_i32_2 = arith.constant 0 : i32
    return %arg0, %c0_i32, %c0_i32_0, %c0_i32_1 : i32, i32, i32, i32
  }
  func.func @transform_6(%arg0: i32) -> (i32, i32, i32, i32) {
    %c0_i32 = arith.constant 0 : i32
    %c0_i32_0 = arith.constant 0 : i32
    %c0_i32_1 = arith.constant 0 : i32
    %c0_i32_2 = arith.constant 0 : i32
    return %arg0, %c0_i32, %c0_i32_0, %c0_i32_1 : i32, i32, i32, i32
  }
  func.func @transform_7(%arg0: i32) -> (i32, i32, i32, i32) {
    %c0_i32 = arith.constant 0 : i32
    %c0_i32_0 = arith.constant 0 : i32
    %c0_i32_1 = arith.constant 0 : i32
    %c0_i32_2 = arith.constant 0 : i32
    return %arg0, %c0_i32, %c0_i32_0, %c0_i32_1 : i32, i32, i32, i32
  }
  func.func @transform_8(%arg0: i32) -> (i32, i32, i32, i32) {
    %c0_i32 = arith.constant 0 : i32
    %c0_i32_0 = arith.constant 0 : i32
    %c0_i32_1 = arith.constant 0 : i32
    %c0_i32_2 = arith.constant 0 : i32
    return %arg0, %c0_i32, %c0_i32_0, %c0_i32_1 : i32, i32, i32, i32
  }
  func.func @transform_9(%arg0: i32) -> (i32, i32, i32, i32) {
    %c0_i32 = arith.constant 0 : i32
    %c0_i32_0 = arith.constant 0 : i32
    %c0_i32_1 = arith.constant 0 : i32
    %c0_i32_2 = arith.constant 0 : i32
    return %arg0, %c0_i32, %c0_i32_0, %c0_i32_1 : i32, i32, i32, i32
  }
  func.func @transform_10(%arg0: i32) -> (i32, i32, i32, i32) {
    %c0_i32 = arith.constant 0 : i32
    %c0_i32_0 = arith.constant 0 : i32
    %c0_i32_1 = arith.constant 0 : i32
    %c0_i32_2 = arith.constant 0 : i32
    return %arg0, %c0_i32, %c0_i32_0, %c0_i32_1 : i32, i32, i32, i32
  }
  func.func @transform_11(%arg0: i32) -> (i32, i32, i32, i32) {
    %c0_i32 = arith.constant 0 : i32
    %c0_i32_0 = arith.constant 0 : i32
    %c0_i32_1 = arith.constant 0 : i32
    %c0_i32_2 = arith.constant 0 : i32
    return %arg0, %c0_i32, %c0_i32_0, %c0_i32_1 : i32, i32, i32, i32
  }
  func.func @transform_12(%arg0: i32) -> (i32, i32, i32, i32) {
    %c0_i32 = arith.constant 0 : i32
    %c0_i32_0 = arith.constant 0 : i32
    %c0_i32_1 = arith.constant 0 : i32
    %c0_i32_2 = arith.constant 0 : i32
    return %arg0, %c0_i32, %c0_i32_0, %c0_i32_1 : i32, i32, i32, i32
  }
  func.func @transform_13(%arg0: i32) -> (i32, i32, i32, i32) {
    %c0_i32 = arith.constant 0 : i32
    %c0_i32_0 = arith.constant 0 : i32
    %c0_i32_1 = arith.constant 0 : i32
    %c0_i32_2 = arith.constant 0 : i32
    return %arg0, %c0_i32, %c0_i32_0, %c0_i32_1 : i32, i32, i32, i32
  }
  func.func @transform_14(%arg0: i32) -> (i32, i32, i32, i32) {
    %c0_i32 = arith.constant 0 : i32
    %c0_i32_0 = arith.constant 0 : i32
    %c0_i32_1 = arith.constant 0 : i32
    %c0_i32_2 = arith.constant 0 : i32
    return %arg0, %c0_i32, %c0_i32_0, %c0_i32_1 : i32, i32, i32, i32
  }
  func.func @transform_15(%arg0: i32) -> (i32, i32, i32, i32) {
    %c0_i32 = arith.constant 0 : i32
    %c0_i32_0 = arith.constant 0 : i32
    %c0_i32_1 = arith.constant 0 : i32
    %c0_i32_2 = arith.constant 0 : i32
    return %arg0, %c0_i32, %c0_i32_0, %c0_i32_1 : i32, i32, i32, i32
  }
  func.func @transform_16(%arg0: i32) -> (i32, i32, i32, i32) {
    %c0_i32 = arith.constant 0 : i32
    %c0_i32_0 = arith.constant 0 : i32
    %c0_i32_1 = arith.constant 0 : i32
    %c0_i32_2 = arith.constant 0 : i32
    return %arg0, %c0_i32, %c0_i32_0, %c0_i32_1 : i32, i32, i32, i32
  }
  func.func @transform_17(%arg0: i32) -> (i32, i32, i32) {
    %c0_i32 = arith.constant 0 : i32
    %c0_i32_0 = arith.constant 0 : i32
    %c0_i32_1 = arith.constant 0 : i32
    return %arg0, %c0_i32, %c0_i32_0 : i32, i32, i32
  }
}

</mosaic_0001>

<bundles_post_ra>
// kernel: fwd.3
= control target key start
LH: loop header
LB: loop body
LE: loop exit
PB: predicated region body
PF: predicated region fallthrough
CT: control target
= control target key end

     0   :  { %v718_v1 = vmov 0.0   ;;  %vm719_vm0 = vmmov 0   ;;  %vm78_vm1 = vcmask 261120   ;;  %s919_s0 = inlined_call_operand.vmem [shape: f32[2,32], index: 0, kind: input, shape index: {}]   ;;  %s920_s1 = inlined_call_operand.vmem [shape: f32[2,32], index: 1, kind: input, shape index: {}]   ;;  %s921_s2 = inlined_call_operand.vmem [shape: bf16[32,32], index: 2, kind: input, shape index: {}]   ;;  %s922_s3 = inlined_call_operand.vmem [shape: f32[1,32], index: 3, kind: input, shape index: {}]   ;;  %s923_s4 = inlined_call_operand.vmem [shape: bf16[32,32], index: 4, kind: input, shape index: {}]   ;;  %s924_s5 = inlined_call_operand.vmem [shape: f32[1,32], index: 5, kind: input, shape index: {}]   ;;  %s925_s6 = inlined_call_operand.vmem [shape: bf16[32,32], index: 6, kind: input, shape index: {}]   ;;  %s926_s7 = inlined_call_operand.vmem [shape: f32[1,32], index: 7, kind: input, shape index: {}]   ;;  %s927_s8 = inlined_call_operand.vmem [shape: bf16[32,32], index: 8, kind: input, shape index: {}]   ;;  %s928_s9 = inlined_call_operand.vmem [shape: f32[1,32], index: 9, kind: input, shape index: {}]   ;;  %s929_s10 = inlined_call_operand.vmem [shape: bf16[32,32], index: 10, kind: input, shape index: {}]   ;;  %s930_s11 = inlined_call_operand.vmem [shape: bf16[32,32], index: 11, kind: input, shape index: {}]   ;;  %s931_s12 = inlined_call_operand.vmem [shape: f32[1,32], index: 12, kind: input, shape index: {}]   ;;  %s932_s13 = inlined_call_operand.vmem [shape: bf16[32,10], index: 13, kind: input, shape index: {}]   ;;  %s933_s14 = inlined_call_operand.vmem [shape: f32[1,10], index: 14, kind: input, shape index: {}]   ;;  %s934_s15 = inlined_call_operand.hbm [shape: f32[2,10], index: 15, kind: output, shape index: {}]  }
   0x1   :  { %v670_v0 = vld [vmem:[%s921_s2] sm:$0xff]   ;;  %611 = vmatprep.subr.bf16.mxu0 %v718_v1  ;;  %619 = vmatprep.subr.bf16.mxu1 %v718_v1  ;;  %v672_v3 = vld [vmem:[%s921_s2 + $0x8] sm:$0xff]  }
   0x2   :  { %v671_v2 = vld [vmem:[%s923_s4] sm:$0xff]   ;;  %612 = vmatpush3.bf16.msra.mxu0 %v670_v0  ;;  %615 = vmatprep.mubr.msk.bf16.mxu0 %vm719_vm0, %v718_v1  ;;  %v673_v4 = vld [vmem:[%s923_s4 + $0x8] sm:$0xff]  }
   0x3   :  { %620 = vmatpush3.bf16.msra.mxu1 %v671_v2  ;;  %613 = vmatprep.subr.bf16.mxu0 %v718_v1  ;;  %v52_v5 = vld [vmem:[%s919_s0] sm:$0x3] }
   0x4   :  { %621 = vmatprep.subr.bf16.mxu1 %v718_v1  ;;  %623 = vmatprep.mubr.msk.bf16.mxu1 %vm719_vm0, %v718_v1  ;;  %v53_v6 = vld [vmem:[%s920_s1] sm:$0x3]  ;;  %v58_v7 = vpack.c.bf16 %v52_v5, %v52_v5 }
   0x5   :  { %v126_v8 = vpack.c.bf16 %v53_v6, %v53_v6 }
   0x6   :  { %614 = vmatpush3.bf16.msra.mxu0 %v672_v3 }
   0x7   :  { %622 = vmatpush3.bf16.msra.mxu1 %v673_v4  ;;  %627 = vmatprep.subr.bf16.mxu0 %v718_v1 }
   0x8   :  { %635 = vmatprep.subr.bf16.mxu1 %v718_v1 }
   0x9   :  { %616 = vmatmul.mubr.msk.bf16.vlgmr.msra.gmra.mrb[0].mxu0 %vm78_vm1, %v58_v7 }
   0xa   :  { %624 = vmatmul.mubr.msk.bf16.vlgmr.msra.gmra.mrb[0].mxu1 %vm78_vm1, %v126_v8  ;;  %631 = vmatprep.mubr.msk.bf16.mxu0 %vm719_vm0, %v718_v1 }
   0xb   :  { %639 = vmatprep.mubr.msk.bf16.mxu1 %vm719_vm0, %v718_v1 }
   0xc   :  { %20 = vsyncpa [#allocation3], 0  ;;  %v674_v9 = vld [vmem:[%s925_s6] sm:$0xff]   ;;  %v675_v10 = vld [vmem:[%s925_s6 + $0x8] sm:$0xff]   ;;  %s720_s29 = smov [#allocation2]   ;;  %vm545_vm2 = vcmask 74752  }
   0xd   :  { %628 = vmatpush3.bf16.msra.mxu0 %v674_v9  ;;  %v561_v11 = vld [vmem:[%s922_s3] ss:$0 sm:$0xff]  ;;  %v677_v34 = vld [vmem:[%s930_s11 + $0x8] sm:$0xff]   ;;  %s553_s30 = sshll.u32 %s720_s29, 4  ;;  %s554_s30 = int_to_ptr.vmem [resolvable:$true] %s553_s30 }
   0xe   :  { %629 = vmatprep.subr.bf16.mxu0 %v718_v1  ;;  %v568_v16 = vld [vmem:[%s924_s5] ss:$0 sm:$0xff]  ;;  %v679_v36 = vld [vmem:[%s927_s8 + $0x8] sm:$0xff]   ;;  %s694_s16 = scalar_lea.vmem %s554_s30, 32  ;;  %p699_p1 = scmp.lt.s32.totalorder %s554_s30, %s554_s30 }
   0xf   :  { %v676_v32 = vld [vmem:[%s930_s11] sm:$0xff]   ;;  %v681_v58 = vld [vmem:[%s929_s10 + $0x8] sm:$0xff]   ;;  %p695_p0 = scmp.ne.s32.totalorder %s554_s30, %s694_s16  ;;  %p700_p2 = scmp.lt.s32.totalorder %s694_s16, %s694_s16 }
  0x10   :  { %v678_v35 = vld [vmem:[%s927_s8] sm:$0xff]   ;;  %v683_v4 = vld [vmem:[%s932_s13 + $0x8] sm:$0xff]  }
  0x11   :  { %630 = vmatpush3.bf16.msra.mxu0 %v675_v10  ;;  %636 = vmatpush3.bf16.msra.mxu1 %v678_v35  ;;  %v570_v37 = vld [vmem:[%s926_s7] ss:$0 sm:$0xff]  ;;  %p701_p3 = por %p700_p2, %p699_p1 }
  0x12   :  { %643 = vmatprep.subr.bf16.mxu0 %v718_v1  ;;  %637 = vmatprep.subr.bf16.mxu1 %v718_v1  ;;  %v680_v56 = vld [vmem:[%s929_s10] sm:$0xff]  }
  0x13   :  { %v574_v59 = vld [vmem:[%s928_s9] ss:$0 sm:$0xff]  ;;  %p702_p4 = pnand %p701_p3, %p695_p0 }
  0x14   :  { %v682_v3 = vld [vmem:[%s932_s13] sm:$0xff]  }
  0x15   :  { %638 = vmatpush3.bf16.msra.mxu1 %v679_v36 }
  0x16   :  { %651 = vmatprep.subr.bf16.mxu1 %v718_v1 }
  0xdc   :  { %v116_v12 = vpop.f32.mrb[0].mxu0 }
  0xdd   :  { %v117_v13 = vadd.f32 %v561_v11, %v116_v12  ;;  %v176_v14 = vpop.f32.mrb[0].mxu1  ;;  %v617_v15 = vpop.f32.mrb[1].mxu0 }
  0xde   :  { %v625_v17 = vpop.f32.mrb[1].mxu1  ;;  %v119_v18 = vpop.f32.mrb[2].mxu0 }
  0xdf   :  { %v182_v19 = vadd.f32 %v176_v14, %v117_v13  ;;  %v179_v20 = vpop.f32.mrb[2].mxu1  ;;  %v618_v21 = vpop.f32.mrb[3].mxu0 }
  0xe0   :  { %v626_v22 = vpop.f32.mrb[3].mxu1  ;;  %v586_v20 = vld [vmem:[%s933_s14] ss:$0 sm:$0xff] }
  0xe1   :  { %v190_v23 = vadd.f32 %v568_v16, %v182_v19 }
  0xe3   :  { %v569_v24 = vmul.f32 -1.442695, %v190_v23 }
  0xe5   :  { %684 = vpow2.f32 %v569_v24 }
  0xef   :  { %v685_v25 = vpop.eup %684 }
  0xf0   :  { %v194_v26 = vadd.f32 1.0, %v685_v25 }
  0xf2   :  { %686 = vrcp.f32 %v194_v26 }
  0xfc   :  { %v687_v27 = vpop.eup %686 }
  0xfd   :  { %v198_v28 = vsub.f32 1.0, %v687_v27  ;;  %v197_v29 = vmul.f32 %v687_v27, %v52_v5 }
  0xff   :  { %v199_v30 = vmul.f32 %v198_v28, %v53_v6  ;;  %v584_v6 = vld [vmem:[%s931_s12] ss:$0 sm:$0xff] }
 0x101   :  { %v849_v31 = vadd.f32 %v199_v30, %v197_v29 }
 0x103   :  { %v205_v33 = vpack.c.bf16 %v849_v31, %v849_v31 }
 0x105   :  { %632 = vmatmul.mubr.msk.bf16.vlgmr.msra.gmra.mrb[4].mxu0 %vm78_vm1, %v205_v33 }
 0x106   :  { %644 = vmatpush3.bf16.msra.mxu0 %v676_v32  ;;  %647 = vmatprep.mubr.msk.bf16.mxu0 %vm719_vm0, %v718_v1 }
 0x107   :  { %645 = vmatprep.subr.bf16.mxu0 %v718_v1 }
 0x10a   :  { %646 = vmatpush3.bf16.msra.mxu0 %v677_v34 }
 0x10b   :  { %659 = vmatprep.subr.bf16.mxu0 %v718_v1 }
 0x10d   :  { %648 = vmatmul.mubr.msk.bf16.vlgmr.msra.gmra.mrb[8].mxu0 %vm78_vm1, %v205_v33 }
 0x10e   :  { %663 = vmatprep.mubr.msk.bf16.mxu0 %vm719_vm0, %v718_v1  ;;  %660 = vmatpush3.bf16.msra.mxu0 %v682_v3 }
 0x10f   :  { %661 = vmatprep.subr.bf16.mxu0 %v718_v1 }
 0x112   :  { %662 = vmatpush3.bf16.msra.mxu0 %v683_v4 }
 0x1d8   :  { %v262_v38 = vpop.f32.mrb[4].mxu0 }
 0x1d9   :  { %v263_v39 = vadd.f32 %v570_v37, %v262_v38  ;;  %v633_v40 = vpop.f32.mrb[5].mxu0 }
 0x1da   :  { %v265_v41 = vpop.f32.mrb[6].mxu0 }
 0x1db   :  { %v268_v42 = vmul.f32 %v263_v39, %v263_v39  ;;  %v634_v43 = vpop.f32.mrb[7].mxu0 }
 0x1dd   :  { %v269_v44 = vmul.f32 %v268_v42, %v263_v39 }
 0x1df   :  { %v270_v45 = vmul.f32 0.044715, %v269_v44 }
 0x1e0   :  { %v399_v46 = vpop.f32.mrb[8].mxu0 }
 0x1e1   :  { %v271_v47 = vadd.f32 %v270_v45, %v263_v39  ;;  %v649_v48 = vpop.f32.mrb[9].mxu0 }
 0x1e2   :  { %v402_v49 = vpop.f32.mrb[10].mxu0 }
 0x1e3   :  { %v272_v50 = vmul.f32 0.7978846, %v271_v47  ;;  %v650_v51 = vpop.f32.mrb[11].mxu0 }
 0x1e5   :  { %688 = vtanh.f32 %v272_v50 }
 0x1ef   :  { %v689_v52 = vpop.eup %688 }
 0x1f0   :  { %v274_v53 = vadd.f32 1.0, %v689_v52 }
 0x1f2   :  { %v275_v54 = vmul.f32 0.5, %v274_v53 }
 0x1f4   :  { %v276_v55 = vmul.f32 %v275_v54, %v263_v39 }
 0x1f6   :  { %v281_v57 = vpack.c.bf16 %v276_v55, %v276_v55 }
 0x1f8   :  { %640 = vmatmul.mubr.msk.bf16.vlgmr.msra.gmra.mrb[4].mxu1 %vm78_vm1, %v281_v57 }
 0x1f9   :  { %652 = vmatpush3.bf16.msra.mxu1 %v680_v56  ;;  %655 = vmatprep.mubr.msk.bf16.mxu1 %vm719_vm0, %v718_v1 }
 0x1fa   :  { %653 = vmatprep.subr.bf16.mxu1 %v718_v1 }
 0x1fd   :  { %654 = vmatpush3.bf16.msra.mxu1 %v681_v58 }
 0x2cb   :  { %v338_v60 = vpop.f32.mrb[4].mxu1 }
 0x2cc   :  { %v339_v61 = vadd.f32 %v574_v59, %v338_v60  ;;  %v641_v62 = vpop.f32.mrb[5].mxu1 }
 0x2cd   :  { %v341_v63 = vpop.f32.mrb[6].mxu1 }
 0x2ce   :  { %v348_v0 = vpack.c.bf16 %v339_v61, %v339_v61  ;;  %v642_v2 = vpop.f32.mrb[7].mxu1 }
 0x2d0   :  { %656 = vmatmul.mubr.msk.bf16.vlgmr.msra.gmra.mrb[8].mxu1 %vm78_vm1, %v348_v0 }
 0x3a3   :  { %v454_v5 = vpop.f32.mrb[8].mxu1 }
 0x3a4   :  { %v455_v7 = vadd.f32 %v454_v5, %v399_v46  ;;  %v657_v8 = vpop.f32.mrb[9].mxu1 }
 0x3a5   :  { %v457_v9 = vpop.f32.mrb[10].mxu1 }
 0x3a6   :  { %v467_v10 = vadd.f32 %v584_v6, %v455_v7  ;;  %v658_v11 = vpop.f32.mrb[11].mxu1 }
 0x3a8   :  { %v585_v12 = vmul.f32 -1.442695, %v467_v10 }
 0x3aa   :  { %690 = vpow2.f32 %v585_v12 }
 0x3b4   :  { %v691_v13 = vpop.eup %690 }
 0x3b5   :  { %v471_v14 = vadd.f32 1.0, %v691_v13 }
 0x3b7   :  { %692 = vrcp.f32 %v471_v14 }
 0x3c1   :  { %v693_v15 = vpop.eup %692 }
 0x3c2   :  { %v475_v16 = vsub.f32 1.0, %v693_v15  ;;  %v474_v17 = vmul.f32 %v693_v15, %v339_v61 }
 0x3c4   :  { %v476_v1 = vmul.f32 %v475_v16, %v849_v31 }
 0x3c6   :  { %v477_v18 = vadd.f32 %v476_v1, %v474_v17 }
 0x3c8   :  { %v482_v19 = vpack.c.bf16 %v477_v18, %v477_v18 }
 0x3ca   :  { %664 = vmatmul.mubr.msk.bf16.vlgmr.msra.gmra.mrb[12].mxu0 %vm78_vm1, %v482_v19 }
 0x49d   :  { %v539_v21 = vpop.f32.mrb[12].mxu0 }
 0x49e   :  { %v540_v22 = vadd.f32 %v586_v20, %v539_v21  ;;  %v665_v23 = vpop.f32.mrb[13].mxu0 }
 0x49f   :  { %v542_v24 = vpop.f32.mrb[14].mxu0 }
 0x4a0   :  { %v666_v25 = vpop.f32.mrb[15].mxu0  ;;  %546 = vst.msk [vmem:[#allocation2] sm:$0x3] %vm545_vm2, %v540_v22 }
 0x4a1   :  { %705 = shalt.err (!%p702_p4)
}
 0x4a2   :  { %s706_s14 = scalar_lea.hbm %s934_s15, 32 }
 0x4a3   :  { %p707_p5 = scmp.ne.s32.totalorder %s934_s15, %s706_s14  ;;  %p710_p6 = scmp.lt.u32.totalorder %s706_s14, %s934_s15 }
 0x4a5   :  { %p712_p7 = pnand %p710_p6, %p707_p5 }
 0x4a7   :  { %715 = shalt.err (!%p712_p7)
}
 0x4a8   :  { %556 = dma.vmem_to_hbm [thread:$0]  %s554_s30, 32, %s934_s15, [#allocation3]  }
 0x4a9   :  { %716 = dma.done.wait [#allocation3], 32  }
 0x4aa   :  { %717 = vsyncadd [#allocation3], 4294967264 }
 0x4ab   :  { %560 = vsyncpa [#allocation3], 1 }

// kernel: fwd.2
= control target key start
LH: loop header
LB: loop body
LE: loop exit
PB: predicated region body
PF: predicated region fallthrough
CT: control target
= control target key end

     0   :  { %s4461_s24 = smov 0   ;;  %s4923_s0 = inlined_call_operand.vmem [shape: f32[2,16,32], index: 0, kind: input, shape index: {}]   ;;  %s4924_s1 = inlined_call_operand.vmem [shape: f32[2,2,8], index: 1, kind: input, shape index: {}]   ;;  %s4925_s2 = inlined_call_operand.vmem [shape: f32[2,2,16], index: 2, kind: input, shape index: {}]   ;;  %s4926_s3 = inlined_call_operand.vmem [shape: f32[2,1,32], index: 3, kind: input, shape index: {}]   ;;  %s4927_s4 = inlined_call_operand.vmem [shape: f32[2,1,32], index: 4, kind: input, shape index: {}]   ;;  %s4928_s5 = inlined_call_operand.vmem [shape: bf16[2,12,32,16], index: 5, kind: input, shape index: {}]   ;;  %s4929_s6 = inlined_call_operand.vmem [shape: f32[2,12,1,16], index: 6, kind: input, shape index: {}]   ;;  %s4930_s7 = inlined_call_operand.vmem [shape: bf16[2,4,16,32], index: 7, kind: input, shape index: {}]   ;;  %s4931_s8 = inlined_call_operand.vmem [shape: f32[2,2,1,32], index: 8, kind: input, shape index: {}]   ;;  %s4932_s9 = inlined_call_operand.vmem [shape: f32[2,2,1,32], index: 9, kind: input, shape index: {}]   ;;  %s4933_s10 = inlined_call_operand.vmem [shape: f32[2,2,1,32], index: 10, kind: input, shape index: {}]   ;;  %s4934_s11 = inlined_call_operand.vmem [shape: bf16[2,2,32,64], index: 11, kind: input, shape index: {}]   ;;  %s4935_s12 = inlined_call_operand.vmem [shape: f32[2,2,1,64], index: 12, kind: input, shape index: {}]   ;;  %s4936_s13 = inlined_call_operand.vmem [shape: bf16[2,2,64,32], index: 13, kind: input, shape index: {}]   ;;  %s4937_s14 = inlined_call_operand.vmem [shape: f32[2,2,1,32], index: 14, kind: input, shape index: {}]   ;;  %s4938_s15 = inlined_call_operand.vmem [shape: f32[2,2,1,32], index: 15, kind: input, shape index: {}]   ;;  %s4939_s16 = inlined_call_operand.vmem [shape: f32[2,2,1,32], index: 16, kind: input, shape index: {}]   ;;  %s4940_s17 = inlined_call_operand.vmem [shape: f32[2,2,32], index: 17, kind: output, shape index: {}]  }
   0x1   :  { %4941 = sst [smem:[#allocation2_spill]] %s4923_s0 }
   0x2   :  { %4942 = sst [smem:[#allocation3_spill]] %s4924_s1 }
   0x3   :  { %4943 = sst [smem:[#allocation4_spill]] %s4926_s3 }
   0x4   :  { %4944 = sst [smem:[#allocation5_spill]] %s4927_s4 }
   0x5   :  { %4945 = sst [smem:[#allocation6_spill]] %s4928_s5 }
   0x6 LB: > { %s3669_s25 = sadd.s32 4294967295, %s4365_s24   ;;  %p3673_p0 = scmp.ge.s32.totalorder %s4365_s24, 1  ;;  %s4365_s24 = sphi %s4461_s24, %s27_s24  }
   0x7   : > { %p633_p1 = scmp.lt.s32.totalorder %s4365_s24, 3 }
   0x9   : > { %p634_p2 = pnand %p3673_p0, %p633_p1 }
   0xa   : > { %p750_p3 = scmp.lt.s32.totalorder (!%p634_p2), %s3669_s25, 1  ;;  %vm830_vm0 = vcmask (!%p634_p2), 261120   ;;  %s4946_s0 = sld [smem:[#allocation2_spill]] (!%p634_p2)  ;;  %v4367_v16 = vmov (!%p634_p2), 0.0   ;;  %vm4368_vm1 = vmmov (!%p634_p2), 0   ;;  %vm1081_vm2 = vcmask (!%p634_p2), 130048  }
   0xb   : > { %637 = sbr.rel (%p634_p2) target bundleno = 6675 (0x1a13), region = 88  ;;  %s4947_s5 = sld [smem:[#allocation6_spill]] (!%p634_p2)  ;;  %3979 = vmatprep.subr.bf16.mxu1 (!%p634_p2), %v4367_v16  ;;  %3995 = vmatprep.subr.bf16.mxu0 (!%p634_p2), %v4367_v16  ;;  %vm1241_vm3 = vcmask (!%p634_p2), 1043456   ;;  %vm1211_vm4 = vcmask (!%p634_p2), 64512   ;;  %vm2028_vm5 = vcmask (!%p634_p2), 523264   ;;  %vm3428_vm6 = vcmask (!%p634_p2), 254976  }
   0xc   : > { %3983 = vmatprep.mubr.msk.bf16.mxu1 (!%p634_p2), %vm4368_vm1, %v4367_v16  ;;  %3999 = vmatprep.mubr.msk.bf16.mxu0 (!%p634_p2), %vm4368_vm1, %v4367_v16  ;;  %s4948_s3 = sld [smem:[#allocation4_spill]] (!%p634_p2)  ;;  %s4949_s4 = sld [smem:[#allocation5_spill]] (!%p634_p2) }
  0x12   : > { %s4952_s25 = smov (!%p750_p3, %s3669_s25), 1 }
  0x13   : > { %s3880_s26 = sshll.u32 %s4952_s25, 4  ;;  %s4245_s27 = smul.u32 192, %s4952_s25 }
  0x14   : > { %s754_s30 = scalar_lea.vmem %s4946_s0, %s3880_s26  ;;  %s3883_s20 = sshll.u32 %s4952_s25, 6 }
  0x15   : > { %s4479_s1 = scalar_lea.vmem %s4947_s5, %s4245_s27  ;;  %v826_v0 = vld [vmem:[%s754_s30] sm:$0xff]  ;;  %v827_v1 = vld [vmem:[%s754_s30 + $0x8] sm:$0xff]  ;;  %s4487_s23 = scalar_lea.vmem %s4936_s13, %s3883_s20 }
  0x16   : > { %v831_v2 = vsel %vm830_vm0, %v826_v0, 0.0  ;;  %v834_v3 = vsel %vm830_vm0, %v827_v1, 0.0  ;;  %v4259_v14 = vld [vmem:[%s4479_s1] sm:$0xff]   ;;  %v4261_v17 = vld [vmem:[%s4479_s1 + $0x8] sm:$0xff]   ;;  %s765_s28 = scalar_lea.vmem %s4948_s3, %s4952_s25  ;;  %s768_s30 = scalar_lea.vmem %s4949_s4, %s4952_s25 }
  0x17   : > { %832 = vadd.xlane.f32.xlu0 %v831_v2  ;;  %v4260_v15 = vld [vmem:[%s4479_s1 + $0x40] sm:$0xff]   ;;  %3980 = vmatpush3.bf16.msra.mxu1 %v4259_v14  ;;  %v4262_v18 = vld [vmem:[%s4479_s1 + $0x48] sm:$0xff]   ;;  %s4246_s18 = smul.u32 12, %s4952_s25  ;;  %s4561_s22 = sshll.u32 %s4952_s25, 1 }
  0x18   : > { %3996 = vmatpush3.bf16.msra.mxu0 %v4260_v15  ;;  %3981 = vmatprep.subr.bf16.mxu1 %v4367_v16  ;;  %v3693_v27 = vld [vmem:[%s765_s28] ss:$0 sm:$0xff]  ;;  %v4264_v37 = vld [vmem:[%s4479_s1 + $0x28] sm:$0xff]   ;;  %s4950_s28 = sld [smem:[#allocation3_spill]]  ;;  %s3881_s0 = sshll.u32 %s4952_s25, 5 }
  0x19   : > { %3997 = vmatprep.subr.bf16.mxu0 %v4367_v16  ;;  %v3694_v31 = vld [vmem:[%s768_s30] ss:$0 sm:$0xff]  ;;  %s4541_s21 = scalar_lea.vmem %s4929_s6, %s4246_s18  ;;  %s4642_s19 = scalar_lea.vmem %s4930_s7, %s3881_s0 }
  0x1a   : > { %v4263_v35 = vld [vmem:[%s4479_s1 + $0x20] sm:$0xff]   ;;  %s4667_s27 = scalar_lea.vmem %s4931_s8, %s4561_s22  ;;  %s4681_s30 = scalar_lea.vmem %s4934_s11, %s3881_s0 }
  0x1b   : > { %835 = vadd.xlane.f32.xlu0 %v834_v3  ;;  %3982 = vmatpush3.bf16.msra.mxu1 %v4261_v17  ;;  %v3704_v46 = vld [vmem:[%s4541_s21 + $0x2] ss:$0 sm:$0xff]  ;;  %v3713_v50 = vld [vmem:[%s4541_s21 + $0x4] ss:$0 sm:$0xff]  ;;  %v3695_v55 = vld [vmem:[%s4541_s21] ss:$0 sm:$0xff]  ;;  %s4691_s18 = scalar_lea.vmem %s4932_s9, %s4561_s22  ;;  %s4716_s0 = scalar_lea.vmem %s4935_s12, %s4561_s22 }
  0x1c   : > { %3998 = vmatpush3.bf16.msra.mxu0 %v4262_v18  ;;  %3987 = vmatprep.subr.bf16.mxu1 %v4367_v16  ;;  %s4745_s26 = scalar_lea.vmem %s4938_s15, %s4561_s22  ;;  %s4752_s5 = scalar_lea.vmem %s4939_s16, %s4561_s22 }
  0x1d   : > { %4009 = vmatprep.subr.bf16.mxu0 %v4367_v16 }
  0x1e   : > { %s758_s29 = scalar_lea.vmem %s4950_s28, %s4561_s22  ;;  %s4698_s28 = scalar_lea.vmem %s4933_s10, %s4561_s22 }
  0xa4   : > { %v833_v4 = vpop.xlane.xlu0 %832 }
  0xa5   : > { %v838_v5 = vmul.f32 0.03125, %v833_v4 }
  0xa7   : > { %v840_v6 = vsub.f32 %v826_v0, %v838_v5  ;;  %v4369_v5 = vmov 1966171168  }
  0xa8   : > { %v836_v7 = vpop.xlane.xlu0 %835 }
  0xa9   : > { %v839_v8 = vmul.f32 0.03125, %v836_v7  ;;  %v842_v9 = vmul.f32 %v840_v6, %v840_v6  ;;  %v1180_v7 = vlaneseq }
  0xab   : > { %v841_v10 = vsub.f32 %v827_v1, %v839_v8  ;;  %v844_v11 = vsel %vm830_vm0, %v842_v9, 0.0  ;;  %v874_v8 = vld [vmem:[%s758_s29] sm:$0x3]  ;;  %s4726_s29 = scalar_lea.vmem %s4937_s14, %s4561_s22 }
  0xac   : > { %845 = vadd.xlane.f32.xlu1 %v844_v11  ;;  %v875_v9 = vsub.f32 1.0, %v874_v8  ;;  %v1181_v11 = vshrl.u32 %v1180_v7, 7 }
  0xad   : > { %v843_v12 = vmul.f32 %v841_v10, %v841_v10 }
  0xae   : > { %v1201_v18 = vsub.s32 0, %v1181_v11 }
  0xaf   : > { %v847_v13 = vsel %vm830_vm0, %v843_v12, 0.0  ;;  %v876_v12 = vmul.f32 -1e+09, %v875_v9 }
  0xb0   : > { %848 = vadd.xlane.f32.xlu1 %v847_v13 }
 0x139   : > { %v846_v19 = vpop.xlane.xlu1 %845 }
 0x13a   : > { %v850_v20 = vmul.f32 0.03125, %v846_v19 }
 0x13c   : > { %v852_v21 = vadd.f32 1e-12, %v850_v20 }
 0x13d   : > { %v849_v22 = vpop.xlane.xlu1 %848 }
 0x13e   : > { %4299 = vrsqrt.f32 %v852_v21  ;;  %v851_v23 = vmul.f32 0.03125, %v849_v22 }
 0x140   : > { %v853_v24 = vadd.f32 1e-12, %v851_v23 }
 0x142   : > { %4301 = vrsqrt.f32 %v853_v24 }
 0x148   : > { %v4300_v25 = vpop.eup %4299 }
 0x149   : > { %v856_v26 = vmul.f32 %v4300_v25, %v840_v6  ;;  %v1178_v6 = vunpack.c.l.s4 %v4369_v5 }
 0x14b   : > { %v864_v29 = vmul.f32 %v3693_v27, %v856_v26 }
 0x14c   : > { %v4302_v28 = vpop.eup %4301 }
 0x14d   : > { %v857_v30 = vmul.f32 %v4302_v28, %v841_v10  ;;  %v4513_v33 = vadd.f32 %v3694_v31, %v864_v29  ;;  %v1179_v10 = vunpack.c.0.s8 %v1178_v6 }
 0x14f   : > { %v865_v32 = vmul.f32 %v3693_v27, %v857_v30  ;;  %v1182_v13 = vsub.s32 %v1179_v10, %v1181_v11 }
 0x151   : > { %v4515_v34 = vadd.f32 %v3694_v31, %v865_v32  ;;  %v1183_v14 = vrot.slane %v876_v12, %v1182_v13 }
 0x153   : > { %v4520_v36 = vpack.c.bf16 %v4515_v34, %v4513_v33  ;;  %v1184_v15 = vcombine.high %v1183_v14, %v1183_v14  ;;  %v1191_v17 = vrot.slane %v1183_v14, %v1182_v13 }
 0x155   : > { %3984 = vmatmul.mubr.msk.bf16.vlgmr.msra.gmra.mrb[0].mxu1 %vm830_vm0, %v4520_v36  ;;  %4000 = vmatmul.mubr.msk.bf16.vlgmr.msra.gmra.mrb[0].mxu0 %vm830_vm0, %v4520_v36  ;;  %v1198_v19 = vrot.slane %v1184_v15, %v1182_v13  ;;  %v4567_v20 = vrot.slane %v1191_v17, %v1201_v18 }
 0x156   : > { %3988 = vmatpush3.bf16.msra.mxu1 %v4263_v35  ;;  %3991 = vmatprep.mubr.msk.bf16.mxu1 %vm4368_vm1, %v4367_v16 }
 0x157   : > { %3989 = vmatprep.subr.bf16.mxu1 %v4367_v16  ;;  %4011 = vmatprep.mubr.msk.bf16.mxu0 %vm4368_vm1, %v4367_v16  ;;  %v4569_v24 = vrot.slane %v1198_v19, %v1201_v18 }
 0x15a   : > { %3990 = vmatpush3.bf16.msra.mxu1 %v4264_v37 }
 0x15b   : > { %4003 = vmatprep.subr.bf16.mxu1 %v4367_v16 }
 0x15d   : > { %3992 = vmatmul.mubr.msk.bf16.vlgmr.msra.gmra.mrb[4].mxu1 %vm830_vm0, %v4520_v36 }
 0x15e   : > { %4005 = vmatprep.mubr.msk.bf16.mxu1 %vm4368_vm1, %v4367_v16 }
 0x228   : > { %v938_v38 = vpop.f32.mrb[0].mxu1  ;;  %v1070_v39 = vpop.f32.mrb[0].mxu0 }
 0x229   : > { %v3985_v40 = vpop.f32.mrb[1].mxu1  ;;  %v4001_v41 = vpop.f32.mrb[1].mxu0  ;;  %v1071_v56 = vadd.f32 %v3713_v50, %v1070_v39  ;;  %v939_v59 = vadd.f32 %v3695_v55, %v938_v38 }
 0x22a   : > { %v941_v42 = vpop.f32.mrb[2].mxu1  ;;  %v1073_v43 = vpop.f32.mrb[2].mxu0 }
 0x22b   : > { %v3986_v44 = vpop.f32.mrb[3].mxu1  ;;  %v4002_v45 = vpop.f32.mrb[3].mxu0  ;;  %v1074_v60 = vadd.f32 %v3713_v50, %v1073_v43  ;;  %v1236_v62 = vpack.c.bf16 %v1071_v56, %v1071_v56  ;;  %v942_v63 = vadd.f32 %v3695_v55, %v941_v42  ;;  %v1077_v0 = vpack.c.bf16 %v939_v59, %v939_v59  ;;  %v4267_v59 = vld [vmem:[%s4479_s1 + $0x18] sm:$0xff]  }
 0x22d   : > { %v1237_v1 = vpack.c.bf16 %v1074_v60, %v1074_v60  ;;  %v1243_v2 = vsel %vm1241_vm3, %v1236_v62, 0  ;;  %v1078_v3 = vpack.c.bf16 %v942_v63, %v942_v63  ;;  %v4268_v60 = vld [vmem:[%s4479_s1 + $0x38] sm:$0xff]  }
 0x22e   : > { %v4270_v62 = vld [vmem:[%s4479_s1 + $0x58] sm:$0xff]  }
 0x22f   : > { %v1289_v4 = vsel %vm1241_vm3, %v1237_v1, 0 }
 0x230   : > { %v1004_v47 = vpop.f32.mrb[4].mxu1 }
 0x231   : > { %v1005_v48 = vadd.f32 %v3704_v46, %v1004_v47  ;;  %v3993_v49 = vpop.f32.mrb[5].mxu1 }
 0x232   : > { %v1007_v51 = vpop.f32.mrb[6].mxu1 }
 0x233   : > { %v1079_v52 = vpack.c.bf16 %v1005_v48, %v1005_v48  ;;  %v1008_v53 = vadd.f32 %v3704_v46, %v1007_v51  ;;  %v3994_v54 = vpop.f32.mrb[7].mxu1 }
 0x234   : > { %v4265_v54 = vld [vmem:[%s4479_s1 + $0x10] sm:$0xff]  }
 0x235   : > { %v1086_v57 = vsel %vm1081_vm2, %v1079_v52, 0  ;;  %v1080_v58 = vpack.c.bf16 %v1008_v53, %v1008_v53 }
 0x236   : > { %4004 = vmatpush3.bf16.xpose.msra.mxu1 %v1086_v57  ;;  %v4266_v57 = vld [vmem:[%s4479_s1 + $0x30] sm:$0xff]  }
 0x237   : > { %v1132_v61 = vsel %vm1081_vm2, %v1080_v58, 0  ;;  %4015 = vmatprep.subr.bf16.mxu1 %v4367_v16 }
 0x238   : > { %4010 = vmatpush3.bf16.xpose.msra.mxu0 %v1132_v61  ;;  %v4269_v61 = vld [vmem:[%s4479_s1 + $0x50] sm:$0xff]  }
 0x239   : > { %4021 = vmatprep.subr.bf16.mxu0 %v4367_v16 }
 0x23d   : > { %4006 = vmatmul.mubr.msk.bf16.vlgmr.msra.gmra.mrb[8].mxu1 %vm1081_vm2, %v1077_v0 }
 0x23e   : > { %4016 = vmatpush3.bf16.msra.mxu1 %v1243_v2  ;;  %4017 = vmatprep.mubr.msk.bf16.mxu1 %vm4368_vm1, %v4367_v16 }
 0x23f   : > { %4012 = vmatmul.mubr.msk.bf16.vlgmr.msra.gmra.mrb[4].mxu0 %vm1081_vm2, %v1078_v3  ;;  %4027 = vmatprep.subr.bf16.mxu1 %v4367_v16 }
 0x240   : > { %4022 = vmatpush3.bf16.msra.mxu0 %v1289_v4  ;;  %4023 = vmatprep.mubr.msk.bf16.mxu0 %vm4368_vm1, %v4367_v16 }
 0x241   : > { %4035 = vmatprep.subr.bf16.mxu0 %v4367_v16 }
 0x310   : > { %v1122_v21 = vpop.f32.mrb[8].mxu1 }
 0x311   : > { %v1174_v22 = vmul.f32 0.25, %v1122_v21  ;;  %v4007_v23 = vpop.f32.mrb[9].mxu1  ;;  %v3726_v21 = vld [vmem:[%s4541_s21 + $0x1] ss:$0 sm:$0xff] }
 0x312   : > { %v1125_v25 = vpop.f32.mrb[10].mxu1  ;;  %v1168_v26 = vpop.f32.mrb[4].mxu0 }
 0x313   : > { %v1175_v27 = vmul.f32 0.25, %v1168_v26  ;;  %v4008_v28 = vpop.f32.mrb[11].mxu1  ;;  %v4013_v29 = vpop.f32.mrb[5].mxu0  ;;  %v1209_v30 = vadd.f32 %v4567_v20, %v1174_v22  ;;  %v3744_v22 = vld [vmem:[%s4541_s21 + $0x5] ss:$0 sm:$0xff] }
 0x314   : > { %v1171_v31 = vpop.f32.mrb[6].mxu0 }
 0x315   : > { %v4014_v32 = vpop.f32.mrb[7].mxu0  ;;  %v1212_v35 = vsel %vm1211_vm4, %v1209_v30, -inf  ;;  %v1210_v37 = vadd.f32 %v4569_v24, %v1175_v27 }
 0x316   : > { %1213 = vmax.xlane.f32.xlu1 %v1212_v35 }
 0x317   : > { %v1215_v38 = vsel %vm1211_vm4, %v1210_v37, -inf }
 0x318   : > { %1216 = vmax.xlane.f32.xlu0 %v1215_v38 }
 0x3a3   : > { %v1214_v39 = vpop.xlane.xlu1 %1213 }
 0x3a4   : > { %v1218_v40 = vsub.f32 %v1209_v30, %v1214_v39 }
 0x3a5   : > { %v1217_v41 = vpop.xlane.xlu0 %1216 }
 0x3a6   : > { %v1220_v42 = vmul.f32 1.442695, %v1218_v40  ;;  %v1219_v43 = vsub.f32 %v1210_v37, %v1217_v41 }
 0x3a8   : > { %4303 = vpow2.f32 %v1220_v42  ;;  %v1222_v44 = vmul.f32 1.442695, %v1219_v43 }
 0x3aa   : > { %4305 = vpow2.f32 %v1222_v44 }
 0x3b2   : > { %v4304_v45 = vpop.eup %4303 }
 0x3b3   : > { %v1224_v46 = vsel %vm1211_vm4, %v4304_v45, 0.0 }
 0x3b4   : > { %v4306_v47 = vpop.eup %4305  ;;  %1225 = vadd.xlane.f32.xlu1 %v1224_v46 }
 0x3b5   : > { %v1227_v48 = vsel %vm1211_vm4, %v4306_v47, 0.0 }
 0x3b6   : > { %1228 = vadd.xlane.f32.xlu0 %v1227_v48 }
 0x441   : > { %v1226_v49 = vpop.xlane.xlu1 %1225 }
 0x442   : > { %4307 = vrcp.f32 %v1226_v49 }
 0x443   : > { %v1229_v50 = vpop.xlane.xlu0 %1228 }
 0x444   : > { %4309 = vrcp.f32 %v1229_v50 }
 0x44c   : > { %v4308_v51 = vpop.eup %4307 }
 0x44d   : > { %v1231_v52 = vmul.f32 %v4308_v51, %v4304_v45 }
 0x44e   : > { %v4310_v53 = vpop.eup %4309 }
 0x44f   : > { %v1233_v55 = vmul.f32 %v4310_v53, %v4306_v47  ;;  %v1234_v56 = vpack.c.bf16 %v1231_v52, %v1231_v52 }
 0x451   : > { %4018 = vmatmul.mubr.msk.bf16.vlgmr.msra.gmra.mrb[12].mxu1 %vm1211_vm4, %v1234_v56  ;;  %v1235_v58 = vpack.c.bf16 %v1233_v55, %v1233_v55 }
 0x452   : > { %4028 = vmatpush3.bf16.msra.mxu1 %v4265_v54  ;;  %4031 = vmatprep.mubr.msk.bf16.mxu1 %vm4368_vm1, %v4367_v16 }
 0x453   : > { %4024 = vmatmul.mubr.msk.bf16.vlgmr.msra.gmra.mrb[8].mxu0 %vm1211_vm4, %v1235_v58  ;;  %4029 = vmatprep.subr.bf16.mxu1 %v4367_v16 }
 0x454   : > { %4036 = vmatpush3.bf16.msra.mxu0 %v4266_v57  ;;  %4039 = vmatprep.mubr.msk.bf16.mxu0 %vm4368_vm1, %v4367_v16 }
 0x455   : > { %4037 = vmatprep.subr.bf16.mxu0 %v4367_v16 }
 0x456   : > { %4030 = vmatpush3.bf16.msra.mxu1 %v4267_v59 }
 0x457   : > { %4043 = vmatprep.subr.bf16.mxu1 %v4367_v16 }
 0x458   : > { %4038 = vmatpush3.bf16.msra.mxu0 %v4268_v60 }
 0x459   : > { %4032 = vmatmul.mubr.msk.bf16.vlgmr.msra.gmra.mrb[16].mxu1 %vm830_vm0, %v4520_v36  ;;  %4051 = vmatprep.subr.bf16.mxu0 %v4367_v16 }
 0x45a   : > { %4044 = vmatpush3.bf16.msra.mxu1 %v4269_v61  ;;  %4047 = vmatprep.mubr.msk.bf16.mxu1 %vm4368_vm1, %v4367_v16 }
 0x45b   : > { %4040 = vmatmul.mubr.msk.bf16.vlgmr.msra.gmra.mrb[12].mxu0 %vm830_vm0, %v4520_v36  ;;  %4045 = vmatprep.subr.bf16.mxu1 %v4367_v16 }
 0x45c   : > { %4053 = vmatprep.mubr.msk.bf16.mxu0 %vm4368_vm1, %v4367_v16 }
 0x45e   : > { %4046 = vmatpush3.bf16.msra.mxu1 %v4270_v62 }
 0x45f   : > { %4057 = vmatprep.subr.bf16.mxu1 %v4367_v16 }
 0x461   : > { %4048 = vmatmul.mubr.msk.bf16.vlgmr.msra.gmra.mrb[20].mxu1 %vm830_vm0, %v4520_v36  ;;  %v3735_v36 = vld [vmem:[%s4541_s21 + $0x3] ss:$0 sm:$0xff] }
 0x462   : > { %4059 = vmatprep.mubr.msk.bf16.mxu1 %vm4368_vm1, %v4367_v16 }
 0x524   : > { %v4607_v63 = vpop.f32.mrb[12].mxu1 }
 0x525   : > { %v4019_v0 = vpop.f32.mrb[13].mxu1 }
 0x526   : > { %v1282_v1 = vpop.f32.mrb[14].mxu1  ;;  %v4609_v2 = vpop.f32.mrb[8].mxu0 }
 0x527   : > { %v1333_v3 = vpack.c.bf16 %v4609_v2, %v4607_v63  ;;  %v4020_v4 = vpop.f32.mrb[15].mxu1  ;;  %v4025_v5 = vpop.f32.mrb[9].mxu0 }
 0x528   : > { %v1328_v6 = vpop.f32.mrb[10].mxu0 }
 0x529   : > { %v4026_v7 = vpop.f32.mrb[11].mxu0 }
 0x52c   : > { %v1393_v8 = vpop.f32.mrb[16].mxu1 }
 0x52d   : > { %v4033_v9 = vpop.f32.mrb[17].mxu1  ;;  %v1394_v27 = vadd.f32 %v3726_v21, %v1393_v8 }
 0x52e   : > { %v1396_v10 = vpop.f32.mrb[18].mxu1  ;;  %v1459_v11 = vpop.f32.mrb[12].mxu0 }
 0x52f   : > { %v1460_v12 = vadd.f32 %v3735_v36, %v1459_v11  ;;  %v4034_v13 = vpop.f32.mrb[19].mxu1  ;;  %v4041_v14 = vpop.f32.mrb[13].mxu0  ;;  %v1397_v32 = vadd.f32 %v3726_v21, %v1396_v10  ;;  %v1532_v39 = vpack.c.bf16 %v1394_v27, %v1394_v27 }
 0x530   : > { %v1462_v15 = vpop.f32.mrb[14].mxu0  ;;  %v4271_v13 = vld [vmem:[%s4642_s19] sm:$0xff]  }
 0x531   : > { %v1534_v17 = vpack.c.bf16 %v1460_v12, %v1460_v12  ;;  %v1463_v18 = vadd.f32 %v3735_v36, %v1462_v15  ;;  %v4042_v19 = vpop.f32.mrb[15].mxu0  ;;  %v1533_v41 = vpack.c.bf16 %v1397_v32, %v1397_v32  ;;  %v4272_v15 = vld [vmem:[%s4642_s19 + $0x8] sm:$0xff]  }
 0x533   : > { %v1540_v23 = vsel %vm1081_vm2, %v1534_v17, 0  ;;  %v1535_v25 = vpack.c.bf16 %v1463_v18, %v1463_v18 }
 0x534   : > { %v1525_v26 = vpop.f32.mrb[20].mxu1  ;;  %4052 = vmatpush3.bf16.xpose.msra.mxu0 %v1540_v23 }
 0x535   : > { %v1586_v28 = vsel %vm1081_vm2, %v1535_v25, 0  ;;  %v1526_v29 = vadd.f32 %v3744_v22, %v1525_v26  ;;  %v4049_v30 = vpop.f32.mrb[21].mxu1  ;;  %4063 = vmatprep.subr.bf16.mxu0 %v4367_v16 }
 0x536   : > { %v1528_v31 = vpop.f32.mrb[22].mxu1  ;;  %4058 = vmatpush3.bf16.xpose.msra.mxu1 %v1586_v28 }
 0x537   : > { %v1656_v35 = vpack.c.bf16 %v1526_v29, %v1526_v29  ;;  %v1529_v37 = vadd.f32 %v3744_v22, %v1528_v31  ;;  %v4050_v38 = vpop.f32.mrb[23].mxu1  ;;  %4069 = vmatprep.subr.bf16.mxu1 %v4367_v16 }
 0x539   : > { %v1657_v40 = vpack.c.bf16 %v1529_v37, %v1529_v37  ;;  %v1662_v42 = vsel %vm1241_vm3, %v1656_v35, 0  ;;  %v3758_v35 = vld [vmem:[%s4667_s27] ss:$0 sm:$0xff] }
 0x53b   : > { %4054 = vmatmul.mubr.msk.bf16.vlgmr.msra.gmra.mrb[16].mxu0 %vm1081_vm2, %v1532_v39  ;;  %v1708_v43 = vsel %vm1241_vm3, %v1657_v40, 0 }
 0x53c   : > { %4064 = vmatpush3.bf16.msra.mxu0 %v1662_v42  ;;  %4065 = vmatprep.mubr.msk.bf16.mxu0 %vm4368_vm1, %v4367_v16 }
 0x53d   : > { %4060 = vmatmul.mubr.msk.bf16.vlgmr.msra.gmra.mrb[24].mxu1 %vm1081_vm2, %v1533_v41  ;;  %4075 = vmatprep.subr.bf16.mxu0 %v4367_v16 }
 0x53e   : > { %4070 = vmatpush3.bf16.msra.mxu1 %v1708_v43  ;;  %4071 = vmatprep.mubr.msk.bf16.mxu1 %vm4368_vm1, %v4367_v16 }
 0x53f   : > { %4081 = vmatprep.subr.bf16.mxu1 %v4367_v16 }
 0x60e   : > { %v1576_v44 = vpop.f32.mrb[16].mxu0 }
 0x60f   : > { %v1628_v45 = vmul.f32 0.25, %v1576_v44  ;;  %v4055_v46 = vpop.f32.mrb[17].mxu0 }
 0x610   : > { %v1579_v47 = vpop.f32.mrb[18].mxu0  ;;  %v1622_v48 = vpop.f32.mrb[24].mxu1 }
 0x611   : > { %v1629_v49 = vmul.f32 0.25, %v1622_v48  ;;  %v4056_v50 = vpop.f32.mrb[19].mxu0  ;;  %v4061_v51 = vpop.f32.mrb[25].mxu1  ;;  %v1630_v52 = vadd.f32 %v1628_v45, %v4567_v20 }
 0x612   : > { %v1625_v53 = vpop.f32.mrb[26].mxu1 }
 0x613   : > { %v4062_v54 = vpop.f32.mrb[27].mxu1  ;;  %v1632_v55 = vsel %vm1211_vm4, %v1630_v52, -inf  ;;  %v1631_v56 = vadd.f32 %v1629_v49, %v4569_v24  ;;  %v4273_v53 = vld [vmem:[%s4681_s30] sm:$0xff]  }
 0x614   : > { %1633 = vmax.xlane.f32.xlu0 %v1632_v55  ;;  %v4274_v54 = vld [vmem:[%s4681_s30 + $0x8] sm:$0xff]  }
 0x615   : > { %v1635_v57 = vsel %vm1211_vm4, %v1631_v56, -inf }
 0x616   : > { %1636 = vmax.xlane.f32.xlu1 %v1635_v57 }
 0x6a1   : > { %v1634_v58 = vpop.xlane.xlu0 %1633 }
 0x6a2   : > { %v1638_v59 = vsub.f32 %v1630_v52, %v1634_v58 }
 0x6a3   : > { %v1637_v60 = vpop.xlane.xlu1 %1636 }
 0x6a4   : > { %v1640_v61 = vmul.f32 1.442695, %v1638_v59  ;;  %v1639_v62 = vsub.f32 %v1631_v56, %v1637_v60 }
 0x6a6   : > { %4311 = vpow2.f32 %v1640_v61  ;;  %v1642_v0 = vmul.f32 1.442695, %v1639_v62  ;;  %v3759_v62 = vld [vmem:[%s4691_s18] ss:$0 sm:$0xff] }
 0x6a8   : > { %4313 = vpow2.f32 %v1642_v0 }
 0x6b0   : > { %v4312_v1 = vpop.eup %4311 }
 0x6b1   : > { %v1644_v4 = vsel %vm1211_vm4, %v4312_v1, 0.0 }
 0x6b2   : > { %v4314_v5 = vpop.eup %4313  ;;  %1645 = vadd.xlane.f32.xlu0 %v1644_v4 }
 0x6b3   : > { %v1647_v6 = vsel %vm1211_vm4, %v4314_v5, 0.0 }
 0x6b4   : > { %1648 = vadd.xlane.f32.xlu1 %v1647_v6  ;;  %v3760_v6 = vld [vmem:[%s4698_s28] ss:$0 sm:$0xff] }
 0x73f   : > { %v1646_v7 = vpop.xlane.xlu0 %1645 }
 0x740   : > { %4315 = vrcp.f32 %v1646_v7 }
 0x741   : > { %v1649_v8 = vpop.xlane.xlu1 %1648 }
 0x742   : > { %4317 = vrcp.f32 %v1649_v8 }
 0x74a   : > { %v4316_v36 = vpop.eup %4315 }
 0x74b   : > { %v1651_v9 = vmul.f32 %v4316_v36, %v4312_v1 }
 0x74c   : > { %v4318_v10 = vpop.eup %4317 }
 0x74d   : > { %v1653_v11 = vmul.f32 %v4318_v10, %v4314_v5  ;;  %v1654_v12 = vpack.c.bf16 %v1651_v9, %v1651_v9  ;;  %v4275_v10 = vld [vmem:[%s4487_s23] sm:$0xff]  }
 0x74f   : > { %4066 = vmatmul.mubr.msk.bf16.vlgmr.msra.gmra.mrb[20].mxu0 %vm1211_vm4, %v1654_v12  ;;  %v1655_v14 = vpack.c.bf16 %v1653_v11, %v1653_v11  ;;  %v4276_v11 = vld [vmem:[%s4487_s23 + $0x8] sm:$0xff]   ;;  %v4277_v12 = vld [vmem:[%s4487_s23 + $0x10] sm:$0xff]  }
 0x750   : > { %4077 = vmatprep.mubr.msk.bf16.mxu0 %vm4368_vm1, %v4367_v16  ;;  %4076 = vmatpush3.bf16.msra.mxu0 %v4272_v15 }
 0x751   : > { %4072 = vmatmul.mubr.msk.bf16.vlgmr.msra.gmra.mrb[28].mxu1 %vm1211_vm4, %v1655_v14  ;;  %4087 = vmatprep.subr.bf16.mxu0 %v4367_v16  ;;  %v3761_v14 = vld [vmem:[%s4716_s0] ss:$0 sm:$0xff] }
 0x752   : > { %4082 = vmatpush3.bf16.msra.mxu1 %v4271_v13  ;;  %4083 = vmatprep.mubr.msk.bf16.mxu1 %vm4368_vm1, %v4367_v16  ;;  %v4278_v13 = vld [vmem:[%s4487_s23 + $0x18] sm:$0xff]  }
 0x753   : > { %4095 = vmatprep.subr.bf16.mxu1 %v4367_v16 }
 0x759   : > { %4084 = vmatmul.mubr.msk.bf16.vlgmr.msra.gmra.mrb[32].mxu1 %vm1081_vm2, %v1333_v3 }
 0x75a   : > { %4103 = vmatprep.mubr.msk.bf16.mxu1 %vm4368_vm1, %v4367_v16  ;;  %4096 = vmatpush3.bf16.msra.mxu1 %v4275_v10 }
 0x75b   : > { %4097 = vmatprep.subr.bf16.mxu1 %v4367_v16 }
 0x75e   : > { %4098 = vmatpush3.bf16.msra.mxu1 %v4276_v11  ;;  %v3771_v11 = vld [vmem:[%s4745_s26] ss:$0 sm:$0xff] }
 0x75f   : > { %4099 = vmatprep.subr.bf16.mxu1 %v4367_v16 }
 0x762   : > { %4100 = vmatpush3.bf16.msra.mxu1 %v4277_v12 }
 0x763   : > { %4101 = vmatprep.subr.bf16.mxu1 %v4367_v16 }
 0x766   : > { %4102 = vmatpush3.bf16.msra.mxu1 %v4278_v13 }
 0x767   : > { %4123 = vmatprep.subr.bf16.mxu1 %v4367_v16 }
 0x822   : > { %v1698_v17 = vpop.f32.mrb[20].mxu0 }
 0x823   : > { %v4067_v18 = vpop.f32.mrb[21].mxu0 }
 0x824   : > { %v1701_v19 = vpop.f32.mrb[22].mxu0  ;;  %v1744_v21 = vpop.f32.mrb[28].mxu1 }
 0x825   : > { %v1753_v22 = vpack.c.bf16 %v1744_v21, %v1698_v17  ;;  %v4068_v23 = vpop.f32.mrb[23].mxu0  ;;  %v4073_v25 = vpop.f32.mrb[29].mxu1 }
 0x826   : > { %v1747_v26 = vpop.f32.mrb[30].mxu1 }
 0x827   : > { %v4074_v27 = vpop.f32.mrb[31].mxu1  ;;  %4078 = vmatmul.mubr.msk.bf16.vlgmr.msra.gmra.mrb[24].mxu0 %vm1081_vm2, %v1753_v22 }
 0x828   : > { %4091 = vmatprep.mubr.msk.bf16.mxu0 %vm4368_vm1, %v4367_v16  ;;  %4088 = vmatpush3.bf16.msra.mxu0 %v4273_v53 }
 0x829   : > { %4089 = vmatprep.subr.bf16.mxu0 %v4367_v16 }
 0x82c   : > { %v1847_v63 = vpop.f32.mrb[32].mxu1  ;;  %4090 = vmatpush3.bf16.msra.mxu0 %v4274_v54 }
 0x82d   : > { %v4085_v2 = vpop.f32.mrb[33].mxu1  ;;  %4107 = vmatprep.subr.bf16.mxu0 %v4367_v16 }
 0x82e   : > { %v1850_v3 = vpop.f32.mrb[34].mxu1 }
 0x82f   : > { %v4086_v28 = vpop.f32.mrb[35].mxu1 }
 0x8fa   : > { %v1797_v29 = vpop.f32.mrb[24].mxu0 }
 0x8fb   : > { %v1848_v30 = vadd.f32 %v1847_v63, %v1797_v29  ;;  %v4079_v31 = vpop.f32.mrb[25].mxu0 }
 0x8fc   : > { %v1800_v32 = vpop.f32.mrb[26].mxu0 }
 0x8fd   : > { %v1854_v37 = vadd.f32 %v1848_v30, %v4513_v33  ;;  %v1851_v38 = vadd.f32 %v1850_v3, %v1800_v32  ;;  %v4080_v39 = vpop.f32.mrb[27].mxu0 }
 0x8ff   : > { %v1855_v40 = vadd.f32 %v1851_v38, %v4515_v34  ;;  %v1863_v41 = vadd.f32 %v3758_v35, %v1854_v37 }
 0x901   : > { %v1867_v42 = vsel %vm830_vm0, %v1863_v41, 0.0  ;;  %v1864_v43 = vadd.f32 %v3758_v35, %v1855_v40 }
 0x902   : > { %1868 = vadd.xlane.f32.xlu0 %v1867_v42 }
 0x903   : > { %v1870_v44 = vsel %vm830_vm0, %v1864_v43, 0.0 }
 0x904   : > { %1871 = vadd.xlane.f32.xlu1 %v1870_v44  ;;  %v3770_v44 = vld [vmem:[%s4726_s29] ss:$0 sm:$0xff] }
 0x98f   : > { %v1869_v45 = vpop.xlane.xlu0 %1868 }
 0x990   : > { %v1873_v46 = vmul.f32 0.03125, %v1869_v45 }
 0x991   : > { %v1872_v47 = vpop.xlane.xlu1 %1871 }
 0x992   : > { %v1875_v48 = vsub.f32 %v1863_v41, %v1873_v46  ;;  %v1874_v49 = vmul.f32 0.03125, %v1872_v47 }
 0x994   : > { %v1876_v50 = vsub.f32 %v1864_v43, %v1874_v49  ;;  %v1877_v33 = vmul.f32 %v1875_v48, %v1875_v48 }
 0x996   : > { %v1879_v51 = vsel %vm830_vm0, %v1877_v33, 0.0  ;;  %v1878_v52 = vmul.f32 %v1876_v50, %v1876_v50 }
 0x997   : > { %1880 = vadd.xlane.f32.xlu0 %v1879_v51 }
 0x998   : > { %v1882_v34 = vsel %vm830_vm0, %v1878_v52, 0.0 }
 0x999   : > { %1883 = vadd.xlane.f32.xlu1 %v1882_v34 }
 0xa24   : > { %v1881_v55 = vpop.xlane.xlu0 %1880 }
 0xa25   : > { %v1885_v56 = vmul.f32 0.03125, %v1881_v55 }
 0xa26   : > { %v1884_v57 = vpop.xlane.xlu1 %1883 }
 0xa27   : > { %v1887_v58 = vadd.f32 1e-12, %v1885_v56  ;;  %v1886_v59 = vmul.f32 0.03125, %v1884_v57 }
 0xa29   : > { %4319 = vrsqrt.f32 %v1887_v58  ;;  %v1888_v60 = vadd.f32 1e-12, %v1886_v59 }
 0xa2b   : > { %4321 = vrsqrt.f32 %v1888_v60 }
 0xa33   : > { %v4320_v61 = vpop.eup %4319 }
 0xa34   : > { %v1891_v0 = vmul.f32 %v4320_v61, %v1875_v48 }
 0xa35   : > { %v4322_v1 = vpop.eup %4321 }
 0xa36   : > { %v1899_v4 = vmul.f32 %v3759_v62, %v1891_v0  ;;  %v1892_v5 = vmul.f32 %v4322_v1, %v1876_v50  ;;  %v4280_v0 = vld [vmem:[%s4479_s1 + $0xa0] sm:$0xff]   ;;  %v4281_v1 = vld [vmem:[%s4479_s1 + $0x68] sm:$0xff]  }
 0xa38   : > { %v1900_v7 = vmul.f32 %v3759_v62, %v1892_v5  ;;  %v1907_v8 = vadd.f32 %v3760_v6, %v1899_v4  ;;  %v4279_v62 = vld [vmem:[%s4479_s1 + $0x60] sm:$0xff]   ;;  %v4282_v4 = vld [vmem:[%s4479_s1 + $0xa8] sm:$0xff]  }
 0xa3a   : > { %v1908_v36 = vadd.f32 %v3760_v6, %v1900_v7 }
 0xa3c   : > { %v1913_v9 = vpack.c.bf16 %v1908_v36, %v1907_v8 }
 0xa3e   : > { %4092 = vmatmul.mubr.msk.bf16.vlgmr.msra.gmra.mrb[28].mxu0 %vm830_vm0, %v1913_v9 }
 0xa3f   : > { %4111 = vmatprep.mubr.msk.bf16.mxu0 %vm4368_vm1, %v4367_v16  ;;  %4108 = vmatpush3.bf16.msra.mxu0 %v4279_v62 }
 0xa40   : > { %4109 = vmatprep.subr.bf16.mxu0 %v4367_v16 }
 0xa43   : > { %4110 = vmatpush3.bf16.msra.mxu0 %v4281_v1 }
 0xa44   : > { %4115 = vmatprep.subr.bf16.mxu0 %v4367_v16 }
 0xb11   : > { %v1970_v15 = vpop.f32.mrb[28].mxu0 }
 0xb12   : > { %v1971_v17 = vadd.f32 %v3761_v14, %v1970_v15  ;;  %v4093_v18 = vpop.f32.mrb[29].mxu0 }
 0xb13   : > { %v1973_v19 = vpop.f32.mrb[30].mxu0 }
 0xb14   : > { %v1977_v21 = vmul.f32 %v1971_v17, %v1971_v17  ;;  %v1974_v22 = vadd.f32 %v3761_v14, %v1973_v19  ;;  %v4094_v23 = vpop.f32.mrb[31].mxu0 }
 0xb16   : > { %v1979_v25 = vmul.f32 %v1977_v21, %v1971_v17  ;;  %v1978_v26 = vmul.f32 %v1974_v22, %v1974_v22 }
 0xb18   : > { %v1981_v27 = vmul.f32 0.044715, %v1979_v25  ;;  %v1980_v63 = vmul.f32 %v1978_v26, %v1974_v22  ;;  %v4284_v25 = vld [vmem:[%s4479_s1 + $0x88] sm:$0xff]  }
 0xb1a   : > { %v1983_v2 = vadd.f32 %v1981_v27, %v1971_v17  ;;  %v1982_v3 = vmul.f32 0.044715, %v1980_v63 }
 0xb1c   : > { %v1985_v28 = vmul.f32 0.7978846, %v1983_v2  ;;  %v1984_v29 = vadd.f32 %v1982_v3, %v1974_v22 }
 0xb1e   : > { %4323 = vtanh.f32 %v1985_v28  ;;  %v1986_v30 = vmul.f32 0.7978846, %v1984_v29 }
 0xb20   : > { %4325 = vtanh.f32 %v1986_v30 }
 0xb28   : > { %v4324_v31 = vpop.eup %4323 }
 0xb29   : > { %v1989_v32 = vadd.f32 1.0, %v4324_v31  ;;  %v3787_v31 = vld [vmem:[%s4541_s21 + $0x8] ss:$0 sm:$0xff] }
 0xb2a   : > { %v4326_v35 = vpop.eup %4325 }
 0xb2b   : > { %v1991_v37 = vmul.f32 0.5, %v1989_v32  ;;  %v1990_v38 = vadd.f32 1.0, %v4326_v35 }
 0xb2d   : > { %v1992_v39 = vmul.f32 0.5, %v1990_v38  ;;  %v1993_v40 = vmul.f32 %v1991_v37, %v1971_v17  ;;  %v3772_v17 = vld [vmem:[%s4752_s5] ss:$0 sm:$0xff]  ;;  %v3796_v38 = vld [vmem:[%s4541_s21 + $0xa] ss:$0 sm:$0xff] }
 0xb2f   : > { %v1994_v41 = vmul.f32 %v1992_v39, %v1974_v22  ;;  %v4283_v22 = vld [vmem:[%s4479_s1 + $0x80] sm:$0xff]  }
 0xb31   : > { %v2003_v42 = vpack.c.bf16 %v1994_v41, %v1993_v40 }
 0xb33   : > { %4104 = vmatmul.mubr.msk.bf16.vlgmr.msra.gmra.mrb[36].mxu1 %vm2028_vm5, %v2003_v42 }
 0xb34   : > { %4127 = vmatprep.mubr.msk.bf16.mxu1 %vm4368_vm1, %v4367_v16  ;;  %4124 = vmatpush3.bf16.msra.mxu1 %v4280_v0 }
 0xb35   : > { %4125 = vmatprep.subr.bf16.mxu1 %v4367_v16 }
 0xb38   : > { %4126 = vmatpush3.bf16.msra.mxu1 %v4282_v4 }
 0xb39   : > { %4137 = vmatprep.subr.bf16.mxu1 %v4367_v16 }
 0xc06   : > { %v2066_v43 = vpop.f32.mrb[36].mxu1 }
 0xc07   : > { %v2073_v45 = vadd.f32 %v2066_v43, %v1907_v8  ;;  %v4105_v46 = vpop.f32.mrb[37].mxu1  ;;  %v3778_v43 = vld [vmem:[%s4541_s21 + $0x6] ss:$0 sm:$0xff] }
 0xc08   : > { %v2069_v47 = vpop.f32.mrb[38].mxu1 }
 0xc09   : > { %v2074_v48 = vadd.f32 %v2069_v47, %v1908_v36  ;;  %v4106_v49 = vpop.f32.mrb[39].mxu1  ;;  %v2082_v50 = vadd.f32 %v3770_v44, %v2073_v45 }
 0xc0b   : > { %v2086_v33 = vsel %vm830_vm0, %v2082_v50, 0.0  ;;  %v2083_v51 = vadd.f32 %v3770_v44, %v2074_v48 }
 0xc0c   : > { %2087 = vadd.xlane.f32.xlu0 %v2086_v33 }
 0xc0d   : > { %v2089_v52 = vsel %vm830_vm0, %v2083_v51, 0.0 }
 0xc0e   : > { %2090 = vadd.xlane.f32.xlu1 %v2089_v52 }
 0xc99   : > { %v2088_v34 = vpop.xlane.xlu0 %2087 }
 0xc9a   : > { %v2092_v53 = vmul.f32 0.03125, %v2088_v34 }
 0xc9b   : > { %v2091_v54 = vpop.xlane.xlu1 %2090 }
 0xc9c   : > { %v2094_v55 = vsub.f32 %v2082_v50, %v2092_v53  ;;  %v2093_v56 = vmul.f32 0.03125, %v2091_v54 }
 0xc9e   : > { %v2095_v57 = vsub.f32 %v2083_v51, %v2093_v56  ;;  %v2096_v58 = vmul.f32 %v2094_v55, %v2094_v55 }
 0xca0   : > { %v2098_v59 = vsel %vm830_vm0, %v2096_v58, 0.0  ;;  %v2097_v60 = vmul.f32 %v2095_v57, %v2095_v57 }
 0xca1   : > { %2099 = vadd.xlane.f32.xlu0 %v2098_v59 }
 0xca2   : > { %v2101_v61 = vsel %vm830_vm0, %v2097_v60, 0.0 }
 0xca3   : > { %2102 = vadd.xlane.f32.xlu1 %v2101_v61 }
 0xd2e   : > { %v2100_v5 = vpop.xlane.xlu0 %2099 }
 0xd2f   : > { %v2104_v6 = vmul.f32 0.03125, %v2100_v5 }
 0xd30   : > { %v2103_v7 = vpop.xlane.xlu1 %2102 }
 0xd31   : > { %v2106_v8 = vadd.f32 1e-12, %v2104_v6  ;;  %v2105_v36 = vmul.f32 0.03125, %v2103_v7 }
 0xd33   : > { %4327 = vrsqrt.f32 %v2106_v8  ;;  %v2107_v9 = vadd.f32 1e-12, %v2105_v36 }
 0xd35   : > { %4329 = vrsqrt.f32 %v2107_v9 }
 0xd3d   : > { %v4328_v10 = vpop.eup %4327 }
 0xd3e   : > { %v2110_v12 = vmul.f32 %v4328_v10, %v2094_v55 }
 0xd3f   : > { %v4330_v13 = vpop.eup %4329 }
 0xd40   : > { %v2118_v14 = vmul.f32 %v3771_v11, %v2110_v12  ;;  %v2111_v15 = vmul.f32 %v4330_v13, %v2095_v57 }
 0xd42   : > { %v2119_v18 = vmul.f32 %v3771_v11, %v2111_v15  ;;  %v4755_v19 = vadd.f32 %v3772_v17, %v2118_v14 }
 0xd44   : > { %v4757_v21 = vadd.f32 %v3772_v17, %v2119_v18 }
 0xd46   : > { %v4762_v23 = vpack.c.bf16 %v4757_v21, %v4755_v19 }
 0xd48   : > { %4112 = vmatmul.mubr.msk.bf16.vlgmr.msra.gmra.mrb[32].mxu0 %vm830_vm0, %v4762_v23  ;;  %4128 = vmatmul.mubr.msk.bf16.vlgmr.msra.gmra.mrb[40].mxu1 %vm830_vm0, %v4762_v23 }
 0xd49   : > { %4116 = vmatpush3.bf16.msra.mxu0 %v4283_v22  ;;  %4119 = vmatprep.mubr.msk.bf16.mxu0 %vm4368_vm1, %v4367_v16 }
 0xd4a   : > { %4117 = vmatprep.subr.bf16.mxu0 %v4367_v16  ;;  %4139 = vmatprep.mubr.msk.bf16.mxu1 %vm4368_vm1, %v4367_v16 }
 0xd4d   : > { %4118 = vmatpush3.bf16.msra.mxu0 %v4284_v25 }
 0xd4e   : > { %4131 = vmatprep.subr.bf16.mxu0 %v4367_v16 }
 0xd50   : > { %4120 = vmatmul.mubr.msk.bf16.vlgmr.msra.gmra.mrb[36].mxu0 %vm830_vm0, %v4762_v23 }
 0xd51   : > { %4133 = vmatprep.mubr.msk.bf16.mxu0 %vm4368_vm1, %v4367_v16 }
 0xe1b   : > { %v2191_v26 = vpop.f32.mrb[32].mxu0  ;;  %v2323_v27 = vpop.f32.mrb[40].mxu1 }
 0xe1c   : > { %v4113_v63 = vpop.f32.mrb[33].mxu0  ;;  %v4129_v2 = vpop.f32.mrb[41].mxu1  ;;  %v2324_v44 = vadd.f32 %v3796_v38, %v2323_v27  ;;  %v2192_v47 = vadd.f32 %v3778_v43, %v2191_v26 }
 0xe1d   : > { %v2194_v3 = vpop.f32.mrb[34].mxu0  ;;  %v2326_v28 = vpop.f32.mrb[42].mxu1  ;;  %v4285_v63 = vld [vmem:[%s4479_s1 + $0x70] sm:$0xff]  }
 0xe1e   : > { %v4114_v29 = vpop.f32.mrb[35].mxu0  ;;  %v4130_v30 = vpop.f32.mrb[43].mxu1  ;;  %v2327_v48 = vadd.f32 %v3796_v38, %v2326_v28  ;;  %v2454_v50 = vpack.c.bf16 %v2324_v44, %v2324_v44  ;;  %v2195_v33 = vadd.f32 %v3778_v43, %v2194_v3  ;;  %v2330_v51 = vpack.c.bf16 %v2192_v47, %v2192_v47  ;;  %v4286_v28 = vld [vmem:[%s4479_s1 + $0x90] sm:$0xff]  }
 0xe1f   : > { %v4287_v30 = vld [vmem:[%s4479_s1 + $0x78] sm:$0xff]  }
 0xe20   : > { %v2455_v52 = vpack.c.bf16 %v2327_v48, %v2327_v48  ;;  %v2460_v34 = vsel %vm1241_vm3, %v2454_v50, 0  ;;  %v2331_v53 = vpack.c.bf16 %v2195_v33, %v2195_v33 }
 0xe22   : > { %v2506_v54 = vsel %vm1241_vm3, %v2455_v52, 0 }
 0xe23   : > { %v2257_v32 = vpop.f32.mrb[36].mxu0 }
 0xe24   : > { %v2258_v35 = vadd.f32 %v3787_v31, %v2257_v32  ;;  %v4121_v37 = vpop.f32.mrb[37].mxu0  ;;  %v4289_v32 = vld [vmem:[%s4479_s1 + $0xb0] sm:$0xff]  }
 0xe25   : > { %v2260_v39 = vpop.f32.mrb[38].mxu0 }
 0xe26   : > { %v2332_v40 = vpack.c.bf16 %v2258_v35, %v2258_v35  ;;  %v2261_v41 = vadd.f32 %v3787_v31, %v2260_v39  ;;  %v4122_v42 = vpop.f32.mrb[39].mxu0  ;;  %v4288_v31 = vld [vmem:[%s4479_s1 + $0x98] sm:$0xff]  }
 0xe27   : > { %v4290_v35 = vld [vmem:[%s4479_s1 + $0xb8] sm:$0xff]   ;;  %s762_s1 = scalar_lea.vmem %s4925_s2, %s4561_s22 }
 0xe28   : > { %v2338_v45 = vsel %vm1081_vm2, %v2332_v40, 0  ;;  %v2333_v46 = vpack.c.bf16 %v2261_v41, %v2261_v41 }
 0xe29   : > { %4132 = vmatpush3.bf16.xpose.msra.mxu0 %v2338_v45 }
 0xe2a   : > { %v2384_v49 = vsel %vm1081_vm2, %v2333_v46, 0  ;;  %4143 = vmatprep.subr.bf16.mxu0 %v4367_v16 }
 0xe2b   : > { %4138 = vmatpush3.bf16.xpose.msra.mxu1 %v2384_v49 }
 0xe2c   : > { %4149 = vmatprep.subr.bf16.mxu1 %v4367_v16 }
 0xe30   : > { %4134 = vmatmul.mubr.msk.bf16.vlgmr.msra.gmra.mrb[40].mxu0 %vm1081_vm2, %v2330_v51 }
 0xe31   : > { %4144 = vmatpush3.bf16.msra.mxu0 %v2460_v34  ;;  %4145 = vmatprep.mubr.msk.bf16.mxu0 %vm4368_vm1, %v4367_v16 }
 0xe32   : > { %4140 = vmatmul.mubr.msk.bf16.vlgmr.msra.gmra.mrb[44].mxu1 %vm1081_vm2, %v2331_v53  ;;  %4155 = vmatprep.subr.bf16.mxu0 %v4367_v16 }
 0xe33   : > { %4150 = vmatpush3.bf16.msra.mxu1 %v2506_v54  ;;  %4151 = vmatprep.mubr.msk.bf16.mxu1 %vm4368_vm1, %v4367_v16 }
 0xe34   : > { %4163 = vmatprep.subr.bf16.mxu1 %v4367_v16 }
 0xf03   : > { %v2374_v55 = vpop.f32.mrb[40].mxu0 }
 0xf04   : > { %v2426_v56 = vmul.f32 0.25, %v2374_v55  ;;  %v4135_v57 = vpop.f32.mrb[41].mxu0  ;;  %v3811_v55 = vld [vmem:[%s4541_s21 + $0x7] ss:$0 sm:$0xff] }
 0xf05   : > { %v2377_v58 = vpop.f32.mrb[42].mxu0  ;;  %v2420_v59 = vpop.f32.mrb[44].mxu1 }
 0xf06   : > { %v2427_v60 = vmul.f32 0.25, %v2420_v59  ;;  %v4136_v61 = vpop.f32.mrb[43].mxu0  ;;  %v4141_v62 = vpop.f32.mrb[45].mxu1  ;;  %v2428_v0 = vadd.f32 %v2426_v56, %v4567_v20  ;;  %v3829_v56 = vld [vmem:[%s4541_s21 + $0xb] ss:$0 sm:$0xff] }
 0xf07   : > { %v2423_v1 = vpop.f32.mrb[46].mxu1 }
 0xf08   : > { %v4142_v4 = vpop.f32.mrb[47].mxu1  ;;  %v2430_v5 = vsel %vm1211_vm4, %v2428_v0, -inf  ;;  %v2429_v6 = vadd.f32 %v2427_v60, %v4569_v24 }
 0xf09   : > { %2431 = vmax.xlane.f32.xlu1 %v2430_v5 }
 0xf0a   : > { %v2433_v7 = vsel %vm1211_vm4, %v2429_v6, -inf }
 0xf0b   : > { %2434 = vmax.xlane.f32.xlu0 %v2433_v7 }
 0xf96   : > { %v2432_v8 = vpop.xlane.xlu1 %2431 }
 0xf97   : > { %v2436_v36 = vsub.f32 %v2428_v0, %v2432_v8 }
 0xf98   : > { %v2435_v9 = vpop.xlane.xlu0 %2434 }
 0xf99   : > { %v2438_v10 = vmul.f32 1.442695, %v2436_v36  ;;  %v2437_v11 = vsub.f32 %v2429_v6, %v2435_v9 }
 0xf9b   : > { %4331 = vpow2.f32 %v2438_v10  ;;  %v2440_v12 = vmul.f32 1.442695, %v2437_v11 }
 0xf9d   : > { %4333 = vpow2.f32 %v2440_v12 }
 0xfa5   : > { %v4332_v13 = vpop.eup %4331 }
 0xfa6   : > { %v2442_v14 = vsel %vm1211_vm4, %v4332_v13, 0.0 }
 0xfa7   : > { %v4334_v15 = vpop.eup %4333  ;;  %2443 = vadd.xlane.f32.xlu1 %v2442_v14 }
 0xfa8   : > { %v2445_v17 = vsel %vm1211_vm4, %v4334_v15, 0.0 }
 0xfa9   : > { %2446 = vadd.xlane.f32.xlu0 %v2445_v17 }
0x1034   : > { %v2444_v18 = vpop.xlane.xlu1 %2443 }
0x1035   : > { %4335 = vrcp.f32 %v2444_v18 }
0x1036   : > { %v2447_v22 = vpop.xlane.xlu0 %2446 }
0x1037   : > { %4337 = vrcp.f32 %v2447_v22 }
0x103f   : > { %v4336_v25 = vpop.eup %4335 }
0x1040   : > { %v2449_v26 = vmul.f32 %v4336_v25, %v4332_v13 }
0x1041   : > { %v4338_v27 = vpop.eup %4337 }
0x1042   : > { %v2451_v2 = vmul.f32 %v4338_v27, %v4334_v15  ;;  %v2452_v3 = vpack.c.bf16 %v2449_v26, %v2449_v26 }
0x1044   : > { %4146 = vmatmul.mubr.msk.bf16.vlgmr.msra.gmra.mrb[44].mxu0 %vm1211_vm4, %v2452_v3  ;;  %v2453_v29 = vpack.c.bf16 %v2451_v2, %v2451_v2 }
0x1045   : > { %4156 = vmatpush3.bf16.msra.mxu0 %v4285_v63  ;;  %4159 = vmatprep.mubr.msk.bf16.mxu0 %vm4368_vm1, %v4367_v16 }
0x1046   : > { %4152 = vmatmul.mubr.msk.bf16.vlgmr.msra.gmra.mrb[48].mxu1 %vm1211_vm4, %v2453_v29  ;;  %4157 = vmatprep.subr.bf16.mxu0 %v4367_v16 }
0x1047   : > { %4164 = vmatpush3.bf16.msra.mxu1 %v4286_v28  ;;  %4167 = vmatprep.mubr.msk.bf16.mxu1 %vm4368_vm1, %v4367_v16 }
0x1048   : > { %4165 = vmatprep.subr.bf16.mxu1 %v4367_v16 }
0x1049   : > { %4158 = vmatpush3.bf16.msra.mxu0 %v4287_v30 }
0x104a   : > { %4171 = vmatprep.subr.bf16.mxu0 %v4367_v16 }
0x104b   : > { %4166 = vmatpush3.bf16.msra.mxu1 %v4288_v31 }
0x104c   : > { %4160 = vmatmul.mubr.msk.bf16.vlgmr.msra.gmra.mrb[48].mxu0 %vm830_vm0, %v4762_v23  ;;  %4179 = vmatprep.subr.bf16.mxu1 %v4367_v16 }
0x104d   : > { %4172 = vmatpush3.bf16.msra.mxu0 %v4289_v32  ;;  %4175 = vmatprep.mubr.msk.bf16.mxu0 %vm4368_vm1, %v4367_v16 }
0x104e   : > { %4168 = vmatmul.mubr.msk.bf16.vlgmr.msra.gmra.mrb[52].mxu1 %vm830_vm0, %v4762_v23  ;;  %4173 = vmatprep.subr.bf16.mxu0 %v4367_v16 }
0x104f   : > { %4181 = vmatprep.mubr.msk.bf16.mxu1 %vm4368_vm1, %v4367_v16 }
0x1051   : > { %4174 = vmatpush3.bf16.msra.mxu0 %v4290_v35 }
0x1052   : > { %4185 = vmatprep.subr.bf16.mxu0 %v4367_v16 }
0x1054   : > { %4176 = vmatmul.mubr.msk.bf16.vlgmr.msra.gmra.mrb[52].mxu0 %vm830_vm0, %v4762_v23  ;;  %v3820_v23 = vld [vmem:[%s4541_s21 + $0x9] ss:$0 sm:$0xff] }
0x1055   : > { %4187 = vmatprep.mubr.msk.bf16.mxu0 %vm4368_vm1, %v4367_v16 }
0x1117   : > { %v4832_v37 = vpop.f32.mrb[44].mxu0 }
0x1118   : > { %v4147_v38 = vpop.f32.mrb[45].mxu0 }
0x1119   : > { %v2499_v39 = vpop.f32.mrb[46].mxu0  ;;  %v4834_v40 = vpop.f32.mrb[48].mxu1 }
0x111a   : > { %v2551_v41 = vpack.c.bf16 %v4834_v40, %v4832_v37  ;;  %v4148_v42 = vpop.f32.mrb[47].mxu0  ;;  %v4153_v43 = vpop.f32.mrb[49].mxu1 }
0x111b   : > { %v2545_v44 = vpop.f32.mrb[50].mxu1 }
0x111c   : > { %v4154_v45 = vpop.f32.mrb[51].mxu1 }
0x111f   : > { %v2611_v46 = vpop.f32.mrb[48].mxu0 }
0x1120   : > { %v4161_v47 = vpop.f32.mrb[49].mxu0  ;;  %v2612_v60 = vadd.f32 %v3811_v55, %v2611_v46 }
0x1121   : > { %v2614_v48 = vpop.f32.mrb[50].mxu0  ;;  %v2677_v49 = vpop.f32.mrb[52].mxu1 }
0x1122   : > { %v2678_v50 = vadd.f32 %v3820_v23, %v2677_v49  ;;  %v4162_v33 = vpop.f32.mrb[51].mxu0  ;;  %v4169_v51 = vpop.f32.mrb[53].mxu1  ;;  %v2615_v4 = vadd.f32 %v3811_v55, %v2614_v48  ;;  %v2750_v8 = vpack.c.bf16 %v2612_v60, %v2612_v60  ;;  %v4291_v49 = vld [vmem:[%s4642_s19 + $0x10] sm:$0xff]  }
0x1123   : > { %v2680_v52 = vpop.f32.mrb[54].mxu1  ;;  %v4292_v33 = vld [vmem:[%s4642_s19 + $0x18] sm:$0xff]   ;;  %s824_s19 = scalar_lea.vmem %s4940_s17, %s4561_s22 }
0x1124   : > { %v2752_v34 = vpack.c.bf16 %v2678_v50, %v2678_v50  ;;  %v2681_v53 = vadd.f32 %v3820_v23, %v2680_v52  ;;  %v4170_v54 = vpop.f32.mrb[55].mxu1  ;;  %v2751_v9 = vpack.c.bf16 %v2615_v4, %v2615_v4 }
0x1126   : > { %v2758_v57 = vsel %vm1081_vm2, %v2752_v34, 0  ;;  %v2753_v58 = vpack.c.bf16 %v2681_v53, %v2681_v53 }
0x1127   : > { %v2743_v59 = vpop.f32.mrb[52].mxu0  ;;  %4180 = vmatpush3.bf16.xpose.msra.mxu1 %v2758_v57 }
0x1128   : > { %v2804_v61 = vsel %vm1081_vm2, %v2753_v58, 0  ;;  %v2744_v62 = vadd.f32 %v3829_v56, %v2743_v59  ;;  %v4177_v0 = vpop.f32.mrb[53].mxu0  ;;  %4191 = vmatprep.subr.bf16.mxu1 %v4367_v16 }
0x1129   : > { %v2746_v1 = vpop.f32.mrb[54].mxu0  ;;  %4186 = vmatpush3.bf16.xpose.msra.mxu0 %v2804_v61 }
0x112a   : > { %v2874_v5 = vpack.c.bf16 %v2744_v62, %v2744_v62  ;;  %v2747_v6 = vadd.f32 %v3829_v56, %v2746_v1  ;;  %v4178_v7 = vpop.f32.mrb[55].mxu0  ;;  %4197 = vmatprep.subr.bf16.mxu0 %v4367_v16  ;;  %v3844_v1 = vld [vmem:[%s4667_s27 + $0x1] ss:$0 sm:$0xff] }
0x112c   : > { %v2875_v36 = vpack.c.bf16 %v2747_v6, %v2747_v6  ;;  %v2880_v10 = vsel %vm1241_vm3, %v2874_v5, 0 }
0x112e   : > { %4182 = vmatmul.mubr.msk.bf16.vlgmr.msra.gmra.mrb[56].mxu1 %vm1081_vm2, %v2750_v8  ;;  %v2926_v11 = vsel %vm1241_vm3, %v2875_v36, 0 }
0x112f   : > { %4192 = vmatpush3.bf16.msra.mxu1 %v2880_v10  ;;  %4193 = vmatprep.mubr.msk.bf16.mxu1 %vm4368_vm1, %v4367_v16 }
0x1130   : > { %4188 = vmatmul.mubr.msk.bf16.vlgmr.msra.gmra.mrb[56].mxu0 %vm1081_vm2, %v2751_v9  ;;  %4203 = vmatprep.subr.bf16.mxu1 %v4367_v16 }
0x1131   : > { %4198 = vmatpush3.bf16.msra.mxu0 %v2926_v11  ;;  %4199 = vmatprep.mubr.msk.bf16.mxu0 %vm4368_vm1, %v4367_v16 }
0x1132   : > { %4209 = vmatprep.subr.bf16.mxu0 %v4367_v16 }
0x1201   : > { %v2794_v12 = vpop.f32.mrb[56].mxu1 }
0x1202   : > { %v2846_v13 = vmul.f32 0.25, %v2794_v12  ;;  %v4183_v14 = vpop.f32.mrb[57].mxu1 }
0x1203   : > { %v2797_v15 = vpop.f32.mrb[58].mxu1  ;;  %v2840_v17 = vpop.f32.mrb[56].mxu0 }
0x1204   : > { %v2847_v18 = vmul.f32 0.25, %v2840_v17  ;;  %v4184_v22 = vpop.f32.mrb[59].mxu1  ;;  %v4189_v25 = vpop.f32.mrb[57].mxu0  ;;  %v2848_v26 = vadd.f32 %v2846_v13, %v4567_v20 }
0x1205   : > { %v2843_v27 = vpop.f32.mrb[58].mxu0  ;;  %v4293_v25 = vld [vmem:[%s4681_s30 + $0x10] sm:$0xff]  }
0x1206   : > { %v4190_v63 = vpop.f32.mrb[59].mxu0  ;;  %v2850_v2 = vsel %vm1211_vm4, %v2848_v26, -inf  ;;  %v2849_v3 = vadd.f32 %v2847_v18, %v4569_v24 }
0x1207   : > { %2851 = vmax.xlane.f32.xlu0 %v2850_v2 }
0x1208   : > { %v2853_v28 = vsel %vm1211_vm4, %v2849_v3, -inf }
0x1209   : > { %2854 = vmax.xlane.f32.xlu1 %v2853_v28 }
0x1294   : > { %v2852_v29 = vpop.xlane.xlu0 %2851 }
0x1295   : > { %v2856_v30 = vsub.f32 %v2848_v26, %v2852_v29  ;;  %v4294_v26 = vld [vmem:[%s4681_s30 + $0x18] sm:$0xff]  }
0x1296   : > { %v2855_v31 = vpop.xlane.xlu1 %2854 }
0x1297   : > { %v2858_v32 = vmul.f32 1.442695, %v2856_v30  ;;  %v2857_v35 = vsub.f32 %v2849_v3, %v2855_v31  ;;  %v3847_v31 = vld [vmem:[%s4691_s18 + $0x1] ss:$0 sm:$0xff] }
0x1299   : > { %4339 = vpow2.f32 %v2858_v32  ;;  %v2860_v38 = vmul.f32 1.442695, %v2857_v35 }
0x129b   : > { %4341 = vpow2.f32 %v2860_v38 }
0x12a3   : > { %v4340_v20 = vpop.eup %4339 }
0x12a4   : > { %v2862_v39 = vsel %vm1211_vm4, %v4340_v20, 0.0 }
0x12a5   : > { %v4342_v42 = vpop.eup %4341  ;;  %2863 = vadd.xlane.f32.xlu0 %v2862_v39  ;;  %v3848_v39 = vld [vmem:[%s4698_s28 + $0x1] ss:$0 sm:$0xff] }
0x12a6   : > { %v2865_v24 = vsel %vm1211_vm4, %v4342_v42, 0.0 }
0x12a7   : > { %2866 = vadd.xlane.f32.xlu1 %v2865_v24 }
0x1332   : > { %v2864_v43 = vpop.xlane.xlu0 %2863 }
0x1333   : > { %4343 = vrcp.f32 %v2864_v43 }
0x1334   : > { %v2867_v44 = vpop.xlane.xlu1 %2866 }
0x1335   : > { %4345 = vrcp.f32 %v2867_v44 }
0x133d   : > { %v4344_v45 = vpop.eup %4343 }
0x133e   : > { %v2869_v46 = vmul.f32 %v4344_v45, %v4340_v20  ;;  %v4295_v45 = vld [vmem:[%s4487_s23 + $0x20] sm:$0xff]  }
0x133f   : > { %v4346_v23 = vpop.eup %4345 }
0x1340   : > { %v2871_v47 = vmul.f32 %v4346_v23, %v4342_v42  ;;  %v2872_v48 = vpack.c.bf16 %v2869_v46, %v2869_v46  ;;  %v4296_v46 = vld [vmem:[%s4487_s23 + $0x28] sm:$0xff]   ;;  %v4297_v23 = vld [vmem:[%s4487_s23 + $0x30] sm:$0xff]  }
0x1342   : > { %4194 = vmatmul.mubr.msk.bf16.vlgmr.msra.gmra.mrb[60].mxu1 %vm1211_vm4, %v2872_v48  ;;  %v2873_v50 = vpack.c.bf16 %v2871_v47, %v2871_v47  ;;  %v4298_v47 = vld [vmem:[%s4487_s23 + $0x38] sm:$0xff]   ;;  %v3854_v48 = vld [vmem:[%s4716_s0 + $0x1] ss:$0 sm:$0xff] }
0x1343   : > { %4205 = vmatprep.mubr.msk.bf16.mxu1 %vm4368_vm1, %v4367_v16  ;;  %4204 = vmatpush3.bf16.msra.mxu1 %v4292_v33 }
0x1344   : > { %4200 = vmatmul.mubr.msk.bf16.vlgmr.msra.gmra.mrb[60].mxu0 %vm1211_vm4, %v2873_v50  ;;  %4215 = vmatprep.subr.bf16.mxu1 %v4367_v16 }
0x1345   : > { %4210 = vmatpush3.bf16.msra.mxu0 %v4291_v49  ;;  %4211 = vmatprep.mubr.msk.bf16.mxu0 %vm4368_vm1, %v4367_v16 }
0x1346   : > { %4223 = vmatprep.subr.bf16.mxu0 %v4367_v16 }
0x134c   : > { %4212 = vmatmul.mubr.msk.bf16.vlgmr.msra.gmra.mrb[64].mxu0 %vm1081_vm2, %v2551_v41 }
0x134d   : > { %4231 = vmatprep.mubr.msk.bf16.mxu0 %vm4368_vm1, %v4367_v16  ;;  %4224 = vmatpush3.bf16.msra.mxu0 %v4295_v45  ;;  %v3876_v45 = vld [vmem:[%s4752_s5 + $0x1] ss:$0 sm:$0xff] }
0x134e   : > { %4225 = vmatprep.subr.bf16.mxu0 %v4367_v16 }
0x1351   : > { %4226 = vmatpush3.bf16.msra.mxu0 %v4296_v46 }
0x1352   : > { %4227 = vmatprep.subr.bf16.mxu0 %v4367_v16 }
0x1355   : > { %4228 = vmatpush3.bf16.msra.mxu0 %v4297_v23 }
0x1356   : > { %4229 = vmatprep.subr.bf16.mxu0 %v4367_v16 }
0x1359   : > { %4230 = vmatpush3.bf16.msra.mxu0 %v4298_v47 }
0x1415   : > { %v2916_v51 = vpop.f32.mrb[60].mxu1 }
0x1416   : > { %v4195_v52 = vpop.f32.mrb[61].mxu1 }
0x1417   : > { %v2919_v34 = vpop.f32.mrb[62].mxu1  ;;  %v2962_v53 = vpop.f32.mrb[60].mxu0 }
0x1418   : > { %v2971_v54 = vpack.c.bf16 %v2962_v53, %v2916_v51  ;;  %v4196_v55 = vpop.f32.mrb[63].mxu1  ;;  %v4201_v56 = vpop.f32.mrb[61].mxu0 }
0x1419   : > { %v2965_v57 = vpop.f32.mrb[62].mxu0 }
0x141a   : > { %v4202_v58 = vpop.f32.mrb[63].mxu0  ;;  %4206 = vmatmul.mubr.msk.bf16.vlgmr.msra.gmra.mrb[64].mxu1 %vm1081_vm2, %v2971_v54 }
0x141b   : > { %4219 = vmatprep.mubr.msk.bf16.mxu1 %vm4368_vm1, %v4367_v16  ;;  %4216 = vmatpush3.bf16.msra.mxu1 %v4293_v25 }
0x141c   : > { %4217 = vmatprep.subr.bf16.mxu1 %v4367_v16 }
0x141f   : > { %v3065_v37 = vpop.f32.mrb[64].mxu0  ;;  %4218 = vmatpush3.bf16.msra.mxu1 %v4294_v26 }
0x1420   : > { %v4213_v40 = vpop.f32.mrb[65].mxu0 }
0x1421   : > { %v3068_v41 = vpop.f32.mrb[66].mxu0 }
0x1422   : > { %v4214_v59 = vpop.f32.mrb[67].mxu0 }
0x14ed   : > { %v3015_v60 = vpop.f32.mrb[64].mxu1 }
0x14ee   : > { %v3066_v61 = vadd.f32 %v3065_v37, %v3015_v60  ;;  %v4207_v62 = vpop.f32.mrb[65].mxu1 }
0x14ef   : > { %v3018_v0 = vpop.f32.mrb[66].mxu1 }
0x14f0   : > { %v3072_v4 = vadd.f32 %v3066_v61, %v4755_v19  ;;  %v3069_v5 = vadd.f32 %v3068_v41, %v3018_v0  ;;  %v4208_v6 = vpop.f32.mrb[67].mxu1 }
0x14f2   : > { %v3073_v7 = vadd.f32 %v3069_v5, %v4757_v21  ;;  %v3082_v8 = vadd.f32 %v3844_v1, %v3072_v4 }
0x14f4   : > { %v3088_v36 = vsel %vm830_vm0, %v3082_v8, 0.0  ;;  %v3083_v9 = vadd.f32 %v3844_v1, %v3073_v7 }
0x14f5   : > { %3089 = vadd.xlane.f32.xlu0 %v3088_v36 }
0x14f6   : > { %v3091_v10 = vsel %vm830_vm0, %v3083_v9, 0.0 }
0x14f7   : > { %3092 = vadd.xlane.f32.xlu1 %v3091_v10 }
0x1582   : > { %v3090_v11 = vpop.xlane.xlu0 %3089 }
0x1583   : > { %v3094_v12 = vmul.f32 0.03125, %v3090_v11 }
0x1584   : > { %v3093_v13 = vpop.xlane.xlu1 %3092 }
0x1585   : > { %v3096_v14 = vsub.f32 %v3082_v8, %v3094_v12  ;;  %v3095_v15 = vmul.f32 0.03125, %v3093_v13  ;;  %v3872_v8 = vld [vmem:[%s4726_s29 + $0x1] ss:$0 sm:$0xff] }
0x1587   : > { %v3097_v19 = vsub.f32 %v3083_v9, %v3095_v15  ;;  %v3098_v17 = vmul.f32 %v3096_v14, %v3096_v14 }
0x1589   : > { %v3100_v18 = vsel %vm830_vm0, %v3098_v17, 0.0  ;;  %v3099_v21 = vmul.f32 %v3097_v19, %v3097_v19 }
0x158a   : > { %3101 = vadd.xlane.f32.xlu0 %v3100_v18 }
0x158b   : > { %v3103_v22 = vsel %vm830_vm0, %v3099_v21, 0.0 }
0x158c   : > { %3104 = vadd.xlane.f32.xlu1 %v3103_v22 }
0x1617   : > { %v3102_v27 = vpop.xlane.xlu0 %3101 }
0x1618   : > { %v3106_v63 = vmul.f32 0.03125, %v3102_v27 }
0x1619   : > { %v3105_v2 = vpop.xlane.xlu1 %3104 }
0x161a   : > { %v3108_v3 = vadd.f32 1e-12, %v3106_v63  ;;  %v3107_v28 = vmul.f32 0.03125, %v3105_v2 }
0x161c   : > { %4347 = vrsqrt.f32 %v3108_v3  ;;  %v3109_v29 = vadd.f32 1e-12, %v3107_v28  ;;  %v4370_v28 = vmov 0.0|0.0  }
0x161d   : > { %4242 = vmatprep.subr.bf16.mxu1 %v4370_v28 }
0x161e   : > { %4349 = vrsqrt.f32 %v3109_v29 }
0x1626   : > { %v4348_v30 = vpop.eup %4347 }
0x1627   : > { %v3112_v32 = vmul.f32 %v4348_v30, %v3096_v14 }
0x1628   : > { %v4350_v35 = vpop.eup %4349 }
0x1629   : > { %v3120_v38 = vmul.f32 %v3847_v31, %v3112_v32  ;;  %v3113_v20 = vmul.f32 %v4350_v35, %v3097_v19 }
0x162b   : > { %v3121_v42 = vmul.f32 %v3847_v31, %v3113_v20  ;;  %v3128_v24 = vadd.f32 %v3848_v39, %v3120_v38 }
0x162d   : > { %v3129_v43 = vadd.f32 %v3848_v39, %v3121_v42  ;;  %v3875_v39 = vld [vmem:[%s4745_s26 + $0x1] ss:$0 sm:$0xff] }
0x162f   : > { %v3135_v44 = vpack.c.bf16 %v3129_v43, %v3128_v24 }
0x1631   : > { %4220 = vmatmul.mubr.msk.bf16.vlgmr.msra.gmra.mrb[68].mxu1 %vm830_vm0, %v3135_v44 }
0x1632   : > { %4239 = vmatprep.mubr.msk.f32.mxu1 %vm4368_vm1, %v4367_v16 }
0x1704   : > { %v3193_v49 = vpop.f32.mrb[68].mxu1 }
0x1705   : > { %v3194_v50 = vadd.f32 %v3854_v48, %v3193_v49  ;;  %v4221_v33 = vpop.f32.mrb[69].mxu1  ;;  %v3354_v49 = vld [vmem:[%s762_s1] sm:$0x3] }
0x1706   : > { %v3196_v51 = vpop.f32.mrb[70].mxu1 }
0x1707   : > { %v3200_v52 = vmul.f32 %v3194_v50, %v3194_v50  ;;  %v3197_v34 = vadd.f32 %v3854_v48, %v3196_v51  ;;  %v4222_v53 = vpop.f32.mrb[71].mxu1 }
0x1709   : > { %v3202_v54 = vmul.f32 %v3200_v52, %v3194_v50  ;;  %v3201_v55 = vmul.f32 %v3197_v34, %v3197_v34 }
0x170b   : > { %v3204_v56 = vmul.f32 0.044715, %v3202_v54  ;;  %v3203_v57 = vmul.f32 %v3201_v55, %v3197_v34 }
0x170d   : > { %v3206_v58 = vadd.f32 %v3204_v56, %v3194_v50  ;;  %v3205_v37 = vmul.f32 0.044715, %v3203_v57 }
0x170f   : > { %v3208_v40 = vmul.f32 0.7978846, %v3206_v58  ;;  %v3207_v41 = vadd.f32 %v3205_v37, %v3197_v34 }
0x1711   : > { %4351 = vtanh.f32 %v3208_v40  ;;  %v3209_v16 = vmul.f32 0.7978846, %v3207_v41 }
0x1713   : > { %4353 = vtanh.f32 %v3209_v16 }
0x171b   : > { %v4352_v59 = vpop.eup %4351 }
0x171c   : > { %v3212_v60 = vadd.f32 1.0, %v4352_v59 }
0x171d   : > { %v4354_v61 = vpop.eup %4353 }
0x171e   : > { %v3214_v62 = vmul.f32 0.5, %v3212_v60  ;;  %v3213_v0 = vadd.f32 1.0, %v4354_v61 }
0x1720   : > { %v3215_v1 = vmul.f32 0.5, %v3213_v0  ;;  %v3216_v4 = vmul.f32 %v3214_v62, %v3194_v50 }
0x1722   : > { %v3217_v5 = vmul.f32 %v3215_v1, %v3197_v34 }
0x1724   : > { %v3227_v6 = vpack.c.bf16 %v3217_v5, %v3216_v4 }
0x1726   : > { %4232 = vmatmul.mubr.msk.bf16.vlgmr.msra.gmra.mrb[68].mxu0 %vm2028_vm5, %v3227_v6 }
0x17f9   : > { %v3289_v7 = vpop.f32.mrb[68].mxu0 }
0x17fa   : > { %v3296_v36 = vadd.f32 %v3289_v7, %v3128_v24  ;;  %v4233_v9 = vpop.f32.mrb[69].mxu0 }
0x17fb   : > { %v3292_v10 = vpop.f32.mrb[70].mxu0 }
0x17fc   : > { %v3297_v11 = vadd.f32 %v3292_v10, %v3129_v43  ;;  %v4234_v12 = vpop.f32.mrb[71].mxu0  ;;  %v3306_v13 = vadd.f32 %v3872_v8, %v3296_v36 }
0x17fe   : > { %v3312_v14 = vsel %vm830_vm0, %v3306_v13, 0.0  ;;  %v3307_v15 = vadd.f32 %v3872_v8, %v3297_v11 }
0x17ff   : > { %3313 = vadd.xlane.f32.xlu0 %v3312_v14 }
0x1800   : > { %v3315_v19 = vsel %vm830_vm0, %v3307_v15, 0.0 }
0x1801   : > { %3316 = vadd.xlane.f32.xlu1 %v3315_v19 }
0x188c   : > { %v3314_v17 = vpop.xlane.xlu0 %3313 }
0x188d   : > { %v3318_v18 = vmul.f32 0.03125, %v3314_v17 }
0x188e   : > { %v3317_v21 = vpop.xlane.xlu1 %3316 }
0x188f   : > { %v3320_v22 = vsub.f32 %v3306_v13, %v3318_v18  ;;  %v3319_v25 = vmul.f32 0.03125, %v3317_v21 }
0x1891   : > { %v3321_v26 = vsub.f32 %v3307_v15, %v3319_v25  ;;  %v3322_v27 = vmul.f32 %v3320_v22, %v3320_v22 }
0x1893   : > { %v3324_v63 = vsel %vm830_vm0, %v3322_v27, 0.0  ;;  %v3323_v2 = vmul.f32 %v3321_v26, %v3321_v26 }
0x1894   : > { %3325 = vadd.xlane.f32.xlu0 %v3324_v63 }
0x1895   : > { %v3327_v3 = vsel %vm830_vm0, %v3323_v2, 0.0 }
0x1896   : > { %3328 = vadd.xlane.f32.xlu1 %v3327_v3 }
0x1921   : > { %v3326_v29 = vpop.xlane.xlu0 %3325 }
0x1922   : > { %v3330_v30 = vmul.f32 0.03125, %v3326_v29 }
0x1923   : > { %v3329_v31 = vpop.xlane.xlu1 %3328 }
0x1924   : > { %v3332_v32 = vadd.f32 1e-12, %v3330_v30  ;;  %v3331_v35 = vmul.f32 0.03125, %v3329_v31 }
0x1926   : > { %4355 = vrsqrt.f32 %v3332_v32  ;;  %v3333_v38 = vadd.f32 1e-12, %v3331_v35 }
0x1928   : > { %4357 = vrsqrt.f32 %v3333_v38 }
0x1930   : > { %v4356_v20 = vpop.eup %4355 }
0x1931   : > { %v3336_v42 = vmul.f32 %v4356_v20, %v3320_v22 }
0x1932   : > { %v4358_v24 = vpop.eup %4357 }
0x1933   : > { %v3337_v43 = vmul.f32 %v4358_v24, %v3321_v26  ;;  %v3344_v44 = vmul.f32 %v3875_v39, %v3336_v42 }
0x1935   : > { %v3345_v46 = vmul.f32 %v3875_v39, %v3337_v43  ;;  %v3352_v23 = vadd.f32 %v3876_v45, %v3344_v44 }
0x1937   : > { %v3353_v47 = vadd.f32 %v3876_v45, %v3345_v46 }
0x1939   : > { %v4243_v48 = vpack.c.bf16 %v3353_v47, %v3352_v23 }
0x193b   : > { %4244 = vmatpush3.bf16.msra.mxu1 %v4243_v48 }
0x193e   : > { %4240 = vmatmul.mubr.msk.f32.vlgmr.msra.gmra.mrb[72].mxu1 %vm1081_vm2, %v3354_v49 }
0x1a11   : > { %v3424_v50 = vpop.f32.mrb[72].mxu1 }
0x1a12   : > { %3429 = vst.msk [vmem:[%s824_s19] sm:$0x3] %vm3428_vm6, %v3424_v50  ;;  %v4241_v33 = vpop.f32.mrb[73].mxu1 }
0x1a13 PF: > { %s27_s24 = sadd.s32 1, %s4365_s24  }
0x1a14   : > { %p24_p4 = scmp.ge.s32.totalorder %s27_s24, 4  }
0x1a16   :  { %26 = sbr.rel (!%p24_p4) target bundleno = 6 (0x6), region = 200 }

</bundles_post_ra>
